<compile_context>
chip_gen: v5e
topology: v5e:2x2
jax: 0.10.0
libtpu: 0.0.40
codegen_flags: <defaults>
</compile_context>

<pallas_src>
import functools
import math

import jax
import jax.numpy as jnp
from jax.experimental import pallas as pl
from jax.experimental.pallas import tpu as pltpu


# ----------------------------------------------------------------------------
# Fused ResBlock kernel (block of Nb images per grid step)
# ----------------------------------------------------------------------------
def _resblock_kernel(x_ref, w1_ref, b1_ref, w2_ref, b2_ref, o_ref,
                     hpad_ref, patch_ref, *, Nb, H, W, C, CH):
    """Per grid step:

    x_ref    : (Nb, H, W, C)       f32  raw input (pre-ReLU, unpadded)
    w1_ref   : (9*C, CH)           bf16 3x3 taps packed (kh, kw, c) row-major
    b1_ref   : (1, CH)             f32
    w2_ref   : (CH, C)             bf16 1x1 conv as a plain matmul
    b2_ref   : (1, C)              f32
    o_ref    : (Nb, H, W, C)       f32
    hpad_ref : (Nb, H+2, W+2, C)   bf16 VMEM scratch: zero-padded ReLU'd slab
    patch_ref: (Nb*H*W, 9*C)       bf16 VMEM scratch: im2col patch matrix
    """
    M = Nb * H * W
    cdt = hpad_ref.dtype  # MXU operand dtype (bf16 perf path / f32 debug path)

    # --- zero-padded, ReLU'd slab in VMEM (border rows/cols stay zero) --------
    # relu(pad(x)) == pad(relu(x)), so padding with zeros before the conv is exact.
    hpad_ref[...] = jnp.zeros((Nb, H + 2, W + 2, C), cdt)
    hpad_ref[:, 1:H + 1, 1:W + 1, :] = jnp.maximum(x_ref[...], 0.0).astype(cdt)

    # --- im2col: 9 shifted views concatenated along channels (in VMEM) --------
    for t in range(9):                      # static unroll
        kh, kw = divmod(t, 3)
        tap = hpad_ref[:, kh:kh + H, kw:kw + W, :].reshape(M, C)
        patch_ref[:, t * C:(t + 1) * C] = tap

    # --- 3x3 conv as ONE K=9*C matmul (f32 accumulation), bias + ReLU ---------
    a = jnp.dot(patch_ref[...], w1_ref[...],
                preferred_element_type=jnp.float32)            # (M, CH) f32
    a = jnp.maximum(a + b1_ref[...], 0.0)

    # --- 1x1 conv + bias -------------------------------------------------------
    out = jnp.dot(a.astype(w2_ref.dtype), w2_ref[...],
                  preferred_element_type=jnp.float32) + b2_ref[...]   # (M, C) f32

    # --- residual against the raw (pre-ReLU) input, re-read from VMEM ---------
    res = out + x_ref[...].reshape(M, C)
    o_ref[...] = res.reshape(Nb, H, W, C).astype(o_ref.dtype)


def _pick_block_n(N, H, W, C, budget_bytes=2 << 20):
    """Largest batch-block dividing N that keeps the grid even (>= 2 steps, so
    both v7x TensorCores get work and the pipeline has something to overlap)
    while staying inside a conservative per-step VMEM budget."""
    img_f32 = H * W * C * 4
    pad_b = (H + 2) * (W + 2) * C * 2
    patch_b = H * W * 9 * C * 2

    def step_bytes(nb):
        # double-buffered input + output blocks, plus the two VMEM scratches
        return nb * (2 * img_f32 + 2 * img_f32 + pad_b + patch_b)

    best = 1
    for nb in range(1, N + 1):
        if N % nb != 0 or step_bytes(nb) > budget_bytes:
            continue
        g = N // nb
        if g >= 2 and g % 2 == 0:
            best = nb
    return best


def resblock_forward_nhwc(x, kp, *, block_n=None):
    """x: (N, H, W, C) f32, kp: packed kernel params. Returns (N, H, W, C) f32."""
    N, H, W, C = x.shape
    CH = kp["w1"].shape[-1]
    wdt = kp["w1"].dtype
    if block_n is None:
        block_n = _pick_block_n(N, H, W, C)
    assert N % block_n == 0, (N, block_n)
    grid_n = N // block_n

    kernel = functools.partial(_resblock_kernel, Nb=block_n, H=H, W=W, C=C, CH=CH)
    return pl.pallas_call(
        kernel,
        out_shape=jax.ShapeDtypeStruct((N, H, W, C), x.dtype),
        grid=(grid_n,),
        in_specs=[
            # per-step raw image block (no HBM pre-padding)
            pl.BlockSpec((block_n, H, W, C), lambda n: (n, 0, 0, 0)),
            # weights/biases: constant block index -> fetched once, stay resident
            pl.BlockSpec((9 * C, CH), lambda n: (0, 0)),
            pl.BlockSpec((1, CH), lambda n: (0, 0)),
            pl.BlockSpec((CH, C), lambda n: (0, 0)),
            pl.BlockSpec((1, C), lambda n: (0, 0)),
        ],
        out_specs=pl.BlockSpec((block_n, H, W, C), lambda n: (n, 0, 0, 0)),
        scratch_shapes=[
            pltpu.VMEM((block_n, H + 2, W + 2, C), wdt),      # padded ReLU'd slab
            pltpu.VMEM((block_n * H * W, 9 * C), wdt),        # im2col patch
        ],
        compiler_params=pltpu.CompilerParams(
            dimension_semantics=("parallel",),   # batch axis -> both v7x TCs busy
        ),
    )(x, kp["w1"], kp["b1"], kp["w2"], kp["b2"])


# ----------------------------------------------------------------------------
# Parameters (f32 masters + one-time packing into kernel layout)
# ----------------------------------------------------------------------------
def init_resblock(key, in_channel, channel):
    k1, k2, k3, k4 = jax.random.split(key, 4)
    fan1 = in_channel * 9
    fan2 = channel
    return {
        "w1_hwio": jax.random.normal(k1, (3, 3, in_channel, channel), jnp.float32)
                   / math.sqrt(fan1),                  # Conv2d(in_ch, ch, 3, pad=1)
        "b1": 0.01 * jax.random.normal(k2, (channel,), jnp.float32),
        "w2": jax.random.normal(k3, (channel, in_channel), jnp.float32)
              / math.sqrt(fan2),                       # Conv2d(ch, in_ch, 1)
        "b2": 0.01 * jax.random.normal(k4, (in_channel,), jnp.float32),
    }


def pack_kernel_params(p, weights_dtype=jnp.bfloat16):
    """Pack once at init: (kh, kw, c)-row-major matmul layout, 2-D f32 biases."""
    kh, kw, c, ch = p["w1_hwio"].shape
    return {
        "w1": p["w1_hwio"].reshape(kh * kw * c, ch).astype(weights_dtype),  # (9C, CH)
        "b1": p["b1"].reshape(1, ch).astype(jnp.float32),
        "w2": p["w2"].astype(weights_dtype),                                # (CH, C)
        "b2": p["b2"].reshape(1, c).astype(jnp.float32),
    }


# ----------------------------------------------------------------------------
# Pure-JAX f32 reference (PyTorch ResBlock semantics, NHWC layout)
# ----------------------------------------------------------------------------
def resblock_reference(x, p):
    h = jnp.maximum(x, 0.0)
    h = jax.lax.conv_general_dilated(
        h, p["w1_hwio"], window_strides=(1, 1), padding=((1, 1), (1, 1)),
        dimension_numbers=("NHWC", "HWIO", "NHWC"))
    h = jnp.maximum(h + p["b1"].reshape(1, 1, 1, -1), 0.0)
    h = jnp.einsum("nhwk,kc->nhwc", h, p["w2"]) + p["b2"].reshape(1, 1, 1, -1)
    return x + h


# ----------------------------------------------------------------------------
if __name__ == "__main__":
    IN_CH, CHANNEL = 32, 16        # ResBlock(in_channel=32, channel=16)
    N, H, W = 2, 16, 16

    key = jax.random.PRNGKey(0)
    k_param, k_x = jax.random.split(key)
    params = init_resblock(k_param, IN_CH, CHANNEL)

    # PyTorch module is NCHW; convert once at the boundary and stay NHWC after.
    x_nchw = jax.random.normal(k_x, (N, IN_CH, H, W), jnp.float32)
    x = jnp.transpose(x_nchw, (0, 2, 3, 1))                   # (N, H, W, C)

    ref = resblock_reference(x, params)
    fwd = jax.jit(resblock_forward_nhwc)

    # 1) f32-operand debug path: tight tolerance catches tap-order / transposed-
    #    weight bugs that the loose bf16 tolerance could hide.
    out_dbg = fwd(x, pack_kernel_params(params, weights_dtype=jnp.float32))
    jax.block_until_ready(out_dbg)
    err_dbg = float(jnp.max(jnp.abs(out_dbg - ref)))
    assert err_dbg < 1e-3, f"f32 debug path max |pallas - ref| = {err_dbg}"

    # 2) bf16 MXU perf path.
    out = fwd(x, pack_kernel_params(params, weights_dtype=jnp.bfloat16))
    jax.block_until_ready(out)
    err = float(jnp.max(jnp.abs(out - ref)))

    assert out.shape == (N, H, W, IN_CH), out.shape
    assert bool(jnp.all(jnp.isfinite(out)))
    assert err < 1e-1, f"bf16 path max |pallas - ref| = {err}"
    print("KERNEL_OK")
</pallas_src>

<mosaic_0001>
module attributes {stable_mosaic.version = 11 : i64} {
  func.func @_resblock_kernel(%arg0: i32, %arg1: memref<1x16x16x32xf32, #tpu.memory_space<vmem>>, %arg2: memref<288x16xf32, #tpu.memory_space<vmem>>, %arg3: memref<1x16xf32, #tpu.memory_space<vmem>>, %arg4: memref<16x32xf32, #tpu.memory_space<vmem>>, %arg5: memref<1x32xf32, #tpu.memory_space<vmem>>, %arg6: memref<1x16x16x32xf32, #tpu.memory_space<vmem>>, %arg7: memref<1x18x18x32xf32, #tpu.memory_space<vmem>>, %arg8: memref<256x288xf32, #tpu.memory_space<vmem>>) attributes {dimension_semantics = [#tpu.dimension_semantics<parallel>], iteration_bounds = array<i64: 2>, scalar_prefetch = 0 : i64, scratch_operands = 2 : i64, tpu.core_type = #tpu.core_type<tc>, window_params = [{transform_indices = @transform_0, window_bounds = array<i64: 1, 16, 16, 32>}, {pipeline_mode = #tpu.pipeline_mode<synchronous>, transform_indices = @transform_1, window_bounds = array<i64: 288, 16>}, {pipeline_mode = #tpu.pipeline_mode<synchronous>, transform_indices = @transform_2, window_bounds = array<i64: 1, 16>}, {pipeline_mode = #tpu.pipeline_mode<synchronous>, transform_indices = @transform_3, window_bounds = array<i64: 16, 32>}, {pipeline_mode = #tpu.pipeline_mode<synchronous>, transform_indices = @transform_4, window_bounds = array<i64: 1, 32>}, {transform_indices = @transform_5, window_bounds = array<i64: 1, 16, 16, 32>}]} {
    %cst = arith.constant 0.000000e+00 : f32
    %0 = vector.broadcast %cst : f32 to vector<1x18x18x32xf32>
    %c0 = arith.constant 0 : index
    %c0_0 = arith.constant 0 : index
    %c0_1 = arith.constant 0 : index
    %c0_2 = arith.constant 0 : index
    %1 = vector.load %arg7[%c0, %c0_0, %c0_1, %c0_2] : memref<1x18x18x32xf32, #tpu.memory_space<vmem>>, vector<1x18x18x32xf32>
    tpu.vector_store %arg7[%c0, %c0_0, %c0_1, %c0_2], %0 {strides = array<i32>} : memref<1x18x18x32xf32, #tpu.memory_space<vmem>>, vector<1x18x18x32xf32>,
    %c0_3 = arith.constant 0 : index
    %c0_4 = arith.constant 0 : index
    %c0_5 = arith.constant 0 : index
    %c0_6 = arith.constant 0 : index
    %2 = vector.load %arg1[%c0_3, %c0_4, %c0_5, %c0_6] : memref<1x16x16x32xf32, #tpu.memory_space<vmem>>, vector<1x16x16x32xf32>
    %cst_7 = arith.constant 0.000000e+00 : f32
    %3 = vector.broadcast %cst_7 : f32 to vector<1x16x16x32xf32>
    %4 = arith.maximumf %2, %3 : vector<1x16x16x32xf32>
    %c0_8 = arith.constant 0 : index
    %c1 = arith.constant 1 : index
    %c1_9 = arith.constant 1 : index
    %c0_10 = arith.constant 0 : index
    %5 = vector.load %arg7[%c0_8, %c1, %c1_9, %c0_10] : memref<1x18x18x32xf32, #tpu.memory_space<vmem>>, vector<1x16x16x32xf32>
    tpu.vector_store %arg7[%c0_8, %c1, %c1_9, %c0_10], %4 {strides = array<i32>} : memref<1x18x18x32xf32, #tpu.memory_space<vmem>>, vector<1x16x16x32xf32>,
    %c0_11 = arith.constant 0 : index
    %c0_12 = arith.constant 0 : index
    %c0_13 = arith.constant 0 : index
    %c0_14 = arith.constant 0 : index
    %6 = vector.load %arg7[%c0_11, %c0_12, %c0_13, %c0_14] : memref<1x18x18x32xf32, #tpu.memory_space<vmem>>, vector<1x16x16x32xf32>
    %7 = vector.shape_cast %6 : vector<1x16x16x32xf32> to vector<256x32xf32>
    %c0_15 = arith.constant 0 : index
    %c0_16 = arith.constant 0 : index
    %8 = vector.load %arg8[%c0_15, %c0_16] : memref<256x288xf32, #tpu.memory_space<vmem>>, vector<256x32xf32>
    tpu.vector_store %arg8[%c0_15, %c0_16], %7 {strides = array<i32>} : memref<256x288xf32, #tpu.memory_space<vmem>>, vector<256x32xf32>,
    %c0_17 = arith.constant 0 : index
    %c0_18 = arith.constant 0 : index
    %c1_19 = arith.constant 1 : index
    %c0_20 = arith.constant 0 : index
    %9 = vector.load %arg7[%c0_17, %c0_18, %c1_19, %c0_20] : memref<1x18x18x32xf32, #tpu.memory_space<vmem>>, vector<1x16x16x32xf32>
    %10 = vector.shape_cast %9 : vector<1x16x16x32xf32> to vector<256x32xf32>
    %c0_21 = arith.constant 0 : index
    %c32 = arith.constant 32 : index
    %11 = vector.load %arg8[%c0_21, %c32] : memref<256x288xf32, #tpu.memory_space<vmem>>, vector<256x32xf32>
    tpu.vector_store %arg8[%c0_21, %c32], %10 {strides = array<i32>} : memref<256x288xf32, #tpu.memory_space<vmem>>, vector<256x32xf32>,
    %c0_22 = arith.constant 0 : index
    %c0_23 = arith.constant 0 : index
    %c2 = arith.constant 2 : index
    %c0_24 = arith.constant 0 : index
    %12 = vector.load %arg7[%c0_22, %c0_23, %c2, %c0_24] : memref<1x18x18x32xf32, #tpu.memory_space<vmem>>, vector<1x16x16x32xf32>
    %13 = vector.shape_cast %12 : vector<1x16x16x32xf32> to vector<256x32xf32>
    %c0_25 = arith.constant 0 : index
    %c64 = arith.constant 64 : index
    %14 = vector.load %arg8[%c0_25, %c64] : memref<256x288xf32, #tpu.memory_space<vmem>>, vector<256x32xf32>
    tpu.vector_store %arg8[%c0_25, %c64], %13 {strides = array<i32>} : memref<256x288xf32, #tpu.memory_space<vmem>>, vector<256x32xf32>,
    %c0_26 = arith.constant 0 : index
    %c1_27 = arith.constant 1 : index
    %c0_28 = arith.constant 0 : index
    %c0_29 = arith.constant 0 : index
    %15 = vector.load %arg7[%c0_26, %c1_27, %c0_28, %c0_29] : memref<1x18x18x32xf32, #tpu.memory_space<vmem>>, vector<1x16x16x32xf32>
    %16 = vector.shape_cast %15 : vector<1x16x16x32xf32> to vector<256x32xf32>
    %c0_30 = arith.constant 0 : index
    %c96 = arith.constant 96 : index
    %17 = vector.load %arg8[%c0_30, %c96] : memref<256x288xf32, #tpu.memory_space<vmem>>, vector<256x32xf32>
    tpu.vector_store %arg8[%c0_30, %c96], %16 {strides = array<i32>} : memref<256x288xf32, #tpu.memory_space<vmem>>, vector<256x32xf32>,
    %c0_31 = arith.constant 0 : index
    %c1_32 = arith.constant 1 : index
    %c1_33 = arith.constant 1 : index
    %c0_34 = arith.constant 0 : index
    %18 = vector.load %arg7[%c0_31, %c1_32, %c1_33, %c0_34] : memref<1x18x18x32xf32, #tpu.memory_space<vmem>>, vector<1x16x16x32xf32>
    %19 = vector.shape_cast %18 : vector<1x16x16x32xf32> to vector<256x32xf32>
    %c0_35 = arith.constant 0 : index
    %c128 = arith.constant 128 : index
    %20 = vector.load %arg8[%c0_35, %c128] : memref<256x288xf32, #tpu.memory_space<vmem>>, vector<256x32xf32>
    tpu.vector_store %arg8[%c0_35, %c128], %19 {strides = array<i32>} : memref<256x288xf32, #tpu.memory_space<vmem>>, vector<256x32xf32>,
    %c0_36 = arith.constant 0 : index
    %c1_37 = arith.constant 1 : index
    %c2_38 = arith.constant 2 : index
    %c0_39 = arith.constant 0 : index
    %21 = vector.load %arg7[%c0_36, %c1_37, %c2_38, %c0_39] : memref<1x18x18x32xf32, #tpu.memory_space<vmem>>, vector<1x16x16x32xf32>
    %22 = vector.shape_cast %21 : vector<1x16x16x32xf32> to vector<256x32xf32>
    %c0_40 = arith.constant 0 : index
    %c160 = arith.constant 160 : index
    %23 = vector.load %arg8[%c0_40, %c160] : memref<256x288xf32, #tpu.memory_space<vmem>>, vector<256x32xf32>
    tpu.vector_store %arg8[%c0_40, %c160], %22 {strides = array<i32>} : memref<256x288xf32, #tpu.memory_space<vmem>>, vector<256x32xf32>,
    %c0_41 = arith.constant 0 : index
    %c2_42 = arith.constant 2 : index
    %c0_43 = arith.constant 0 : index
    %c0_44 = arith.constant 0 : index
    %24 = vector.load %arg7[%c0_41, %c2_42, %c0_43, %c0_44] : memref<1x18x18x32xf32, #tpu.memory_space<vmem>>, vector<1x16x16x32xf32>
    %25 = vector.shape_cast %24 : vector<1x16x16x32xf32> to vector<256x32xf32>
    %c0_45 = arith.constant 0 : index
    %c192 = arith.constant 192 : index
    %26 = vector.load %arg8[%c0_45, %c192] : memref<256x288xf32, #tpu.memory_space<vmem>>, vector<256x32xf32>
    tpu.vector_store %arg8[%c0_45, %c192], %25 {strides = array<i32>} : memref<256x288xf32, #tpu.memory_space<vmem>>, vector<256x32xf32>,
    %c0_46 = arith.constant 0 : index
    %c2_47 = arith.constant 2 : index
    %c1_48 = arith.constant 1 : index
    %c0_49 = arith.constant 0 : index
    %27 = vector.load %arg7[%c0_46, %c2_47, %c1_48, %c0_49] : memref<1x18x18x32xf32, #tpu.memory_space<vmem>>, vector<1x16x16x32xf32>
    %28 = vector.shape_cast %27 : vector<1x16x16x32xf32> to vector<256x32xf32>
    %c0_50 = arith.constant 0 : index
    %c224 = arith.constant 224 : index
    %29 = vector.load %arg8[%c0_50, %c224] : memref<256x288xf32, #tpu.memory_space<vmem>>, vector<256x32xf32>
    tpu.vector_store %arg8[%c0_50, %c224], %28 {strides = array<i32>} : memref<256x288xf32, #tpu.memory_space<vmem>>, vector<256x32xf32>,
    %c0_51 = arith.constant 0 : index
    %c2_52 = arith.constant 2 : index
    %c2_53 = arith.constant 2 : index
    %c0_54 = arith.constant 0 : index
    %30 = vector.load %arg7[%c0_51, %c2_52, %c2_53, %c0_54] : memref<1x18x18x32xf32, #tpu.memory_space<vmem>>, vector<1x16x16x32xf32>
    %31 = vector.shape_cast %30 : vector<1x16x16x32xf32> to vector<256x32xf32>
    %c0_55 = arith.constant 0 : index
    %c256 = arith.constant 256 : index
    %32 = vector.load %arg8[%c0_55, %c256] : memref<256x288xf32, #tpu.memory_space<vmem>>, vector<256x32xf32>
    tpu.vector_store %arg8[%c0_55, %c256], %31 {strides = array<i32>} : memref<256x288xf32, #tpu.memory_space<vmem>>, vector<256x32xf32>,
    %c0_56 = arith.constant 0 : index
    %c0_57 = arith.constant 0 : index
    %33 = vector.load %arg8[%c0_56, %c0_57] : memref<256x288xf32, #tpu.memory_space<vmem>>, vector<256x288xf32>
    %c0_58 = arith.constant 0 : index
    %c0_59 = arith.constant 0 : index
    %34 = vector.load %arg2[%c0_58, %c0_59] : memref<288x16xf32, #tpu.memory_space<vmem>>, vector<288x16xf32>
    %cst_60 = arith.constant dense<0.000000e+00> : vector<256x16xf32>
    %35 = tpu.matmul %33, %34, %cst_60 {dimension_numbers = #tpu.dot_dimension_numbers<[1], [0], [0], [1], [0, 0, 1, 1], [], []>} : vector<256x288xf32>, vector<288x16xf32>, vector<256x16xf32> -> vector<256x16xf32>
    %c0_61 = arith.constant 0 : index
    %c0_62 = arith.constant 0 : index
    %36 = vector.load %arg3[%c0_61, %c0_62] : memref<1x16xf32, #tpu.memory_space<vmem>>, vector<1x16xf32>
    %37 = vector.broadcast %36 : vector<1x16xf32> to vector<256x16xf32>
    %38 = arith.addf %35, %37 : vector<256x16xf32>
    %cst_63 = arith.constant 0.000000e+00 : f32
    %39 = vector.broadcast %cst_63 : f32 to vector<256x16xf32>
    %40 = arith.maximumf %38, %39 : vector<256x16xf32>
    %c0_64 = arith.constant 0 : index
    %c0_65 = arith.constant 0 : index
    %41 = vector.load %arg4[%c0_64, %c0_65] : memref<16x32xf32, #tpu.memory_space<vmem>>, vector<16x32xf32>
    %cst_66 = arith.constant dense<0.000000e+00> : vector<256x32xf32>
    %42 = tpu.matmul %40, %41, %cst_66 {dimension_numbers = #tpu.dot_dimension_numbers<[1], [0], [0], [1], [0, 0, 1, 1], [], []>} : vector<256x16xf32>, vector<16x32xf32>, vector<256x32xf32> -> vector<256x32xf32>
    %c0_67 = arith.constant 0 : index
    %c0_68 = arith.constant 0 : index
    %43 = vector.load %arg5[%c0_67, %c0_68] : memref<1x32xf32, #tpu.memory_space<vmem>>, vector<1x32xf32>
    %44 = vector.broadcast %43 : vector<1x32xf32> to vector<256x32xf32>
    %45 = arith.addf %42, %44 : vector<256x32xf32>
    %c0_69 = arith.constant 0 : index
    %c0_70 = arith.constant 0 : index
    %c0_71 = arith.constant 0 : index
    %c0_72 = arith.constant 0 : index
    %46 = vector.load %arg1[%c0_69, %c0_70, %c0_71, %c0_72] : memref<1x16x16x32xf32, #tpu.memory_space<vmem>>, vector<1x16x16x32xf32>
    %47 = vector.shape_cast %46 : vector<1x16x16x32xf32> to vector<256x32xf32>
    %48 = arith.addf %45, %47 : vector<256x32xf32>
    %49 = vector.shape_cast %48 : vector<256x32xf32> to vector<1x16x16x32xf32>
    %c0_73 = arith.constant 0 : index
    %c0_74 = arith.constant 0 : index
    %c0_75 = arith.constant 0 : index
    %c0_76 = arith.constant 0 : index
    %50 = vector.load %arg6[%c0_73, %c0_74, %c0_75, %c0_76] : memref<1x16x16x32xf32, #tpu.memory_space<vmem>>, vector<1x16x16x32xf32>
    tpu.vector_store %arg6[%c0_73, %c0_74, %c0_75, %c0_76], %49 {strides = array<i32>} : memref<1x16x16x32xf32, #tpu.memory_space<vmem>>, vector<1x16x16x32xf32>,
    return
  }
  func.func @transform_0(%arg0: i32) -> (i32, i32, i32, i32) {
    %c0_i32 = arith.constant 0 : i32
    %c0_i32_0 = arith.constant 0 : i32
    %c0_i32_1 = arith.constant 0 : i32
    %c0_i32_2 = arith.constant 0 : i32
    return %arg0, %c0_i32, %c0_i32_0, %c0_i32_1 : i32, i32, i32, i32
  }
  func.func @transform_1(%arg0: i32) -> (i32, i32) {
    %c0_i32 = arith.constant 0 : i32
    %c0_i32_0 = arith.constant 0 : i32
    %c0_i32_1 = arith.constant 0 : i32
    return %c0_i32, %c0_i32_0 : i32, i32
  }
  func.func @transform_2(%arg0: i32) -> (i32, i32) {
    %c0_i32 = arith.constant 0 : i32
    %c0_i32_0 = arith.constant 0 : i32
    %c0_i32_1 = arith.constant 0 : i32
    return %c0_i32, %c0_i32_0 : i32, i32
  }
  func.func @transform_3(%arg0: i32) -> (i32, i32) {
    %c0_i32 = arith.constant 0 : i32
    %c0_i32_0 = arith.constant 0 : i32
    %c0_i32_1 = arith.constant 0 : i32
    return %c0_i32, %c0_i32_0 : i32, i32
  }
  func.func @transform_4(%arg0: i32) -> (i32, i32) {
    %c0_i32 = arith.constant 0 : i32
    %c0_i32_0 = arith.constant 0 : i32
    %c0_i32_1 = arith.constant 0 : i32
    return %c0_i32, %c0_i32_0 : i32, i32
  }
  func.func @transform_5(%arg0: i32) -> (i32, i32, i32, i32) {
    %c0_i32 = arith.constant 0 : i32
    %c0_i32_0 = arith.constant 0 : i32
    %c0_i32_1 = arith.constant 0 : i32
    %c0_i32_2 = arith.constant 0 : i32
    return %arg0, %c0_i32, %c0_i32_0, %c0_i32_1 : i32, i32, i32, i32
  }
}

</mosaic_0001>

<bundles_post_ra>
// kernel: resblock_forward_nhwc.1
= control target key start
LH: loop header
LB: loop body
LE: loop exit
PB: predicated region body
PF: predicated region fallthrough
CT: control target
= control target key end

     0   :  { %10 = vsyncpa [#allocation5], 0  ;;  %s4628_s0 = inlined_call_operand.hbm [shape: f32[2,16,16,32], index: 0, kind: input, shape index: {}]   ;;  %s4629_s1 = inlined_call_operand.vmem [shape: f32[288,16], index: 1, kind: input, shape index: {}]   ;;  %s4630_s2 = inlined_call_operand.vmem [shape: f32[1,16], index: 2, kind: input, shape index: {}]   ;;  %s4631_s3 = inlined_call_operand.vmem [shape: f32[16,32], index: 3, kind: input, shape index: {}]   ;;  %s4632_s4 = inlined_call_operand.vmem [shape: f32[1,32], index: 4, kind: input, shape index: {}]   ;;  %s4633_s5 = inlined_call_operand.hbm [shape: f32[2,16,16,32], index: 5, kind: output, shape index: {}]  }
   0x1   :  { %12 = vsyncpa [#allocation5 + $0x1], 0 }
   0x2   :  { %13 = vsyncpa [#allocation6], 0 }
   0x3   :  { %15 = vsyncpa [#allocation6 + $0x1], 0  ;;  %s3024_s18 = smov 0   ;;  %s3026_s19 = smov 0  }
   0x4   :  { %s3028_s20 = smov 0   ;;  %s3030_s21 = smov 0  }
   0x5 LB: > { %s3045_s22 = sadd.s32 4294967295, %s2984_s21   ;;  %s2750_s23 = sadd.s32 4294967294, %s2984_s21   ;;  %s2984_s21 = sphi %s3030_s21, %s4643_s21   ;;  %s2980_s20 = sphi %s3028_s20, %s4642_s20   ;;  %s2976_s19 = sphi %s3026_s19, %s4641_s19   ;;  %s2972_s18 = sphi %s3024_s18, %s4640_s18  }
   0x6   : > { %s3049_s24 = sadd.s32 1, %s2984_s21   ;;  %s28_s25 = sadd.s32 1, %s2980_s20 }
   0x7   : > { %s25_s26 = ssub.s32 %s2984_s21, %s3049_s24  ;;  %p35_p0 = scmp.ne.s32.totalorder %s2980_s20, %s2976_s19 }
   0x8   : > { %p26_p1 = scmp.eq.s32.totalorder %s25_s26, 0  ;;  %p36_p2 = scmp.eq.s32.totalorder %s2984_s21, 0 }
   0x9   : > { %p41_p3 = scmp.ne.s32.totalorder %s2976_s19, %s2972_s18  ;;  %p42_p4 = scmp.eq.s32.totalorder %s3045_s22, 0 }
   0xa   : > { %s3061_s27 = scalar_select %p26_p1, %s2980_s20, %s28_s25  }
   0xb   : > { %p3063_p5 = por %p36_p2, %p35_p0  ;;  %p3067_p6 = por %p42_p4, %p41_p3 }
   0xc   : > { %p149_p7 = scmp.eq.s32.totalorder %s3045_s22, 1  ;;  %p155_p8 = scmp.eq.s32.totalorder %s2750_s23, 1 }
   0xd   : > { %p2842_p10 = scmp.lt.s32.totalorder %s2984_s21, 2  ;;  %s187_s7 = sand.u32 1, %s2980_s20  }
   0xe   : > { %p3074_p11 = por %p149_p7, %p35_p0  ;;  %p3078_p12 = por %p155_p8, %p41_p3 }
   0xf   : > { %s2828_s8 = sshll.u32 %s2984_s21, 8  ;;  %s2753_s9 = sshll.u32 %s187_s7, 8 }
  0x10   : > { %s196_s12 = scalar_lea.hbm %s4628_s0, %s2828_s8  ;;  %s191_s14 = scalar_lea.vmem [#allocation4], %s2753_s9 }
  0x11   : > { %s197_s13 = sshll.u32 %s196_s12, 4  ;;  %s199_s15 = sshll.u32 %s191_s14, 4  ;;  %s198_s13 = int_to_ptr.hbm [resolvable:$true] %s197_s13  ;;  %s200_s15 = int_to_ptr.vmem [resolvable:$true] %s199_s15 }
  0x12   : > { %p3089_p13 = pnand %p2842_p10, %p3063_p5  ;;  %p2756_p0 = scmp.ge.s32.totalorder %s2984_s21, 1 }
  0x13   : > { %p207_p1 = scmp.lt.s32.totalorder %s2984_s21, 3  ;;  %s188_s17 = scalar_lea.sflag [#allocation5], %s187_s7 }
  0x14   : > { %s2888_s23 = sshra.s32 %s198_s13, 4  ;;  %p2892_p3 = pneg %p3089_p13  ;;  %s2889_s23 = int_to_ptr.hbm [resolvable:$true] %s2888_s23 }
  0x15   : > { %s2890_s25 = scalar_lea.hbm %s2889_s23, 256  ;;  %s2895_s28 = scalar_lea.hbm %s4628_s0, 512 }
  0x16   : > { %p2891_p2 = scmp.ne.s32.totalorder %s2889_s23, %s2890_s25  ;;  %p2896_p5 = scmp.lt.s32.totalorder %s2889_s23, %s4628_s0 }
  0x17   : > { %p2897_p8 = scmp.lt.s32.totalorder %s2895_s28, %s2890_s25 }
  0x18   : > { %p2893_p4 = pnand %p2892_p3, %p2891_p2 }
  0x19   : > { %p2898_p10 = por %p2897_p8, %p2896_p5 }
  0x1a   : > { %p2894_p7 = pneg %p2893_p4 }
  0x1c   : > { %p2899_p9 = pnand %p2898_p10, %p2894_p7 }
  0x1e   : > { %2902 = shalt.err (!%p2899_p9)
}
  0x1f   : > { %s2986_s7 = smov 128   ;;  %s2987_s11 = smov 8  }
  0x20   : > { %2837 = dma.hbm_to_vmem [thread:$0]  (!%p3089_p13), %s198_s13, 4096, %s200_s15, %s188_s17, %s2986_s7, %s2986_s7, %s2987_s11  }
  0x21   : > { %p208_p2 = pnand %p2756_p0, %p207_p1 }
  0x22   : > { %s3110_s12 = sand.u32 (!%p208_p2), 1, %s2976_s19  }
  0x23   : > { %211 = sbr.rel (%p208_p2) target bundleno = 996 (0x3e4), region = 40  ;;  %s2757_s14 = sshll.u32 (!%p208_p2), %s3110_s12, 8 }
  0x24   : > { %s214_s23 = scalar_lea.sflag (!%p208_p2), [#allocation5], %s3110_s12  ;;  %s3116_s25 = scalar_lea.vmem (!%p208_p2), [#allocation4], %s2757_s14 }
  0x28   : > { %2963 = dma.done.wait (%p3067_p6), %s214_s23, 4096  }
  0x29   : > { %2965 = vsyncadd (%p3067_p6), %s214_s23, 4294963200  ;;  %vm245_vm0 = vcmask 261120   ;;  %v2988_v0 = vmov 0.0   ;;  %s2989_s29 = smov 32   ;;  %s2990_s13 = smov 64   ;;  %vm248_vm1 = vcmask 254976  }
  0x2a   : > { %246 = vst.msk [vmem:[#allocation2] sm:$0xff] %vm245_vm0, %v2988_v0  ;;  %v301_v5 = vld [vmem:[%s3116_s25] sm:$0xff]  ;;  %v303_v6 = vld [vmem:[%s3116_s25 + $0x10] sm:$0xff]  ;;  %v302_v7 = vld [vmem:[%s3116_s25 + $0x8] sm:$0xff]  ;;  %s2991_s15 = smov 96   ;;  %vm622_vm2 = vcmask 523520  }
  0x2b   : > { %247 = vst.msk [vmem:[#allocation2 + $0x8] sm:$0xff] %vm245_vm0, %v2988_v0  ;;  %v333_v8 = vmax.f32 %v301_v5, 0.0  ;;  %v304_v9 = vld [vmem:[%s3116_s25 + $0x18] sm:$0xff]  ;;  %v335_v10 = vmax.f32 %v303_v6, 0.0  ;;  %v305_v11 = vld [vmem:[%s3116_s25 + $0x20] sm:$0xff]  ;;  %v334_v12 = vmax.f32 %v302_v7, 0.0 }
  0x2c   : > { %250 = vst.msk [vmem:[#allocation2 + $0x18] sm:$0xff] %vm245_vm0, %v2988_v0  ;;  %v336_v13 = vmax.f32 %v304_v9, 0.0  ;;  %v337_v14 = vmax.f32 %v305_v11, 0.0  ;;  %v306_v23 = vld [vmem:[%s3116_s25 + $0x28] sm:$0xff]  ;;  %v307_v31 = vld [vmem:[%s3116_s25 + $0x30] sm:$0xff]  ;;  %v308_v36 = vld [vmem:[%s3116_s25 + $0x38] sm:$0xff] }
  0x2d   : > { %251 = vst.msk [vmem:[#allocation2 + $0x20] sm:$0xff] %vm245_vm0, %v2988_v0  ;;  %v338_v24 = vmax.f32 %v306_v23, 0.0  ;;  %v339_v32 = vmax.f32 %v307_v31, 0.0  ;;  %v340_v37 = vmax.f32 %v308_v36, 0.0  ;;  %v309_v41 = vld [vmem:[%s3116_s25 + $0x40] sm:$0xff]  ;;  %v1857_v44 = vld [vmem:[%s4629_s1 + $0x78] sm:$0xff] }
  0x2e   : > { %253 = vst.msk [vmem:[#allocation2 + $0x30] sm:$0xff] %vm245_vm0, %v2988_v0  ;;  %v341_v42 = vmax.f32 %v309_v41, 0.0  ;;  %v1856_v45 = vld [vmem:[%s4629_s1 + $0x70] sm:$0xff]  ;;  %1978 = vmatpush.msra.mxu0 %v1857_v44  ;;  %v1855_v48 = vld [vmem:[%s4629_s1 + $0x68] sm:$0xff]  ;;  %v1854_v49 = vld [vmem:[%s4629_s1 + $0x60] sm:$0xff]  ;;  %vm815_vm3 = vcmask 785920  }
  0x2f   : > { %254 = vst.msk [vmem:[#allocation2 + $0x38] sm:$0xff] %vm245_vm0, %v2988_v0  ;;  %v1873_v50 = vld [vmem:[%s4629_s1 + $0xf8] sm:$0xff]  ;;  %v1872_v51 = vld [vmem:[%s4629_s1 + $0xf0] sm:$0xff]  ;;  %v1871_v53 = vld [vmem:[%s4629_s1 + $0xe8] sm:$0xff]  ;;  %vm1008_vm4 = vcmask 1048320   ;;  %vm2355_vm5 = vcmask 130048  }
  0x30   : > { %256 = vst.msk [vmem:[#allocation2 + $0x48] sm:$0xff] %vm245_vm0, %v2988_v0  ;;  %1979 = vmatpush.msra.mxu0 %v1856_v45  ;;  %2091 = vmatpush.msra.mxu1 %v1873_v50  ;;  %v1853_v52 = vld [vmem:[%s4629_s1 + $0x58] sm:$0xff]  ;;  %v1852_v54 = vld [vmem:[%s4629_s1 + $0x50] sm:$0xff]  ;;  %v1851_v57 = vld [vmem:[%s4629_s1 + $0x48] sm:$0xff]  ;;  %s4180_s16 = scalar_lea.vmem [#allocation7], %s2757_s14  ;;  %s2662_s7 = scalar_lea.sflag [#allocation6], %s3110_s12 }
  0x31   : > { %257 = vst.msk [vmem:[#allocation2 + $0x50] sm:$0xff] %vm245_vm0, %v2988_v0  ;;  %v310_v55 = vld [vmem:[%s3116_s25 + $0x48] sm:$0xff]  ;;  %v398_v59 = vld [vmem:[#allocation2] sm:$0xff]  ;;  %v1867_v5 = vld [vmem:[%s4629_s1 + $0xc8] sm:$0xff]  ;;  %s2674_s9 = sshll.u32 %s4180_s16, 4  ;;  %s2938_s17 = scalar_lea.hbm %s4633_s5, 512  ;;  %s2675_s9 = int_to_ptr.vmem [resolvable:$true] %s2674_s9 }
  0x32   : > { %v462_v1 = vld [vmem:[#allocation2 + $0x1] sm:$0xff]  ;;  %259 = vst.msk [vmem:[#allocation2 + $0x60] sm:$0xff] %vm245_vm0, %v2988_v0  ;;  %1980 = vmatpush.msra.mxu0 %v1855_v48  ;;  %2092 = vmatpush.msra.mxu1 %v1872_v51  ;;  %v342_v56 = vmax.f32 %v310_v55, 0.0  ;;  %v1869_v63 = vld [vmem:[%s4629_s1 + $0xd8] sm:$0xff]  ;;  %v1876_v23 = vld [vmem:[%s4629_s1 + $0x110] sm:$0xff] }
  0x33   : > { %v655_v2 = vld [vmem:[#allocation2 + $0x2] sm:$0xff]  ;;  %526 = vrot.lane.b32.xlu0 %v462_v1, %s2989_s29  ;;  %260 = vst.msk [vmem:[#allocation2 + $0x68] sm:$0xff] %vm245_vm0, %v2988_v0  ;;  %v1868_v1 = vld [vmem:[%s4629_s1 + $0xd0] sm:$0xff] }
  0x34   : > { %719 = vrot.lane.b32.xlu1 %v655_v2, %s2990_s13  ;;  %262 = vst.msk [vmem:[#allocation2 + $0x78] sm:$0xff] %vm245_vm0, %v2988_v0  ;;  %1981 = vmatpush.msra.mxu0 %v1854_v49  ;;  %v1870_v60 = vld [vmem:[%s4629_s1 + $0xe0] sm:$0xff]  ;;  %v399_v9 = vld [vmem:[#allocation2 + $0x8] sm:$0xff]  ;;  %v1860_v31 = vld [vmem:[%s4629_s1 + $0x90] sm:$0xff] }
  0x35   : > { %263 = vst.msk [vmem:[#allocation2 + $0x80] sm:$0xff] %vm245_vm0, %v2988_v0  ;;  %2093 = vmatpush.msra.mxu1 %v1871_v53  ;;  %v1850_v62 = vld [vmem:[%s4629_s1 + $0x40] sm:$0xff]  ;;  %v312_v41 = vld [vmem:[%s3116_s25 + $0x58] sm:$0xff] }
  0x36   : > { %265 = vst.msk [vmem:[#allocation2 + $0x90] sm:$0xff] %vm245_vm0, %v2988_v0  ;;  %1982 = vmatpush.msra.mxu0 %v1853_v52  ;;  %v1846_v11 = vld [vmem:[%s4629_s1 + $0x20] sm:$0xff]  ;;  %v313_v52 = vld [vmem:[%s3116_s25 + $0x60] sm:$0xff] }
  0x37   : > { %266 = vst.msk [vmem:[#allocation2 + $0x98] sm:$0xff] %vm245_vm0, %v2988_v0  ;;  %2094 = vmatpush.msra.mxu1 %v1870_v60  ;;  %v345_v53 = vmax.f32 %v313_v52, 0.0 }
  0x38   : > { %268 = vst.msk [vmem:[#allocation2 + $0xa8] sm:$0xff] %vm245_vm0, %v2988_v0  ;;  %1983 = vmatpush.msra.mxu0 %v1852_v54 }
  0x39   : > { %269 = vst.msk [vmem:[#allocation2 + $0xb0] sm:$0xff] %vm245_vm0, %v2988_v0  ;;  %2095 = vmatpush.msra.mxu1 %v1869_v63  ;;  %v314_v63 = vld [vmem:[%s3116_s25 + $0x68] sm:$0xff] }
  0x3a   : > { %271 = vst.msk [vmem:[#allocation2 + $0xc0] sm:$0xff] %vm245_vm0, %v2988_v0  ;;  %1984 = vmatpush.msra.mxu0 %v1851_v57 }
  0x3b   : > { %272 = vst.msk [vmem:[#allocation2 + $0xc8] sm:$0xff] %vm245_vm0, %v2988_v0  ;;  %2096 = vmatpush.msra.mxu1 %v1868_v1 }
  0x3c   : > { %274 = vst.msk [vmem:[#allocation2 + $0xd8] sm:$0xff] %vm245_vm0, %v2988_v0  ;;  %1985 = vmatpush.msra.mxu0 %v1850_v62 }
  0x3d   : > { %275 = vst.msk [vmem:[#allocation2 + $0xe0] sm:$0xff] %vm245_vm0, %v2988_v0  ;;  %2097 = vmatpush.msra.mxu1 %v1867_v5 }
  0x3e   : > { %277 = vst.msk [vmem:[#allocation2 + $0xf0] sm:$0xff] %vm245_vm0, %v2988_v0 }
  0x3f   : > { %278 = vst.msk [vmem:[#allocation2 + $0xf8] sm:$0xff] %vm245_vm0, %v2988_v0 }
  0x40   : > { %280 = vst.msk [vmem:[#allocation2 + $0x108] sm:$0xff] %vm245_vm0, %v2988_v0 }
  0x41   : > { %281 = vst.msk [vmem:[#allocation2 + $0x110] sm:$0xff] %vm245_vm0, %v2988_v0 }
  0x42   : > { %283 = vst.msk [vmem:[#allocation2 + $0x120] sm:$0xff] %vm245_vm0, %v2988_v0 }
  0x43   : > { %284 = vst.msk [vmem:[#allocation2 + $0x128] sm:$0xff] %vm245_vm0, %v2988_v0 }
  0x44   : > { %286 = vst.msk [vmem:[#allocation2 + $0x138] sm:$0xff] %vm245_vm0, %v2988_v0 }
  0x45   : > { %287 = vst.msk [vmem:[#allocation2 + $0x140] sm:$0xff] %vm245_vm0, %v2988_v0 }
  0x46   : > { %289 = vst.msk [vmem:[#allocation2 + $0x150] sm:$0xff] %vm245_vm0, %v2988_v0 }
  0x47   : > { %290 = vst.msk [vmem:[#allocation2 + $0x158] sm:$0xff] %vm245_vm0, %v2988_v0 }
  0x48   : > { %292 = vst.msk [vmem:[#allocation2 + $0x168] sm:$0xff] %vm245_vm0, %v2988_v0 }
  0x49   : > { %293 = vst.msk [vmem:[#allocation2 + $0x170] sm:$0xff] %vm245_vm0, %v2988_v0 }
  0x4a   : > { %295 = vst.msk [vmem:[#allocation2 + $0x180] sm:$0xff] %vm245_vm0, %v2988_v0 }
  0x4b   : > { %296 = vst.msk [vmem:[#allocation2 + $0x188] sm:$0xff] %vm245_vm0, %v2988_v0 }
  0x4c   : > { %298 = vst.msk [vmem:[#allocation2 + $0x198] sm:$0xff] %vm245_vm0, %v2988_v0 }
  0x4d   : > { %299 = vst.msk [vmem:[#allocation2 + $0x1a0] sm:$0xff] %vm245_vm0, %v2988_v0 }
  0x4e   : > { %249 = vst.msk [vmem:[#allocation2 + $0x10] sm:$0x3] %vm248_vm1, %v2988_v0 }
  0x4f   : > { %252 = vst.msk [vmem:[#allocation2 + $0x28] sm:$0x3] %vm248_vm1, %v2988_v0 }
  0x50   : > { %255 = vst.msk [vmem:[#allocation2 + $0x40] sm:$0x3] %vm248_vm1, %v2988_v0 }
  0x51   : > { %258 = vst.msk [vmem:[#allocation2 + $0x58] sm:$0x3] %vm248_vm1, %v2988_v0 }
  0x52   : > { %261 = vst.msk [vmem:[#allocation2 + $0x70] sm:$0x3] %vm248_vm1, %v2988_v0 }
  0x53   : > { %264 = vst.msk [vmem:[#allocation2 + $0x88] sm:$0x3] %vm248_vm1, %v2988_v0 }
  0x54   : > { %267 = vst.msk [vmem:[#allocation2 + $0xa0] sm:$0x3] %vm248_vm1, %v2988_v0 }
  0x55   : > { %v463_v3 = vld [vmem:[#allocation2 + $0x9] sm:$0xff]  ;;  %270 = vst.msk [vmem:[#allocation2 + $0xb8] sm:$0x3] %vm248_vm1, %v2988_v0 }
  0x56   : > { %v656_v4 = vld [vmem:[#allocation2 + $0xa] sm:$0xff]  ;;  %528 = vrot.lane.b32.xlu0 %v463_v3, %s2989_s29  ;;  %273 = vst.msk [vmem:[#allocation2 + $0xd0] sm:$0x3] %vm248_vm1, %v2988_v0 }
  0x57   : > { %721 = vrot.lane.b32.xlu2 %v656_v4, %s2990_s13  ;;  %276 = vst.msk [vmem:[#allocation2 + $0xe8] sm:$0x3] %vm248_vm1, %v2988_v0  ;;  %v1848_v4 = vld [vmem:[%s4629_s1 + $0x30] sm:$0xff] }
  0x58   : > { %279 = vst.msk [vmem:[#allocation2 + $0x100] sm:$0x3] %vm248_vm1, %v2988_v0 }
  0x59   : > { %282 = vst.msk [vmem:[#allocation2 + $0x118] sm:$0x3] %vm248_vm1, %v2988_v0 }
  0x5a   : > { %285 = vst.msk [vmem:[#allocation2 + $0x130] sm:$0x3] %vm248_vm1, %v2988_v0 }
  0x5b   : > { %288 = vst.msk [vmem:[#allocation2 + $0x148] sm:$0x3] %vm248_vm1, %v2988_v0 }
  0x5c   : > { %291 = vst.msk [vmem:[#allocation2 + $0x160] sm:$0x3] %vm248_vm1, %v2988_v0 }
  0x5d   : > { %294 = vst.msk [vmem:[#allocation2 + $0x178] sm:$0x3] %vm248_vm1, %v2988_v0 }
  0x5e   : > { %297 = vst.msk [vmem:[#allocation2 + $0x190] sm:$0x3] %vm248_vm1, %v2988_v0 }
  0x5f   : > { %300 = vst.msk [vmem:[#allocation2 + $0x1a8] sm:$0x3] %vm248_vm1, %v2988_v0  ;;  %v1849_v0 = vld [vmem:[%s4629_s1 + $0x38] sm:$0xff] }
  0x60   : > { %366 = vst.msk [vmem:[#allocation2 + $0x19] sm:$0xff] %vm245_vm0, %v333_v8  ;;  %1986 = vmatpush.msra.mxu0 %v1849_v0  ;;  %v1847_v8 = vld [vmem:[%s4629_s1 + $0x28] sm:$0xff]  ;;  %v346_v0 = vmax.f32 %v314_v63, 0.0 }
  0x61   : > { %368 = vst.msk [vmem:[#allocation2 + $0x31] sm:$0xff] %vm245_vm0, %v335_v10  ;;  %v1866_v10 = vld [vmem:[%s4629_s1 + $0xc0] sm:$0xff] }
  0x62   : > { %367 = vst.msk [vmem:[#allocation2 + $0x21] sm:$0xff] %vm245_vm0, %v334_v12  ;;  %1987 = vmatpush.msra.mxu0 %v1848_v4  ;;  %2098 = vmatpush.msra.mxu1 %v1866_v10  ;;  %v1865_v12 = vld [vmem:[%s4629_s1 + $0xb8] sm:$0xff] }
  0x63   : > { %369 = vst.msk [vmem:[#allocation2 + $0x39] sm:$0xff] %vm245_vm0, %v336_v13  ;;  %v1845_v13 = vld [vmem:[%s4629_s1 + $0x18] sm:$0xff] }
  0x64   : > { %370 = vst.msk [vmem:[#allocation2 + $0x49] sm:$0xff] %vm245_vm0, %v337_v14  ;;  %1988 = vmatpush.msra.mxu0 %v1847_v8  ;;  %v1864_v14 = vld [vmem:[%s4629_s1 + $0xb0] sm:$0xff]  ;;  %2099 = vmatpush.msra.mxu1 %v1865_v12 }
  0x65   : > { %371 = vst.msk [vmem:[#allocation2 + $0x51] sm:$0xff] %vm245_vm0, %v338_v24 }
  0x66   : > { %372 = vst.msk [vmem:[#allocation2 + $0x61] sm:$0xff] %vm245_vm0, %v339_v32  ;;  %1989 = vmatpush.msra.mxu0 %v1846_v11  ;;  %2100 = vmatpush.msra.mxu1 %v1864_v14 }
  0x67   : > { %v464_v15 = vld [vmem:[#allocation2 + $0x19] sm:$0xff]  ;;  %373 = vst.msk [vmem:[#allocation2 + $0x69] sm:$0xff] %vm245_vm0, %v340_v37 }
  0x68   : > { %v848_v16 = vld [vmem:[#allocation2 + $0x18] sm:$0xff]  ;;  %530 = vrot.lane.b32.xlu1 %v464_v15, %s2989_s29  ;;  %v1298_v17 = vld [vmem:[#allocation2 + $0x30] sm:$0xff]  ;;  %1073 = vst.msk [vmem:[#allocation3 + $0x8] sm:$0xff] %vm245_vm0, %v464_v15  ;;  %1990 = vmatpush.msra.mxu0 %v1845_v13  ;;  %v1858_v37 = vld [vmem:[%s4629_s1 + $0x80] sm:$0xff] }
  0x69   : > { %912 = vrot.lane.b32.xlu2 %v848_v16, %s2991_s15  ;;  %432 = vst.msk [vmem:[#allocation3 + $0x30] sm:$0xff] %vm245_vm0, %v848_v16  ;;  %1362 = vrot.lane.b32.xlu0 %v1298_v17, %s2990_s13  ;;  %v1490_v18 = vld [vmem:[#allocation2 + $0x31] sm:$0xff]  ;;  %v465_v20 = vld [vmem:[#allocation2 + $0x21] sm:$0xff] }
  0x6a   : > { %v1107_v19 = vld [vmem:[#allocation2 + $0x32] sm:$0xff]  ;;  %1075 = vst.msk [vmem:[#allocation3 + $0x38] sm:$0xff] %vm245_vm0, %v1490_v18  ;;  %v849_v21 = vld [vmem:[#allocation2 + $0x20] sm:$0xff] }
  0x6b   : > { %1714 = vst.msk [vmem:[#allocation3 + $0x10] sm:$0xff] %vm245_vm0, %v1107_v19  ;;  %v3252_v22 = vld [vmem:[#allocation2 + $0x39] sm:$0xff]  ;;  %v1300_v28 = vld [vmem:[#allocation2 + $0x48] sm:$0xff] }
  0x6c   : > { %1074 = vst.msk [vmem:[#allocation3 + $0x20] sm:$0xff] %vm245_vm0, %v465_v20  ;;  %v657_v25 = vld [vmem:[#allocation2 + $0x1a] sm:$0xff]  ;;  %v1106_v29 = vld [vmem:[#allocation2 + $0x22] sm:$0xff]  ;;  %v3269_v30 = vld [vmem:[#allocation2 + $0x50] sm:$0xff] }
  0x6d   : > { %433 = vst.msk [vmem:[#allocation3 + $0x48] sm:$0xff] %vm245_vm0, %v849_v21  ;;  %v3261_v26 = vld [vmem:[#allocation2 + $0x3a] sm:$0xff]  ;;  %v3280_v33 = vld [vmem:[#allocation2 + $0x4a] sm:$0xff]  ;;  %v3301_v38 = vld [vmem:[#allocation2 + $0x52] sm:$0xff] }
  0x6e   : > { %1076 = vst.msk [vmem:[#allocation3 + $0x50] sm:$0xff] %vm245_vm0, %v3252_v22  ;;  %v1299_v27 = vld [vmem:[#allocation2 + $0x38] sm:$0xff]  ;;  %v3284_v34 = vld [vmem:[#allocation2 + $0x49] sm:$0xff]  ;;  %v3290_v35 = vld [vmem:[#allocation2 + $0x60] sm:$0xff] }
  0x6f   : > { %434 = vst.msk [vmem:[#allocation3 + $0x60] sm:$0xff] %vm245_vm0, %v1298_v17  ;;  %v3306_v39 = vld [vmem:[#allocation2 + $0x51] sm:$0xff]  ;;  %v3312_v40 = vld [vmem:[#allocation2 + $0x68] sm:$0xff]  ;;  %v311_v16 = vld [vmem:[%s3116_s25 + $0x50] sm:$0xff] }
  0x70   : > { %1554 = vrot.lane.b32.xlu1 %v1490_v18, %s2991_s15  ;;  %1715 = vst.msk [vmem:[#allocation3 + $0x28] sm:$0xff] %vm245_vm0, %v3261_v26  ;;  %v3324_v43 = vld [vmem:[#allocation2 + $0x61] sm:$0xff]  ;;  %v3401_v2 = vld [vmem:[#allocation2 + $0x6a] sm:$0xff]  ;;  %v1877_v15 = vld [vmem:[%s4629_s1 + $0x118] sm:$0xff] }
  0x71   : > { %1169 = vrot.lane.b32.xlu2 %v657_v25, %s2989_s29  ;;  %914 = vrot.lane.b32.xlu0 %v849_v21, %s2991_s15  ;;  %435 = vst.msk [vmem:[#allocation3 + $0x78] sm:$0xff] %vm245_vm0, %v1299_v27  ;;  %v3335_v46 = vld [vmem:[#allocation2 + $0x62] sm:$0xff] }
  0x72   : > { %436 = vst.msk [vmem:[#allocation3 + $0x90] sm:$0xff] %vm245_vm0, %v1300_v28  ;;  %v3403_v3 = vld [vmem:[#allocation2 + $0x69] sm:$0xff]  ;;  %2216 = vmatpush.msra.mxu2 %v1877_v15  ;;  %v315_v13 = vld [vmem:[%s3116_s25 + $0x70] sm:$0xff] }
  0x73   : > { %437 = vst.msk [vmem:[#allocation3 + $0xa8] sm:$0xff] %vm245_vm0, %v3269_v30  ;;  %v347_v14 = vmax.f32 %v315_v13, 0.0 }
  0x74   : > { %1716 = vst.msk [vmem:[#allocation3 + $0x40] sm:$0xff] %vm245_vm0, %v3280_v33  ;;  %2217 = vmatpush.msra.mxu2 %v1876_v23 }
  0x75   : > { %1077 = vst.msk [vmem:[#allocation3 + $0x68] sm:$0xff] %vm245_vm0, %v3284_v34 }
  0x76   : > { %438 = vst.msk [vmem:[#allocation3 + $0xc0] sm:$0xff] %vm245_vm0, %v3290_v35 }
  0x77   : > { %1717 = vst.msk [vmem:[#allocation3 + $0x58] sm:$0xff] %vm245_vm0, %v3301_v38  ;;  %v1751_v45 = vld [vmem:[#allocation3 + $0x28] sm:$0xff] }
  0x78   : > { %1171 = vrot.lane.b32.xlu1 %v1106_v29, %s2989_s29  ;;  %1078 = vst.msk [vmem:[#allocation3 + $0x80] sm:$0xff] %vm245_vm0, %v3306_v39 }
  0x79   : > { %1364 = vrot.lane.b32.xlu2 %v1299_v27, %s2990_s13  ;;  %1556 = vrot.lane.b32.xlu0 %v3252_v22, %s2991_s15  ;;  %439 = vst.msk [vmem:[#allocation3 + $0xd8] sm:$0xff] %vm245_vm0, %v3312_v40 }
  0x7a   : > { %374 = vst.msk [vmem:[#allocation2 + $0x79] sm:$0xff] %vm245_vm0, %v341_v42  ;;  %v344_v42 = vmax.f32 %v312_v41, 0.0 }
  0x7b   : > { %1079 = vst.msk [vmem:[#allocation3 + $0x98] sm:$0xff] %vm245_vm0, %v3324_v43  ;;  %v1754_v51 = vld [vmem:[#allocation3 + $0x40] sm:$0xff] }
  0x7c   : > { %1718 = vst.msk [vmem:[#allocation3 + $0x70] sm:$0xff] %vm245_vm0, %v3335_v46 }
  0x7d   : > { %375 = vst.msk [vmem:[#allocation2 + $0x81] sm:$0xff] %vm245_vm0, %v342_v56 }
  0x7e   : > { %430 = vst.msk [vmem:[#allocation3] sm:$0xff] %vm245_vm0, %v398_v59  ;;  %v1757_v62 = vld [vmem:[#allocation3 + $0x58] sm:$0xff] }
  0x7f   : > { %1719 = vst.msk [vmem:[#allocation3 + $0x88] sm:$0xff] %vm245_vm0, %v3401_v2 }
  0x80   : > { %723 = vrot.lane.b32.xlu1 %v657_v25, %s2990_s13  ;;  %1080 = vst.msk [vmem:[#allocation3 + $0xb0] sm:$0xff] %vm245_vm0, %v3403_v3  ;;  %v1842_v25 = vld [vmem:[%s4629_s1] sm:$0xff] }
  0x81   : > { %916 = vrot.lane.b32.xlu2 %v1298_v17, %s2991_s15  ;;  %1173 = vrot.lane.b32.xlu0 %v1107_v19, %s2989_s29  ;;  %v3341_v47 = vld [vmem:[#allocation2 + $0x78] sm:$0xff]  ;;  %431 = vst.msk [vmem:[#allocation3 + $0x18] sm:$0xff] %vm245_vm0, %v399_v9  ;;  %v1844_v17 = vld [vmem:[%s4629_s1 + $0x10] sm:$0xff] }
  0x82   : > { %440 = vst.msk [vmem:[#allocation3 + $0xf0] sm:$0xff] %vm245_vm0, %v3341_v47  ;;  %v3463_v21 = vld [vmem:[#allocation2 + $0x79] sm:$0xff]  ;;  %1991 = vmatpush.msra.mxu0 %v1844_v17 }
  0x83   : > { %1081 = vst.msk [vmem:[#allocation3 + $0xc8] sm:$0xff] %vm245_vm0, %v3463_v21  ;;  %v1760_v12 = vld [vmem:[#allocation3 + $0x70] sm:$0xff] }
  0x84   : > { %v3415_v6 = vld [vmem:[#allocation2 + $0x80] sm:$0xff]  ;;  %377 = vst.msk [vmem:[#allocation2 + $0x99] sm:$0xff] %vm245_vm0, %v344_v42 }
  0x85   : > { %441 = vst.msk [vmem:[#allocation3 + $0x108] sm:$0xff] %vm245_vm0, %v3415_v6  ;;  %v3529_v48 = vld [vmem:[#allocation2 + $0x82] sm:$0xff] }
  0x86   : > { %1721 = vst.msk [vmem:[#allocation3 + $0xb8] sm:$0xff] %vm245_vm0, %v3529_v48 }
  0x87   : > { %378 = vst.msk [vmem:[#allocation2 + $0xa9] sm:$0xff] %vm245_vm0, %v345_v53 }
  0x88   : > { %1366 = vrot.lane.b32.xlu1 %v1300_v28, %s2990_s13  ;;  %379 = vst.msk [vmem:[#allocation2 + $0xb1] sm:$0xff] %vm245_vm0, %v346_v0 }
  0x89   : > { %1558 = vrot.lane.b32.xlu2 %v3284_v34, %s2991_s15  ;;  %532 = vrot.lane.b32.xlu0 %v465_v20, %s2989_s29  ;;  %v1843_v20 = vld [vmem:[%s4629_s1 + $0x8] sm:$0xff]  ;;  %380 = vst.msk [vmem:[#allocation2 + $0xc1] sm:$0xff] %vm245_vm0, %v347_v14 }
  0x8a   : > { %1992 = vmatpush.msra.mxu0 %v1843_v20 }
  0x8b   : > { %v3584_v1 = vld [vmem:[#allocation2 + $0x99] sm:$0xff] }
  0x8c   : > { %1993 = vmatpush.msra.mxu0 %v1842_v25  ;;  %1084 = vst.msk [vmem:[#allocation3 + $0x110] sm:$0xff] %vm245_vm0, %v3584_v1 }
  0x8e   : > { %v3617_v15 = vld [vmem:[#allocation2 + $0xa9] sm:$0xff] }
  0x8f   : > { %1085 = vst.msk [vmem:[#allocation3 + $0x128] sm:$0xff] %vm245_vm0, %v3617_v15  ;;  %v3627_v20 = vld [vmem:[#allocation2 + $0xaa] sm:$0xff] }
  0x90   : > { %725 = vrot.lane.b32.xlu1 %v1106_v29, %s2990_s13  ;;  %v1748_v29 = vld [vmem:[#allocation3 + $0x10] sm:$0xff]  ;;  %1724 = vst.msk [vmem:[#allocation3 + $0x100] sm:$0xff] %vm245_vm0, %v3627_v20 }
  0x91   : > { %918 = vrot.lane.b32.xlu2 %v1299_v27, %s2991_s15  ;;  %1175 = vrot.lane.b32.xlu0 %v3261_v26, %s2989_s29  ;;  %v1875_v27 = vld [vmem:[%s4629_s1 + $0x108] sm:$0xff] }
  0x92   : > { %2218 = vmatpush.msra.mxu2 %v1875_v27  ;;  %v316_v27 = vld [vmem:[%s3116_s25 + $0x78] sm:$0xff] }
  0x98   : > { %1368 = vrot.lane.b32.xlu1 %v3269_v30, %s2990_s13 }
  0x99   : > { %1560 = vrot.lane.b32.xlu2 %v3306_v39, %s2991_s15  ;;  %534 = vrot.lane.b32.xlu0 %v1490_v18, %s2989_s29  ;;  %v343_v18 = vmax.f32 %v311_v16, 0.0 }
  0x9b   : > { %376 = vst.msk [vmem:[#allocation2 + $0x91] sm:$0xff] %vm245_vm0, %v343_v18 }
  0xa0   : > { %727 = vrot.lane.b32.xlu1 %v1107_v19, %s2990_s13  ;;  %v1863_v19 = vld [vmem:[%s4629_s1 + $0xa8] sm:$0xff] }
  0xa1   : > { %920 = vrot.lane.b32.xlu2 %v1300_v28, %s2991_s15  ;;  %1177 = vrot.lane.b32.xlu0 %v3280_v33, %s2989_s29  ;;  %v1874_v28 = vld [vmem:[%s4629_s1 + $0x100] sm:$0xff] }
  0xa2   : > { %2101 = vmatpush.msra.mxu1 %v1863_v19  ;;  %2219 = vmatpush.msra.mxu2 %v1874_v28  ;;  %v3497_v32 = vld [vmem:[#allocation2 + $0x90] sm:$0xff]  ;;  %v348_v28 = vmax.f32 %v316_v27, 0.0 }
  0xa3   : > { %2759 = vmatmul.msk.f32.vlgmr.msra.gmra.mxu2 %vm245_vm0, %v1748_v29  ;;  %442 = vst.msk [vmem:[#allocation3 + $0x120] sm:$0xff] %vm245_vm0, %v3497_v32  ;;  %v3552_v54 = vld [vmem:[#allocation2 + $0x91] sm:$0xff] }
  0xa4   : > { %1083 = vst.msk [vmem:[#allocation3 + $0xf8] sm:$0xff] %vm245_vm0, %v3552_v54  ;;  %v3650_v29 = vld [vmem:[#allocation2 + $0xb1] sm:$0xff] }
  0xa5   : > { %v527_v58 = vpop.permute.xlu0 %526  ;;  %381 = vst.msk [vmem:[#allocation2 + $0xc9] sm:$0xff] %vm245_vm0, %v348_v28 }
  0xa6   : > { %v720_v61 = vpop.permute.xlu1 %719  ;;  %623 = vst.msk [vmem:[#allocation3] sm:$0xff] %vm622_vm2, %v527_v58 }
  0xa7   : > { %816 = vst.msk [vmem:[#allocation3] sm:$0xff] %vm815_vm3, %v720_v61 }
  0xa8   : > { %1370 = vrot.lane.b32.xlu1 %v3290_v35, %s2990_s13  ;;  %1086 = vst.msk [vmem:[#allocation3 + $0x140] sm:$0xff] %vm245_vm0, %v3650_v29 }
  0xa9   : > { %1562 = vrot.lane.b32.xlu2 %v3324_v43, %s2991_s15  ;;  %536 = vrot.lane.b32.xlu0 %v3252_v22, %s2989_s29  ;;  %v1862_v22 = vld [vmem:[%s4629_s1 + $0xa0] sm:$0xff] }
  0xaa   : > { %2102 = vmatpush.msra.mxu1 %v1862_v22 }
  0xab   : > { %2760 = vmatmul.msk.f32.gmra.mxu2 %vm245_vm0, %v1751_v45 }
  0xb0   : > { %729 = vrot.lane.b32.xlu1 %v3261_v26, %s2990_s13  ;;  %v1861_v26 = vld [vmem:[%s4629_s1 + $0x98] sm:$0xff] }
  0xb1   : > { %922 = vrot.lane.b32.xlu2 %v3269_v30, %s2991_s15  ;;  %1179 = vrot.lane.b32.xlu0 %v3301_v38, %s2989_s29  ;;  %v3419_v7 = vpop.permute.xlu2 %721  ;;  %v3489_v30 = vld [vmem:[#allocation2 + $0x7a] sm:$0xff] }
  0xb2   : > { %1720 = vst.msk [vmem:[#allocation3 + $0xa0] sm:$0xff] %vm245_vm0, %v3489_v30  ;;  %2103 = vmatpush.msra.mxu1 %v1861_v26  ;;  %v1763_v26 = vld [vmem:[#allocation3 + $0x88] sm:$0xff] }
  0xb3   : > { %2761 = vmatmul.msk.f32.gmra.mxu2 %vm245_vm0, %v1754_v51  ;;  %v3693_v51 = vld [vmem:[#allocation2 + $0xc2] sm:$0xff] }
  0xb4   : > { %2104 = vmatpush.msra.mxu1 %v1860_v31  ;;  %1726 = vst.msk [vmem:[#allocation3 + $0x130] sm:$0xff] %vm245_vm0, %v3693_v51 }
  0xb8   : > { %1372 = vrot.lane.b32.xlu1 %v3312_v40, %s2990_s13 }
  0xb9   : > { %1564 = vrot.lane.b32.xlu2 %v3403_v3, %s2991_s15  ;;  %538 = vrot.lane.b32.xlu0 %v3284_v34, %s2989_s29  ;;  %v1859_v34 = vld [vmem:[%s4629_s1 + $0x88] sm:$0xff] }
  0xba   : > { %2105 = vmatpush.msra.mxu1 %v1859_v34  ;;  %v3660_v34 = vld [vmem:[#allocation2 + $0xb2] sm:$0xff] }
  0xbb   : > { %2762 = vmatmul.msk.f32.gmra.mxu2 %vm245_vm0, %v1757_v62  ;;  %1725 = vst.msk [vmem:[#allocation3 + $0x118] sm:$0xff] %vm245_vm0, %v3660_v34  ;;  %v3726_v62 = vld [vmem:[#allocation2 + $0xca] sm:$0xff] }
  0xbc   : > { %2106 = vmatpush.msra.mxu1 %v1858_v37  ;;  %1727 = vst.msk [vmem:[#allocation3 + $0x148] sm:$0xff] %vm245_vm0, %v3726_v62 }
  0xc0   : > { %731 = vrot.lane.b32.xlu1 %v3280_v33, %s2990_s13 }
  0xc1   : > { %924 = vrot.lane.b32.xlu2 %v3290_v35, %s2991_s15  ;;  %1181 = vrot.lane.b32.xlu0 %v3335_v46, %s2989_s29 }
  0xc3   : > { %v913_v24 = vpop.permute.xlu2 %912  ;;  %2763 = vmatmul.msk.f32.gmra.mxu2 %vm245_vm0, %v1760_v12 }
  0xc4   : > { %1009 = vst.msk [vmem:[#allocation3] sm:$0xff] %vm1008_vm4, %v913_v24 }
  0xc8   : > { %1374 = vrot.lane.b32.xlu1 %v3341_v47, %s2990_s13  ;;  %v529_v33 = vpop.permute.xlu0 %528 }
  0xc9   : > { %1566 = vrot.lane.b32.xlu2 %v3463_v21, %s2991_s15  ;;  %540 = vrot.lane.b32.xlu0 %v3306_v39, %s2989_s29  ;;  %624 = vst.msk [vmem:[#allocation3 + $0x18] sm:$0xff] %vm622_vm2, %v529_v33  ;;  %v3522_v39 = vld [vmem:[#allocation2 + $0x81] sm:$0xff] }
  0xca   : > { %817 = vst.msk [vmem:[#allocation3 + $0x18] sm:$0xff] %vm815_vm3, %v3419_v7  ;;  %v3598_v7 = vld [vmem:[#allocation2 + $0xb0] sm:$0xff] }
  0xcb   : > { %v1170_v35 = vpop.permute.xlu2 %1169  ;;  %v1746_v36 = vld [vmem:[#allocation3] sm:$0xff]  ;;  %1082 = vst.msk [vmem:[#allocation3 + $0xe0] sm:$0xff] %vm245_vm0, %v3522_v39  ;;  %2764 = vmatmul.msk.f32.gmra.mxu2 %vm245_vm0, %v1763_v26 }
  0xcc   : > { %1265 = vst.msk [vmem:[#allocation3 + $0x8] sm:$0xff] %vm622_vm2, %v1170_v35  ;;  %1994 = vmatmul.f32.vlgmr.msra.gmra.mxu0 %v1746_v36  ;;  %v3664_v35 = vld [vmem:[#allocation2 + $0xc8] sm:$0xff] }
  0xcd   : > { %445 = vst.msk [vmem:[#allocation3 + $0x168] sm:$0xff] %vm245_vm0, %v3598_v7 }
  0xce   : > { %447 = vst.msk [vmem:[#allocation3 + $0x198] sm:$0xff] %vm245_vm0, %v3664_v35 }
  0xd0   : > { %733 = vrot.lane.b32.xlu1 %v3301_v38, %s2990_s13  ;;  %v3534_v38 = vld [vmem:[#allocation2 + $0x98] sm:$0xff] }
  0xd1   : > { %926 = vrot.lane.b32.xlu2 %v3312_v40, %s2991_s15  ;;  %1183 = vrot.lane.b32.xlu0 %v3401_v2, %s2989_s29  ;;  %443 = vst.msk [vmem:[#allocation3 + $0x138] sm:$0xff] %vm245_vm0, %v3534_v38 }
  0xd3   : > { %v1365_v44 = vpop.permute.xlu2 %1364 }
  0xd8   : > { %1376 = vrot.lane.b32.xlu1 %v3415_v6, %s2990_s13 }
  0xd9   : > { %1568 = vrot.lane.b32.xlu2 %v3522_v39, %s2991_s15  ;;  %542 = vrot.lane.b32.xlu0 %v3324_v43, %s2989_s29 }
  0xda   : > { %v531_v40 = vpop.permute.xlu1 %530 }
  0xdb   : > { %v917_v49 = vpop.permute.xlu2 %916  ;;  %625 = vst.msk [vmem:[#allocation3 + $0x30] sm:$0xff] %vm622_vm2, %v531_v40  ;;  %v1363_v50 = vpop.permute.xlu0 %1362 }
  0xdc   : > { %1458 = vst.msk [vmem:[#allocation3 + $0x8] sm:$0xff] %vm815_vm3, %v1363_v50 }
  0xe0   : > { %735 = vrot.lane.b32.xlu1 %v3335_v46, %s2990_s13  ;;  %v3561_v46 = vld [vmem:[#allocation2 + $0x92] sm:$0xff] }
  0xe1   : > { %928 = vrot.lane.b32.xlu2 %v3341_v47, %s2991_s15  ;;  %1185 = vrot.lane.b32.xlu0 %v3489_v30, %s2989_s29  ;;  %1722 = vst.msk [vmem:[#allocation3 + $0xd0] sm:$0xff] %vm245_vm0, %v3561_v46  ;;  %v3565_v47 = vld [vmem:[#allocation2 + $0xa8] sm:$0xff] }
  0xe2   : > { %v1555_v43 = vpop.permute.xlu1 %1554  ;;  %444 = vst.msk [vmem:[#allocation3 + $0x150] sm:$0xff] %vm245_vm0, %v3565_v47 }
  0xe3   : > { %v1559_v55 = vpop.permute.xlu2 %1558  ;;  %1650 = vst.msk [vmem:[#allocation3 + $0x8] sm:$0xff] %vm1008_vm4, %v1555_v43  ;;  %v915_v56 = vpop.permute.xlu0 %914 }
  0xe4   : > { %1010 = vst.msk [vmem:[#allocation3 + $0x18] sm:$0xff] %vm1008_vm4, %v915_v56  ;;  %v1769_v56 = vld [vmem:[#allocation3 + $0xb8] sm:$0xff] }
  0xe8   : > { %1378 = vrot.lane.b32.xlu1 %v3497_v32, %s2990_s13 }
  0xe9   : > { %1570 = vrot.lane.b32.xlu2 %v3552_v54, %s2991_s15  ;;  %544 = vrot.lane.b32.xlu0 %v3403_v3, %s2989_s29 }
  0xea   : > { %v1172_v57 = vpop.permute.xlu1 %1171  ;;  %v1747_v58 = vld [vmem:[#allocation3 + $0x8] sm:$0xff] }
  0xeb   : > { %v919_v59 = vpop.permute.xlu2 %918  ;;  %1266 = vst.msk [vmem:[#allocation3 + $0x20] sm:$0xff] %vm622_vm2, %v1172_v57  ;;  %2107 = vmatmul.f32.vlgmr.msra.gmra.mxu1 %v1747_v58  ;;  %v1557_v60 = vpop.permute.xlu0 %1556  ;;  %v1749_v61 = vld [vmem:[#allocation3 + $0x18] sm:$0xff] }
  0xec   : > { %1459 = vst.msk [vmem:[#allocation3 + $0x20] sm:$0xff] %vm815_vm3, %v1365_v44  ;;  %1997 = vmatmul.f32.gmra.mxu0 %v1749_v61  ;;  %v317_v44 = vld [vmem:[%s3116_s25 + $0x80] sm:$0xff] }
  0xed   : > { %1651 = vst.msk [vmem:[#allocation3 + $0x20] sm:$0xff] %vm1008_vm4, %v1557_v60  ;;  %v349_v45 = vmax.f32 %v317_v44, 0.0  ;;  %v3716_v57 = vld [vmem:[#allocation2 + $0xc9] sm:$0xff] }
  0xee   : > { %1088 = vst.msk [vmem:[#allocation3 + $0x170] sm:$0xff] %vm245_vm0, %v3716_v57 }
  0xef   : > { %382 = vst.msk [vmem:[#allocation2 + $0xd9] sm:$0xff] %vm245_vm0, %v349_v45 }
  0xf0   : > { %737 = vrot.lane.b32.xlu1 %v3401_v2, %s2990_s13 }
  0xf1   : > { %930 = vrot.lane.b32.xlu2 %v3415_v6, %s2991_s15  ;;  %1187 = vrot.lane.b32.xlu0 %v3529_v48, %s2989_s29  ;;  %v3594_v6 = vld [vmem:[#allocation2 + $0x9a] sm:$0xff] }
  0xf2   : > { %v724_v3 = vpop.permute.xlu1 %723  ;;  %1723 = vst.msk [vmem:[#allocation3 + $0xe8] sm:$0xff] %vm245_vm0, %v3594_v6 }
  0xf3   : > { %v1561_v4 = vpop.permute.xlu2 %1560  ;;  %818 = vst.msk [vmem:[#allocation3 + $0x30] sm:$0xff] %vm815_vm3, %v724_v3  ;;  %v1174_v5 = vpop.permute.xlu0 %1173 }
  0xf4   : > { %1011 = vst.msk [vmem:[#allocation3 + $0x30] sm:$0xff] %vm1008_vm4, %v917_v49  ;;  %v1750_v2 = vld [vmem:[#allocation3 + $0x20] sm:$0xff] }
  0xf5   : > { %1267 = vst.msk [vmem:[#allocation3 + $0x38] sm:$0xff] %vm622_vm2, %v1174_v5  ;;  %2110 = vmatmul.f32.gmra.mxu1 %v1750_v2  ;;  %v319_v5 = vld [vmem:[%s3116_s25 + $0x90] sm:$0xff] }
  0xf6   : > { %v3697_v52 = vld [vmem:[#allocation2 + $0xd8] sm:$0xff]  ;;  %v351_v2 = vmax.f32 %v319_v5, 0.0 }
  0xf7   : > { %448 = vst.msk [vmem:[#allocation3 + $0x1b0] sm:$0xff] %vm245_vm0, %v3697_v52 }
  0xf8   : > { %1380 = vrot.lane.b32.xlu1 %v3534_v38, %s2990_s13  ;;  %384 = vst.msk [vmem:[#allocation2 + $0xf1] sm:$0xff] %vm245_vm0, %v351_v2 }
  0xf9   : > { %1572 = vrot.lane.b32.xlu2 %v3584_v1, %s2991_s15  ;;  %546 = vrot.lane.b32.xlu0 %v3463_v21, %s2989_s29  ;;  %v3631_v21 = vld [vmem:[#allocation2 + $0xc0] sm:$0xff] }
  0xfa   : > { %v1367_v8 = vpop.permute.xlu1 %1366  ;;  %446 = vst.msk [vmem:[#allocation3 + $0x180] sm:$0xff] %vm245_vm0, %v3631_v21 }
  0xfb   : > { %v921_v9 = vpop.permute.xlu2 %920  ;;  %1460 = vst.msk [vmem:[#allocation3 + $0x38] sm:$0xff] %vm815_vm3, %v1367_v8  ;;  %v1752_v10 = vld [vmem:[#allocation3 + $0x30] sm:$0xff]  ;;  %v533_v11 = vpop.permute.xlu0 %532 }
  0xfc   : > { %1652 = vst.msk [vmem:[#allocation3 + $0x38] sm:$0xff] %vm1008_vm4, %v1559_v55  ;;  %2000 = vmatmul.f32.gmra.mxu0 %v1752_v10 }
  0xfd   : > { %626 = vst.msk [vmem:[#allocation3 + $0x48] sm:$0xff] %vm622_vm2, %v533_v11 }
  0xff   : > { %v3826_v45 = vld [vmem:[#allocation2 + $0xf0] sm:$0xff] }
 0x100   : > { %739 = vrot.lane.b32.xlu1 %v3489_v30, %s2990_s13 }
 0x101   : > { %932 = vrot.lane.b32.xlu2 %v3497_v32, %s2991_s15  ;;  %1189 = vrot.lane.b32.xlu0 %v3561_v46, %s2989_s29 }
 0x102   : > { %v726_v16 = vpop.permute.xlu1 %725 }
 0x103   : > { %v1563_v17 = vpop.permute.xlu2 %1562  ;;  %819 = vst.msk [vmem:[#allocation3 + $0x48] sm:$0xff] %vm815_vm3, %v726_v16  ;;  %v1753_v18 = vld [vmem:[#allocation3 + $0x38] sm:$0xff]  ;;  %v1176_v19 = vpop.permute.xlu0 %1175 }
 0x104   : > { %1012 = vst.msk [vmem:[#allocation3 + $0x48] sm:$0xff] %vm1008_vm4, %v919_v59  ;;  %2113 = vmatmul.f32.gmra.mxu1 %v1753_v18  ;;  %v2350_v16 = vld [vmem:[%s4631_s3 + $0x8] sm:$0xff] }
 0x105   : > { %1268 = vst.msk [vmem:[#allocation3 + $0x50] sm:$0xff] %vm622_vm2, %v1176_v19  ;;  %2466 = vmatpush.msra.mxu3 %v2350_v16  ;;  %v320_v18 = vld [vmem:[%s3116_s25 + $0x98] sm:$0xff] }
 0x106   : > { %v352_v19 = vmax.f32 %v320_v18, 0.0 }
 0x108   : > { %1382 = vrot.lane.b32.xlu1 %v3565_v47, %s2990_s13  ;;  %385 = vst.msk [vmem:[#allocation2 + $0xf9] sm:$0xff] %vm245_vm0, %v352_v19 }
 0x109   : > { %1574 = vrot.lane.b32.xlu2 %v3617_v15, %s2991_s15  ;;  %548 = vrot.lane.b32.xlu0 %v3522_v39, %s2989_s29  ;;  %v1766_v39 = vld [vmem:[#allocation3 + $0xa0] sm:$0xff] }
 0x10a   : > { %v1369_v22 = vpop.permute.xlu1 %1368  ;;  %2765 = vmatmul.msk.f32.gmra.mxu2 %vm245_vm0, %v1766_v39 }
 0x10b   : > { %v923_v23 = vpop.permute.xlu2 %922  ;;  %1461 = vst.msk [vmem:[#allocation3 + $0x50] sm:$0xff] %vm815_vm3, %v1369_v22  ;;  %v1755_v24 = vld [vmem:[#allocation3 + $0x48] sm:$0xff]  ;;  %v535_v25 = vpop.permute.xlu0 %534 }
 0x10c   : > { %1653 = vst.msk [vmem:[#allocation3 + $0x50] sm:$0xff] %vm1008_vm4, %v1561_v4  ;;  %2003 = vmatmul.f32.gmra.mxu0 %v1755_v24  ;;  %v1772_v4 = vld [vmem:[#allocation3 + $0xd0] sm:$0xff] }
 0x10d   : > { %627 = vst.msk [vmem:[#allocation3 + $0x60] sm:$0xff] %vm622_vm2, %v535_v25 }
 0x10f   : > { %v3865_v2 = vld [vmem:[#allocation2 + $0xfa] sm:$0xff] }
 0x110   : > { %741 = vrot.lane.b32.xlu1 %v3529_v48, %s2990_s13  ;;  %v3683_v48 = vld [vmem:[#allocation2 + $0xc1] sm:$0xff]  ;;  %1731 = vst.msk [vmem:[#allocation3 + $0x1a8] sm:$0xff] %vm245_vm0, %v3865_v2 }
 0x111   : > { %934 = vrot.lane.b32.xlu2 %v3534_v38, %s2991_s15  ;;  %1191 = vrot.lane.b32.xlu0 %v3594_v6, %s2989_s29  ;;  %1087 = vst.msk [vmem:[#allocation3 + $0x158] sm:$0xff] %vm245_vm0, %v3683_v48 }
 0x112   : > { %v728_v30 = vpop.permute.xlu1 %727  ;;  %2766 = vmatmul.msk.f32.gmra.mxu2 %vm245_vm0, %v1769_v56 }
 0x113   : > { %v1565_v31 = vpop.permute.xlu2 %1564  ;;  %820 = vst.msk [vmem:[#allocation3 + $0x60] sm:$0xff] %vm815_vm3, %v728_v30  ;;  %v1756_v32 = vld [vmem:[#allocation3 + $0x50] sm:$0xff]  ;;  %v1178_v33 = vpop.permute.xlu0 %1177 }
 0x114   : > { %1013 = vst.msk [vmem:[#allocation3 + $0x60] sm:$0xff] %vm1008_vm4, %v921_v9  ;;  %2116 = vmatmul.f32.gmra.mxu1 %v1756_v32  ;;  %v1778_v32 = vld [vmem:[#allocation3 + $0x100] sm:$0xff] }
 0x115   : > { %1269 = vst.msk [vmem:[#allocation3 + $0x68] sm:$0xff] %vm622_vm2, %v1178_v33  ;;  %v321_v33 = vld [vmem:[%s3116_s25 + $0xa0] sm:$0xff] }
 0x118   : > { %1384 = vrot.lane.b32.xlu1 %v3598_v7, %s2990_s13 }
 0x119   : > { %1576 = vrot.lane.b32.xlu2 %v3650_v29, %s2991_s15  ;;  %550 = vrot.lane.b32.xlu0 %v3552_v54, %s2989_s29 }
 0x11a   : > { %v1371_v36 = vpop.permute.xlu1 %1370  ;;  %2767 = vmatmul.msk.f32.gmra.mxu2 %vm245_vm0, %v1772_v4  ;;  %v3862_v4 = vld [vmem:[#allocation2 + $0xf8] sm:$0xff] }
 0x11b   : > { %v925_v37 = vpop.permute.xlu2 %924  ;;  %1462 = vst.msk [vmem:[#allocation3 + $0x68] sm:$0xff] %vm815_vm3, %v1371_v36  ;;  %v1758_v41 = vld [vmem:[#allocation3 + $0x60] sm:$0xff]  ;;  %v537_v42 = vpop.permute.xlu0 %536 }
 0x11c   : > { %1654 = vst.msk [vmem:[#allocation3 + $0x68] sm:$0xff] %vm1008_vm4, %v1563_v17  ;;  %2006 = vmatmul.f32.gmra.mxu0 %v1758_v41  ;;  %v2349_v17 = vld [vmem:[%s4631_s3] sm:$0xff] }
 0x11d   : > { %628 = vst.msk [vmem:[#allocation3 + $0x78] sm:$0xff] %vm622_vm2, %v537_v42  ;;  %2467 = vmatpush.msra.mxu3 %v2349_v17  ;;  %v3822_v41 = vld [vmem:[%s4630_s2] ss:$0 sm:$0xff] }
 0x120   : > { %743 = vrot.lane.b32.xlu1 %v3561_v46, %s2990_s13  ;;  %v318_v46 = vld [vmem:[%s3116_s25 + $0x88] sm:$0xff] }
 0x121   : > { %936 = vrot.lane.b32.xlu2 %v3565_v47, %s2991_s15  ;;  %1193 = vrot.lane.b32.xlu0 %v3627_v20, %s2989_s29  ;;  %v350_v47 = vmax.f32 %v318_v46, 0.0  ;;  %v322_v46 = vld [vmem:[%s3116_s25 + $0xa8] sm:$0xff] }
 0x122   : > { %v730_v38 = vpop.permute.xlu1 %729 }
 0x123   : > { %v1567_v40 = vpop.permute.xlu2 %1566  ;;  %821 = vst.msk [vmem:[#allocation3 + $0x78] sm:$0xff] %vm815_vm3, %v730_v38  ;;  %v1759_v49 = vld [vmem:[#allocation3 + $0x68] sm:$0xff]  ;;  %v1180_v50 = vpop.permute.xlu0 %1179 }
 0x124   : > { %1014 = vst.msk [vmem:[#allocation3 + $0x78] sm:$0xff] %vm1008_vm4, %v923_v23  ;;  %2119 = vmatmul.f32.gmra.mxu1 %v1759_v49 }
 0x125   : > { %1270 = vst.msk [vmem:[#allocation3 + $0x80] sm:$0xff] %vm622_vm2, %v1180_v50 }
 0x126   : > { %383 = vst.msk [vmem:[#allocation2 + $0xe1] sm:$0xff] %vm245_vm0, %v350_v47  ;;  %v2221_v49 = vpop.f32.mrf.mxu2 }
 0x128   : > { %1386 = vrot.lane.b32.xlu1 %v3631_v21, %s2990_s13 }
 0x129   : > { %1578 = vrot.lane.b32.xlu2 %v3683_v48, %s2991_s15  ;;  %552 = vrot.lane.b32.xlu0 %v3584_v1, %s2989_s29 }
 0x12a   : > { %v1373_v53 = vpop.permute.xlu1 %1372 }
 0x12b   : > { %v927_v54 = vpop.permute.xlu2 %926  ;;  %1463 = vst.msk [vmem:[#allocation3 + $0x80] sm:$0xff] %vm815_vm3, %v1373_v53  ;;  %v1761_v43 = vld [vmem:[#allocation3 + $0x78] sm:$0xff]  ;;  %v539_v55 = vpop.permute.xlu0 %538 }
 0x12c   : > { %1655 = vst.msk [vmem:[#allocation3 + $0x80] sm:$0xff] %vm1008_vm4, %v1565_v31  ;;  %2009 = vmatmul.f32.gmra.mxu0 %v1761_v43 }
 0x12d   : > { %629 = vst.msk [vmem:[#allocation3 + $0x90] sm:$0xff] %vm622_vm2, %v539_v55  ;;  %v3755_v11 = vld [vmem:[#allocation2 + $0xda] sm:$0xff]  ;;  %v3790_v27 = vld [vmem:[#allocation2 + $0xe2] sm:$0xff] }
 0x12e   : > { %1728 = vst.msk [vmem:[#allocation3 + $0x160] sm:$0xff] %vm245_vm0, %v3755_v11  ;;  %v1313_v26 = vld [vmem:[#allocation2 + $0xe0] sm:$0xff]  ;;  %v1781_v55 = vld [vmem:[#allocation3 + $0x118] sm:$0xff] }
 0x12f   : > { %1729 = vst.msk [vmem:[#allocation3 + $0x178] sm:$0xff] %vm245_vm0, %v3790_v27 }
 0x130   : > { %745 = vrot.lane.b32.xlu1 %v3594_v6, %s2990_s13  ;;  %v3745_v6 = vld [vmem:[#allocation2 + $0xd9] sm:$0xff] }
 0x131   : > { %938 = vrot.lane.b32.xlu2 %v3598_v7, %s2991_s15  ;;  %1195 = vrot.lane.b32.xlu0 %v3660_v34, %s2989_s29  ;;  %1089 = vst.msk [vmem:[#allocation3 + $0x188] sm:$0xff] %vm245_vm0, %v3745_v6 }
 0x132   : > { %v732_v58 = vpop.permute.xlu1 %731 }
 0x133   : > { %v1569_v59 = vpop.permute.xlu2 %1568  ;;  %822 = vst.msk [vmem:[#allocation3 + $0x90] sm:$0xff] %vm815_vm3, %v732_v58  ;;  %v1762_v60 = vld [vmem:[#allocation3 + $0x80] sm:$0xff]  ;;  %v1182_v61 = vpop.permute.xlu0 %1181  ;;  %v3851_v58 = vld [vmem:[#allocation2 + $0xf9] sm:$0xff] }
 0x134   : > { %1015 = vst.msk [vmem:[#allocation3 + $0x90] sm:$0xff] %vm1008_vm4, %v925_v37  ;;  %2122 = vmatmul.f32.gmra.mxu1 %v1762_v60  ;;  %v2224_v60 = vpop.f32.mrf.mxu2 }
 0x135   : > { %1271 = vst.msk [vmem:[#allocation3 + $0x98] sm:$0xff] %vm622_vm2, %v1182_v61 }
 0x136   : > { %1092 = vst.msk [vmem:[#allocation3 + $0x1d0] sm:$0xff] %vm245_vm0, %v3851_v58 }
 0x138   : > { %1388 = vrot.lane.b32.xlu1 %v3664_v35, %s2990_s13 }
 0x139   : > { %1580 = vrot.lane.b32.xlu2 %v3716_v57, %s2991_s15  ;;  %554 = vrot.lane.b32.xlu0 %v3617_v15, %s2989_s29 }
 0x13a   : > { %v1375_v63 = vpop.permute.xlu1 %1374 }
 0x13b   : > { %v929_v0 = vpop.permute.xlu2 %928  ;;  %1464 = vst.msk [vmem:[#allocation3 + $0x98] sm:$0xff] %vm815_vm3, %v1375_v63  ;;  %v1764_v1 = vld [vmem:[#allocation3 + $0x90] sm:$0xff]  ;;  %v541_v3 = vpop.permute.xlu0 %540 }
 0x13c   : > { %1656 = vst.msk [vmem:[#allocation3 + $0x98] sm:$0xff] %vm1008_vm4, %v1567_v40  ;;  %2012 = vmatmul.f32.gmra.mxu0 %v1764_v1  ;;  %v2227_v19 = vpop.f32.mrf.mxu2 }
 0x13d   : > { %630 = vst.msk [vmem:[#allocation3 + $0xa8] sm:$0xff] %vm622_vm2, %v541_v3 }
 0x140   : > { %747 = vrot.lane.b32.xlu1 %v3627_v20, %s2990_s13  ;;  %v1775_v20 = vld [vmem:[#allocation3 + $0xe8] sm:$0xff] }
 0x141   : > { %940 = vrot.lane.b32.xlu2 %v3631_v21, %s2991_s15  ;;  %1197 = vrot.lane.b32.xlu0 %v3693_v51, %s2989_s29  ;;  %v3779_v21 = vld [vmem:[#allocation2 + $0xe1] sm:$0xff] }
 0x142   : > { %v734_v7 = vpop.permute.xlu1 %733  ;;  %2768 = vmatmul.msk.f32.gmra.mxu2 %vm245_vm0, %v1775_v20  ;;  %1090 = vst.msk [vmem:[#allocation3 + $0x1a0] sm:$0xff] %vm245_vm0, %v3779_v21 }
 0x143   : > { %v1571_v8 = vpop.permute.xlu2 %1570  ;;  %823 = vst.msk [vmem:[#allocation3 + $0xa8] sm:$0xff] %vm815_vm3, %v734_v7  ;;  %v1765_v9 = vld [vmem:[#allocation3 + $0x98] sm:$0xff]  ;;  %v1184_v10 = vpop.permute.xlu0 %1183 }
 0x144   : > { %1016 = vst.msk [vmem:[#allocation3 + $0xa8] sm:$0xff] %vm1008_vm4, %v927_v54  ;;  %2125 = vmatmul.f32.gmra.mxu1 %v1765_v9 }
 0x145   : > { %1272 = vst.msk [vmem:[#allocation3 + $0xb0] sm:$0xff] %vm622_vm2, %v1184_v10 }
 0x148   : > { %1390 = vrot.lane.b32.xlu1 %v3697_v52, %s2990_s13 }
 0x149   : > { %1582 = vrot.lane.b32.xlu2 %v3745_v6, %s2991_s15  ;;  %556 = vrot.lane.b32.xlu0 %v3650_v29, %s2989_s29  ;;  %v1995_v44 = vpop.f32.mrf.mxu0 }
 0x14a   : > { %v1377_v12 = vpop.permute.xlu1 %1376  ;;  %2769 = vmatmul.msk.f32.gmra.mxu2 %vm245_vm0, %v1778_v32  ;;  %v1996_v38 = vadd.f32 %v3822_v41, %v1995_v44 }
 0x14b   : > { %v931_v13 = vpop.permute.xlu2 %930  ;;  %1465 = vst.msk [vmem:[#allocation3 + $0xb0] sm:$0xff] %vm815_vm3, %v1377_v12  ;;  %v1767_v14 = vld [vmem:[#allocation3 + $0xa8] sm:$0xff]  ;;  %v543_v15 = vpop.permute.xlu0 %542 }
 0x14c   : > { %1657 = vst.msk [vmem:[#allocation3 + $0xb0] sm:$0xff] %vm1008_vm4, %v1569_v59  ;;  %2015 = vmatmul.f32.gmra.mxu0 %v1767_v14 }
 0x14d   : > { %631 = vst.msk [vmem:[#allocation3 + $0xc0] sm:$0xff] %vm622_vm2, %v543_v15  ;;  %v323_v15 = vld [vmem:[%s3116_s25 + $0xb0] sm:$0xff] }
 0x14e   : > { %v355_v16 = vmax.f32 %v323_v15, 0.0  ;;  %v1793_v15 = vld [vmem:[#allocation3 + $0x178] sm:$0xff] }
 0x150   : > { %749 = vrot.lane.b32.xlu1 %v3660_v34, %s2990_s13  ;;  %v353_v34 = vmax.f32 %v321_v33, 0.0  ;;  %388 = vst.msk [vmem:[#allocation2 + $0x121] sm:$0xff] %vm245_vm0, %v355_v16 }
 0x151   : > { %942 = vrot.lane.b32.xlu2 %v3664_v35, %s2991_s15  ;;  %1199 = vrot.lane.b32.xlu0 %v3726_v62, %s2989_s29  ;;  %v3810_v35 = vld [vmem:[#allocation2 + $0xf1] sm:$0xff] }
 0x152   : > { %v736_v22 = vpop.permute.xlu1 %735  ;;  %386 = vst.msk [vmem:[#allocation2 + $0x109] sm:$0xff] %vm245_vm0, %v353_v34  ;;  %2770 = vmatmul.msk.f32.gmra.mxu2 %vm245_vm0, %v1781_v55  ;;  %v1787_v34 = vld [vmem:[#allocation3 + $0x148] sm:$0xff] }
 0x153   : > { %v1573_v23 = vpop.permute.xlu2 %1572  ;;  %824 = vst.msk [vmem:[#allocation3 + $0xc0] sm:$0xff] %vm815_vm3, %v736_v22  ;;  %v1768_v24 = vld [vmem:[#allocation3 + $0xb0] sm:$0xff]  ;;  %v1186_v25 = vpop.permute.xlu0 %1185 }
 0x154   : > { %1017 = vst.msk [vmem:[#allocation3 + $0xc0] sm:$0xff] %vm1008_vm4, %v929_v0  ;;  %2128 = vmatmul.f32.gmra.mxu1 %v1768_v24 }
 0x155   : > { %1273 = vst.msk [vmem:[#allocation3 + $0xc8] sm:$0xff] %vm622_vm2, %v1186_v25 }
 0x156   : > { %1091 = vst.msk [vmem:[#allocation3 + $0x1b8] sm:$0xff] %vm245_vm0, %v3810_v35 }
 0x158   : > { %1392 = vrot.lane.b32.xlu1 %v1313_v26, %s2990_s13 }
 0x159   : > { %1584 = vrot.lane.b32.xlu2 %v3779_v21, %s2991_s15  ;;  %558 = vrot.lane.b32.xlu0 %v3683_v48, %s2989_s29  ;;  %v3829_v48 = vld [vmem:[#allocation2 + $0xf2] sm:$0xff]  ;;  %v3889_v17 = vld [vmem:[#allocation2 + $0x109] sm:$0xff] }
 0x15a   : > { %v1379_v28 = vpop.permute.xlu1 %1378  ;;  %1730 = vst.msk [vmem:[#allocation3 + $0x190] sm:$0xff] %vm245_vm0, %v3829_v48 }
 0x15b   : > { %v3799_v29 = vpop.permute.xlu2 %932  ;;  %1466 = vst.msk [vmem:[#allocation3 + $0xc8] sm:$0xff] %vm815_vm3, %v1379_v28  ;;  %v1770_v30 = vld [vmem:[#allocation3 + $0xc0] sm:$0xff]  ;;  %v545_v31 = vpop.permute.xlu0 %544 }
 0x15c   : > { %1658 = vst.msk [vmem:[#allocation3 + $0xc8] sm:$0xff] %vm1008_vm4, %v1571_v8  ;;  %2018 = vmatmul.f32.gmra.mxu0 %v1770_v30 }
 0x15d   : > { %632 = vst.msk [vmem:[#allocation3 + $0xd8] sm:$0xff] %vm622_vm2, %v545_v31 }
 0x15e   : > { %1093 = vst.msk [vmem:[#allocation3 + $0x1e8] sm:$0xff] %vm245_vm0, %v3889_v17 }
 0x160   : > { %751 = vrot.lane.b32.xlu1 %v3693_v51, %s2990_s13 }
 0x161   : > { %944 = vrot.lane.b32.xlu2 %v3697_v52, %s2991_s15  ;;  %1201 = vrot.lane.b32.xlu0 %v3755_v11, %s2989_s29 }
 0x162   : > { %v738_v36 = vpop.permute.xlu1 %737 }
 0x163   : > { %v3817_v37 = vpop.permute.xlu2 %1574  ;;  %825 = vst.msk [vmem:[#allocation3 + $0xd8] sm:$0xff] %vm815_vm3, %v738_v36  ;;  %v1771_v42 = vld [vmem:[#allocation3 + $0xc8] sm:$0xff]  ;;  %v1188_v39 = vpop.permute.xlu0 %1187 }
 0x164   : > { %1018 = vst.msk [vmem:[#allocation3 + $0xd8] sm:$0xff] %vm1008_vm4, %v931_v13  ;;  %2131 = vmatmul.f32.gmra.mxu1 %v1771_v42  ;;  %v1784_v13 = vld [vmem:[#allocation3 + $0x130] sm:$0xff] }
 0x165   : > { %1274 = vst.msk [vmem:[#allocation3 + $0xe0] sm:$0xff] %vm622_vm2, %v1188_v39  ;;  %2771 = vmatmul.msk.f32.gmra.mxu2 %vm245_vm0, %v1784_v13 }
 0x168   : > { %1394 = vrot.lane.b32.xlu1 %v3826_v45, %s2990_s13  ;;  %v2108_v40 = vpop.f32.mrf.mxu1 }
 0x169   : > { %1586 = vrot.lane.b32.xlu2 %v3810_v35, %s2991_s15  ;;  %v2109_v50 = vadd.f32 %v2108_v40, %v1996_v38  ;;  %560 = vrot.lane.b32.xlu0 %v3716_v57, %s2989_s29  ;;  %v1998_v47 = vpop.f32.mrf.mxu0  ;;  %v354_v57 = vmax.f32 %v322_v46, 0.0 }
 0x16a   : > { %v1381_v51 = vpop.permute.xlu1 %1380  ;;  %v1999_v59 = vadd.f32 %v3822_v41, %v1998_v47  ;;  %v1790_v47 = vld [vmem:[#allocation3 + $0x160] sm:$0xff] }
 0x16b   : > { %v3840_v52 = vpop.permute.xlu2 %934  ;;  %v2222_v53 = vadd.f32 %v2221_v49, %v2109_v50  ;;  %1467 = vst.msk [vmem:[#allocation3 + $0xe0] sm:$0xff] %vm815_vm3, %v1381_v51  ;;  %v1773_v54 = vld [vmem:[#allocation3 + $0xd8] sm:$0xff]  ;;  %v547_v43 = vpop.permute.xlu0 %546 }
 0x16c   : > { %1659 = vst.msk [vmem:[#allocation3 + $0xe0] sm:$0xff] %vm1008_vm4, %v1573_v23  ;;  %2021 = vmatmul.f32.gmra.mxu0 %v1773_v54 }
 0x16d   : > { %v2317_v56 = vmax.f32 %v2222_v53, 0.0  ;;  %633 = vst.msk [vmem:[#allocation3 + $0xf0] sm:$0xff] %vm622_vm2, %v547_v43  ;;  %2772 = vmatmul.msk.f32.gmra.mxu2 %vm245_vm0, %v1787_v34 }
 0x16e   : > { %387 = vst.msk [vmem:[#allocation2 + $0x111] sm:$0xff] %vm245_vm0, %v354_v57 }
 0x16f   : > { %2791 = vmatmul.msk.f32.vlgmr.msra.gmra.mxu3 %vm2355_vm5, %v2317_v56 }
 0x170   : > { %753 = vrot.lane.b32.xlu1 %v3726_v62, %s2990_s13 }
 0x171   : > { %946 = vrot.lane.b32.xlu2 %v1313_v26, %s2991_s15  ;;  %1203 = vrot.lane.b32.xlu0 %v3790_v27, %s2989_s29  ;;  %v3899_v26 = vld [vmem:[#allocation2 + $0x108] sm:$0xff] }
 0x172   : > { %v740_v61 = vpop.permute.xlu1 %739  ;;  %v2111_v63 = vpop.f32.mrf.mxu1 }
 0x173   : > { %826 = vst.msk [vmem:[#allocation3 + $0xf0] sm:$0xff] %vm815_vm3, %v740_v61  ;;  %v1774_v62 = vld [vmem:[#allocation3 + $0xe0] sm:$0xff]  ;;  %v2112_v0 = vadd.f32 %v2111_v63, %v1999_v59  ;;  %v1190_v1 = vpop.permute.xlu0 %1189  ;;  %v1577_v3 = vpop.permute.xlu2 %1576  ;;  %v3959_v61 = vld [vmem:[#allocation2 + $0x121] sm:$0xff] }
 0x174   : > { %1019 = vst.msk [vmem:[#allocation3 + $0xf0] sm:$0xff] %vm1008_vm4, %v3799_v29  ;;  %2134 = vmatmul.f32.gmra.mxu1 %v1774_v62 }
 0x175   : > { %v2225_v5 = vadd.f32 %v2224_v60, %v2112_v0  ;;  %1275 = vst.msk [vmem:[#allocation3 + $0xf8] sm:$0xff] %vm622_vm2, %v1190_v1  ;;  %v3902_v29 = vld [vmem:[#allocation2 + $0x10a] sm:$0xff]  ;;  %v3938_v54 = vld [vmem:[#allocation2 + $0x112] sm:$0xff]  ;;  %2773 = vmatmul.msk.f32.gmra.mxu2 %vm245_vm0, %v1790_v47 }
 0x176   : > { %1732 = vst.msk [vmem:[#allocation3 + $0x1c0] sm:$0xff] %vm245_vm0, %v3902_v29  ;;  %v3923_v39 = vld [vmem:[#allocation2 + $0x111] sm:$0xff] }
 0x177   : > { %v2318_v7 = vmax.f32 %v2225_v5, 0.0  ;;  %1094 = vst.msk [vmem:[#allocation3 + $0x200] sm:$0xff] %vm245_vm0, %v3923_v39 }
 0x178   : > { %1396 = vrot.lane.b32.xlu1 %v3862_v4, %s2990_s13  ;;  %1733 = vst.msk [vmem:[#allocation3 + $0x1d8] sm:$0xff] %vm245_vm0, %v3938_v54 }
 0x179   : > { %1588 = vrot.lane.b32.xlu2 %v3851_v58, %s2991_s15  ;;  %2792 = vmatmul.msk.f32.gmra.mxu3 %vm2355_vm5, %v2318_v7  ;;  %v2001_v14 = vpop.f32.mrf.mxu0  ;;  %1095 = vst.msk [vmem:[#allocation3 + $0x218] sm:$0xff] %vm245_vm0, %v3959_v61  ;;  %v3971_v7 = vld [vmem:[#allocation2 + $0x120] sm:$0xff] }
 0x17a   : > { %562 = vrot.lane.b32.xlu0 %v3745_v6, %s2989_s29  ;;  %v1383_v8 = vpop.permute.xlu1 %1382  ;;  %v2002_v6 = vadd.f32 %v3822_v41, %v2001_v14 }
 0x17b   : > { %1468 = vst.msk [vmem:[#allocation3 + $0xf8] sm:$0xff] %vm815_vm3, %v1383_v8  ;;  %v1776_v9 = vld [vmem:[#allocation3 + $0xf0] sm:$0xff]  ;;  %v549_v10 = vpop.permute.xlu0 %548  ;;  %v3877_v12 = vpop.permute.xlu2 %936 }
 0x17c   : > { %1660 = vst.msk [vmem:[#allocation3 + $0xf8] sm:$0xff] %vm1008_vm4, %v3817_v37  ;;  %2024 = vmatmul.f32.gmra.mxu0 %v1776_v9 }
 0x17d   : > { %634 = vst.msk [vmem:[#allocation3 + $0x108] sm:$0xff] %vm622_vm2, %v549_v10  ;;  %2774 = vmatmul.msk.f32.gmra.mxu2 %vm245_vm0, %v1793_v15 }
 0x180   : > { %755 = vrot.lane.b32.xlu1 %v3755_v11, %s2990_s13 }
 0x181   : > { %948 = vrot.lane.b32.xlu2 %v3826_v45, %s2991_s15  ;;  %v2114_v18 = vpop.f32.mrf.mxu1  ;;  %v2230_v45 = vpop.f32.mrf.mxu2 }
 0x182   : > { %1205 = vrot.lane.b32.xlu0 %v3829_v48, %s2989_s29  ;;  %v2115_v20 = vadd.f32 %v2114_v18, %v2002_v6  ;;  %v742_v22 = vpop.permute.xlu1 %741 }
 0x183   : > { %827 = vst.msk [vmem:[#allocation3 + $0x108] sm:$0xff] %vm815_vm3, %v742_v22  ;;  %v1777_v11 = vld [vmem:[#allocation3 + $0xf8] sm:$0xff]  ;;  %v1192_v23 = vpop.permute.xlu0 %1191  ;;  %v1579_v24 = vpop.permute.xlu2 %1578 }
 0x184   : > { %v2228_v25 = vadd.f32 %v2227_v19, %v2115_v20  ;;  %1020 = vst.msk [vmem:[#allocation3 + $0x108] sm:$0xff] %vm1008_vm4, %v3840_v52  ;;  %2137 = vmatmul.f32.gmra.mxu1 %v1777_v11  ;;  %v3935_v52 = vld [vmem:[#allocation2 + $0x110] sm:$0xff] }
 0x185   : > { %1276 = vst.msk [vmem:[#allocation3 + $0x110] sm:$0xff] %vm622_vm2, %v1192_v23 }
 0x186   : > { %v2319_v28 = vmax.f32 %v2228_v25, 0.0 }
 0x188   : > { %1398 = vrot.lane.b32.xlu1 %v3899_v26, %s2990_s13  ;;  %2793 = vmatmul.msk.f32.gmra.mxu3 %vm2355_vm5, %v2319_v28 }
 0x189   : > { %1590 = vrot.lane.b32.xlu2 %v3889_v17, %s2991_s15  ;;  %v2004_v36 = vpop.f32.mrf.mxu0  ;;  %v2233_v62 = vpop.f32.mrf.mxu2 }
 0x18a   : > { %564 = vrot.lane.b32.xlu0 %v3779_v21, %s2989_s29  ;;  %v1385_v30 = vpop.permute.xlu1 %1384  ;;  %v324_v21 = vld [vmem:[%s3116_s25 + $0xb8] sm:$0xff]  ;;  %v2005_v42 = vadd.f32 %v3822_v41, %v2004_v36 }
 0x18b   : > { %1469 = vst.msk [vmem:[#allocation3 + $0x110] sm:$0xff] %vm815_vm3, %v1385_v30  ;;  %v1779_v31 = vld [vmem:[#allocation3 + $0x108] sm:$0xff]  ;;  %v551_v32 = vpop.permute.xlu0 %550  ;;  %v3914_v33 = vpop.permute.xlu2 %938  ;;  %v356_v37 = vmax.f32 %v324_v21, 0.0  ;;  %v1796_v21 = vld [vmem:[#allocation3 + $0x190] sm:$0xff] }
 0x18c   : > { %1661 = vst.msk [vmem:[#allocation3 + $0x110] sm:$0xff] %vm1008_vm4, %v1577_v3  ;;  %2027 = vmatmul.f32.gmra.mxu0 %v1779_v31  ;;  %2775 = vmatmul.msk.f32.gmra.mxu2 %vm245_vm0, %v1796_v21 }
 0x18d   : > { %635 = vst.msk [vmem:[#allocation3 + $0x120] sm:$0xff] %vm622_vm2, %v551_v32 }
 0x18e   : > { %389 = vst.msk [vmem:[#allocation2 + $0x129] sm:$0xff] %vm245_vm0, %v356_v37 }
 0x190   : > { %757 = vrot.lane.b32.xlu1 %v3790_v27, %s2990_s13 }
 0x191   : > { %v2117_v44 = vpop.f32.mrf.mxu1  ;;  %950 = vrot.lane.b32.xlu2 %v3862_v4, %s2991_s15  ;;  %v2236_v22 = vpop.f32.mrf.mxu2 }
 0x192   : > { %1207 = vrot.lane.b32.xlu0 %v3865_v2, %s2989_s29  ;;  %v2118_v38 = vadd.f32 %v2117_v44, %v2005_v42  ;;  %v744_v40 = vpop.permute.xlu1 %743 }
 0x193   : > { %828 = vst.msk [vmem:[#allocation3 + $0x120] sm:$0xff] %vm815_vm3, %v744_v40  ;;  %v1780_v27 = vld [vmem:[#allocation3 + $0x110] sm:$0xff]  ;;  %v1194_v49 = vpop.permute.xlu0 %1193  ;;  %v1581_v50 = vpop.permute.xlu2 %1580 }
 0x194   : > { %v2231_v51 = vadd.f32 %v2230_v45, %v2118_v38  ;;  %1021 = vst.msk [vmem:[#allocation3 + $0x120] sm:$0xff] %vm1008_vm4, %v3877_v12  ;;  %2140 = vmatmul.f32.gmra.mxu1 %v1780_v27 }
 0x195   : > { %1277 = vst.msk [vmem:[#allocation3 + $0x128] sm:$0xff] %vm622_vm2, %v1194_v49  ;;  %v3974_v9 = vld [vmem:[#allocation2 + $0x122] sm:$0xff]  ;;  %v4010_v31 = vld [vmem:[#allocation2 + $0x12a] sm:$0xff] }
 0x196   : > { %v2320_v53 = vmax.f32 %v2231_v51, 0.0  ;;  %1734 = vst.msk [vmem:[#allocation3 + $0x1f0] sm:$0xff] %vm245_vm0, %v3974_v9  ;;  %v3995_v19 = vld [vmem:[#allocation2 + $0x129] sm:$0xff] }
 0x197   : > { %1096 = vst.msk [vmem:[#allocation3 + $0x230] sm:$0xff] %vm245_vm0, %v3995_v19  ;;  %v4007_v28 = vld [vmem:[#allocation2 + $0x128] sm:$0xff] }
 0x198   : > { %1400 = vrot.lane.b32.xlu1 %v3935_v52, %s2990_s13  ;;  %2794 = vmatmul.msk.f32.gmra.mxu3 %vm2355_vm5, %v2320_v53  ;;  %1735 = vst.msk [vmem:[#allocation3 + $0x208] sm:$0xff] %vm245_vm0, %v4010_v31 }
 0x199   : > { %1592 = vrot.lane.b32.xlu2 %v3923_v39, %s2991_s15  ;;  %v2007_v57 = vpop.f32.mrf.mxu0  ;;  %v2239_v40 = vpop.f32.mrf.mxu2 }
 0x19a   : > { %566 = vrot.lane.b32.xlu0 %v3810_v35, %s2989_s29  ;;  %v1387_v43 = vpop.permute.xlu1 %1386  ;;  %v325_v35 = vld [vmem:[%s3116_s25 + $0xc0] sm:$0xff]  ;;  %v2008_v60 = vadd.f32 %v3822_v41, %v2007_v57 }
 0x19b   : > { %1470 = vst.msk [vmem:[#allocation3 + $0x128] sm:$0xff] %vm815_vm3, %v1387_v43  ;;  %v1782_v55 = vld [vmem:[#allocation3 + $0x120] sm:$0xff]  ;;  %v553_v56 = vpop.permute.xlu0 %552  ;;  %v3950_v46 = vpop.permute.xlu2 %940  ;;  %v357_v59 = vmax.f32 %v325_v35, 0.0 }
 0x19c   : > { %1662 = vst.msk [vmem:[#allocation3 + $0x128] sm:$0xff] %vm1008_vm4, %v1579_v24  ;;  %2030 = vmatmul.f32.gmra.mxu0 %v1782_v55 }
 0x19d   : > { %636 = vst.msk [vmem:[#allocation3 + $0x138] sm:$0xff] %vm622_vm2, %v553_v56 }
 0x19e   : > { %390 = vst.msk [vmem:[#allocation2 + $0x139] sm:$0xff] %vm245_vm0, %v357_v59  ;;  %v1799_v59 = vld [vmem:[#allocation3 + $0x1a8] sm:$0xff] }
 0x19f   : > { %2776 = vmatmul.msk.f32.gmra.mxu2 %vm245_vm0, %v1799_v59 }
 0x1a0   : > { %759 = vrot.lane.b32.xlu1 %v3829_v48, %s2990_s13 }
 0x1a1   : > { %v2120_v63 = vpop.f32.mrf.mxu1  ;;  %952 = vrot.lane.b32.xlu2 %v3899_v26, %s2991_s15 }
 0x1a2   : > { %1209 = vrot.lane.b32.xlu0 %v3902_v29, %s2989_s29  ;;  %v2121_v0 = vadd.f32 %v2120_v63, %v2008_v60  ;;  %v746_v1 = vpop.permute.xlu1 %745 }
 0x1a3   : > { %829 = vst.msk [vmem:[#allocation3 + $0x138] sm:$0xff] %vm815_vm3, %v746_v1  ;;  %v1783_v48 = vld [vmem:[#allocation3 + $0x128] sm:$0xff]  ;;  %v1196_v3 = vpop.permute.xlu0 %1195  ;;  %v1583_v4 = vpop.permute.xlu2 %1582 }
 0x1a4   : > { %v2234_v5 = vadd.f32 %v2233_v62, %v2121_v0  ;;  %1022 = vst.msk [vmem:[#allocation3 + $0x138] sm:$0xff] %vm1008_vm4, %v3914_v33  ;;  %2143 = vmatmul.f32.gmra.mxu1 %v1783_v48  ;;  %v2242_v48 = vpop.f32.mrf.mxu2 }
 0x1a5   : > { %1278 = vst.msk [vmem:[#allocation3 + $0x140] sm:$0xff] %vm622_vm2, %v1196_v3  ;;  %v4031_v45 = vld [vmem:[#allocation2 + $0x139] sm:$0xff] }
 0x1a6   : > { %v2321_v8 = vmax.f32 %v2234_v5, 0.0  ;;  %1097 = vst.msk [vmem:[#allocation3 + $0x248] sm:$0xff] %vm245_vm0, %v4031_v45  ;;  %v4043_v53 = vld [vmem:[#allocation2 + $0x138] sm:$0xff] }
 0x1a8   : > { %1402 = vrot.lane.b32.xlu1 %v3971_v7, %s2990_s13  ;;  %2795 = vmatmul.msk.f32.gmra.mxu3 %vm2355_vm5, %v2321_v8 }
 0x1a9   : > { %1594 = vrot.lane.b32.xlu2 %v3959_v61, %s2991_s15  ;;  %v2010_v16 = vpop.f32.mrf.mxu0 }
 0x1aa   : > { %568 = vrot.lane.b32.xlu0 %v3851_v58, %s2989_s29  ;;  %v1389_v10 = vpop.permute.xlu1 %1388  ;;  %v326_v58 = vld [vmem:[%s3116_s25 + $0xc8] sm:$0xff]  ;;  %v2011_v18 = vadd.f32 %v3822_v41, %v2010_v16 }
 0x1ab   : > { %1471 = vst.msk [vmem:[#allocation3 + $0x140] sm:$0xff] %vm815_vm3, %v1389_v10  ;;  %v1785_v12 = vld [vmem:[#allocation3 + $0x138] sm:$0xff]  ;;  %v555_v13 = vpop.permute.xlu0 %554  ;;  %v3986_v14 = vpop.permute.xlu2 %942  ;;  %v358_v6 = vmax.f32 %v326_v58, 0.0 }
 0x1ac   : > { %1663 = vst.msk [vmem:[#allocation3 + $0x140] sm:$0xff] %vm1008_vm4, %v1581_v50  ;;  %2033 = vmatmul.f32.gmra.mxu0 %v1785_v12 }
 0x1ad   : > { %637 = vst.msk [vmem:[#allocation3 + $0x150] sm:$0xff] %vm622_vm2, %v555_v13 }
 0x1ae   : > { %391 = vst.msk [vmem:[#allocation2 + $0x141] sm:$0xff] %vm245_vm0, %v358_v6 }
 0x1b0   : > { %761 = vrot.lane.b32.xlu1 %v3865_v2, %s2990_s13 }
 0x1b1   : > { %v2123_v20 = vpop.f32.mrf.mxu1  ;;  %954 = vrot.lane.b32.xlu2 %v3935_v52, %s2991_s15 }
 0x1b2   : > { %1211 = vrot.lane.b32.xlu0 %v3938_v54, %s2989_s29  ;;  %v2124_v11 = vadd.f32 %v2123_v20, %v2011_v18  ;;  %v748_v23 = vpop.permute.xlu1 %747  ;;  %v1802_v18 = vld [vmem:[#allocation3 + $0x1c0] sm:$0xff] }
 0x1b3   : > { %830 = vst.msk [vmem:[#allocation3 + $0x150] sm:$0xff] %vm815_vm3, %v748_v23  ;;  %v1786_v2 = vld [vmem:[#allocation3 + $0x140] sm:$0xff]  ;;  %v1198_v24 = vpop.permute.xlu0 %1197  ;;  %v1585_v25 = vpop.permute.xlu2 %1584  ;;  %2777 = vmatmul.msk.f32.gmra.mxu2 %vm245_vm0, %v1802_v18  ;;  %v417_v23 = vld [vmem:[#allocation2 + $0xe0] sm:$0xff]  ;;  %v419_v18 = vld [vmem:[#allocation2 + $0xf8] sm:$0xff] }
 0x1b4   : > { %v2237_v26 = vadd.f32 %v2236_v22, %v2124_v11  ;;  %1023 = vst.msk [vmem:[#allocation3 + $0x150] sm:$0xff] %vm1008_vm4, %v3950_v46  ;;  %2146 = vmatmul.f32.gmra.mxu1 %v1786_v2 }
 0x1b5   : > { %1279 = vst.msk [vmem:[#allocation3 + $0x158] sm:$0xff] %vm622_vm2, %v1198_v24  ;;  %v4046_v55 = vld [vmem:[#allocation2 + $0x13a] sm:$0xff]  ;;  %v4088_v13 = vld [vmem:[#allocation2 + $0x142] sm:$0xff]  ;;  %v2245_v24 = vpop.f32.mrf.mxu2 }
 0x1b6   : > { %v2322_v30 = vmax.f32 %v2237_v26, 0.0  ;;  %1736 = vst.msk [vmem:[#allocation3 + $0x220] sm:$0xff] %vm245_vm0, %v4046_v55  ;;  %v4071_v0 = vld [vmem:[#allocation2 + $0x141] sm:$0xff] }
 0x1b7   : > { %1098 = vst.msk [vmem:[#allocation3 + $0x260] sm:$0xff] %vm245_vm0, %v4071_v0  ;;  %v4085_v10 = vld [vmem:[#allocation2 + $0x140] sm:$0xff] }
 0x1b8   : > { %1404 = vrot.lane.b32.xlu1 %v4007_v28, %s2990_s13  ;;  %2796 = vmatmul.msk.f32.gmra.mxu3 %vm2355_vm5, %v2322_v30  ;;  %1737 = vst.msk [vmem:[#allocation3 + $0x238] sm:$0xff] %vm245_vm0, %v4088_v13 }
 0x1b9   : > { %1596 = vrot.lane.b32.xlu2 %v3995_v19, %s2991_s15  ;;  %v2013_v37 = vpop.f32.mrf.mxu0  ;;  %449 = vst.msk [vmem:[#allocation3 + $0x1c8] sm:$0xff] %vm245_vm0, %v417_v23 }
 0x1ba   : > { %570 = vrot.lane.b32.xlu0 %v3889_v17, %s2989_s29  ;;  %v1391_v32 = vpop.permute.xlu1 %1390  ;;  %v327_v17 = vld [vmem:[%s3116_s25 + $0xd0] sm:$0xff]  ;;  %v2014_v44 = vadd.f32 %v3822_v41, %v2013_v37  ;;  %451 = vst.msk [vmem:[#allocation3 + $0x1f8] sm:$0xff] %vm245_vm0, %v419_v18 }
 0x1bb   : > { %1472 = vst.msk [vmem:[#allocation3 + $0x158] sm:$0xff] %vm815_vm3, %v1391_v32  ;;  %v1788_v33 = vld [vmem:[#allocation3 + $0x150] sm:$0xff]  ;;  %v557_v34 = vpop.permute.xlu0 %556  ;;  %v4022_v36 = vpop.permute.xlu2 %944  ;;  %v359_v42 = vmax.f32 %v327_v17, 0.0 }
 0x1bc   : > { %1664 = vst.msk [vmem:[#allocation3 + $0x158] sm:$0xff] %vm1008_vm4, %v1583_v4  ;;  %2036 = vmatmul.f32.gmra.mxu0 %v1788_v33 }
 0x1bd   : > { %638 = vst.msk [vmem:[#allocation3 + $0x168] sm:$0xff] %vm622_vm2, %v557_v34 }
 0x1be   : > { %392 = vst.msk [vmem:[#allocation2 + $0x151] sm:$0xff] %vm245_vm0, %v359_v42 }
 0x1c0   : > { %763 = vrot.lane.b32.xlu1 %v3902_v29, %s2990_s13 }
 0x1c1   : > { %v2126_v38 = vpop.f32.mrf.mxu1  ;;  %956 = vrot.lane.b32.xlu2 %v3971_v7, %s2991_s15 }
 0x1c2   : > { %1213 = vrot.lane.b32.xlu0 %v3974_v9, %s2989_s29  ;;  %v2127_v27 = vadd.f32 %v2126_v38, %v2014_v44  ;;  %v750_v49 = vpop.permute.xlu1 %749 }
 0x1c3   : > { %831 = vst.msk [vmem:[#allocation3 + $0x168] sm:$0xff] %vm815_vm3, %v750_v49  ;;  %v1789_v29 = vld [vmem:[#allocation3 + $0x158] sm:$0xff]  ;;  %v1200_v50 = vpop.permute.xlu0 %1199  ;;  %v1587_v51 = vpop.permute.xlu2 %1586 }
 0x1c4   : > { %v2240_v52 = vadd.f32 %v2239_v40, %v2127_v27  ;;  %1024 = vst.msk [vmem:[#allocation3 + $0x168] sm:$0xff] %vm1008_vm4, %v3986_v14  ;;  %2149 = vmatmul.f32.gmra.mxu1 %v1789_v29  ;;  %v330_v40 = vld [vmem:[%s3116_s25 + $0xe8] sm:$0xff]  ;;  %v1805_v49 = vld [vmem:[#allocation3 + $0x1d8] sm:$0xff] }
 0x1c5   : > { %1280 = vst.msk [vmem:[#allocation3 + $0x170] sm:$0xff] %vm622_vm2, %v1200_v50  ;;  %v4048_v56 = vld [vmem:[#allocation2 + $0x150] sm:$0xff]  ;;  %v362_v27 = vmax.f32 %v330_v40, 0.0  ;;  %2778 = vmatmul.msk.f32.gmra.mxu2 %vm245_vm0, %v1805_v49  ;;  %v1811_v40 = vld [vmem:[#allocation3 + $0x208] sm:$0xff]  ;;  %v420_v49 = vld [vmem:[#allocation2 + $0x108] sm:$0xff] }
 0x1c6   : > { %v2323_v43 = vmax.f32 %v2240_v52, 0.0  ;;  %458 = vst.msk [vmem:[#allocation3 + $0x2a0] sm:$0xff] %vm245_vm0, %v4048_v56  ;;  %v418_v50 = vld [vmem:[#allocation2 + $0xf0] sm:$0xff]  ;;  %v2248_v52 = vpop.f32.mrf.mxu2 }
 0x1c7   : > { %395 = vst.msk [vmem:[#allocation2 + $0x171] sm:$0xff] %vm245_vm0, %v362_v27 }
 0x1c8   : > { %1406 = vrot.lane.b32.xlu1 %v4043_v53, %s2990_s13  ;;  %2797 = vmatmul.msk.f32.gmra.mxu3 %vm2355_vm5, %v2323_v43  ;;  %450 = vst.msk [vmem:[#allocation3 + $0x1e0] sm:$0xff] %vm245_vm0, %v418_v50 }
 0x1c9   : > { %1598 = vrot.lane.b32.xlu2 %v4031_v45, %s2991_s15  ;;  %v2016_v60 = vpop.f32.mrf.mxu0  ;;  %452 = vst.msk [vmem:[#allocation3 + $0x210] sm:$0xff] %vm245_vm0, %v420_v49 }
 0x1ca   : > { %572 = vrot.lane.b32.xlu0 %v3923_v39, %s2989_s29  ;;  %v1393_v46 = vpop.permute.xlu1 %1392  ;;  %v328_v39 = vld [vmem:[%s3116_s25 + $0xd8] sm:$0xff]  ;;  %v2017_v62 = vadd.f32 %v3822_v41, %v2016_v60 }
 0x1cb   : > { %1473 = vst.msk [vmem:[#allocation3 + $0x170] sm:$0xff] %vm815_vm3, %v1393_v46  ;;  %v1791_v47 = vld [vmem:[#allocation3 + $0x168] sm:$0xff]  ;;  %v559_v57 = vpop.permute.xlu0 %558  ;;  %v4062_v35 = vpop.permute.xlu2 %946  ;;  %v360_v63 = vmax.f32 %v328_v39, 0.0 }
 0x1cc   : > { %1665 = vst.msk [vmem:[#allocation3 + $0x170] sm:$0xff] %vm1008_vm4, %v1585_v25  ;;  %2039 = vmatmul.f32.gmra.mxu0 %v1791_v47  ;;  %v4118_v25 = vld [vmem:[#allocation2 + $0x151] sm:$0xff] }
 0x1cd   : > { %639 = vst.msk [vmem:[#allocation3 + $0x180] sm:$0xff] %vm622_vm2, %v559_v57  ;;  %v2565_v47 = vld [vmem:[%s3116_s25] sm:$0xff] }
 0x1ce   : > { %393 = vst.msk [vmem:[#allocation2 + $0x159] sm:$0xff] %vm245_vm0, %v360_v63 }
 0x1cf   : > { %1099 = vst.msk [vmem:[#allocation3 + $0x278] sm:$0xff] %vm245_vm0, %v4118_v25 }
 0x1d0   : > { %765 = vrot.lane.b32.xlu1 %v3938_v54, %s2990_s13 }
 0x1d1   : > { %v2129_v1 = vpop.f32.mrf.mxu1  ;;  %958 = vrot.lane.b32.xlu2 %v4007_v28, %s2991_s15 }
 0x1d2   : > { %1215 = vrot.lane.b32.xlu0 %v4010_v31, %s2989_s29  ;;  %v2130_v3 = vadd.f32 %v2129_v1, %v2017_v62  ;;  %v752_v4 = vpop.permute.xlu1 %751 }
 0x1d3   : > { %832 = vst.msk [vmem:[#allocation3 + $0x180] sm:$0xff] %vm815_vm3, %v752_v4  ;;  %v1792_v54 = vld [vmem:[#allocation3 + $0x170] sm:$0xff]  ;;  %v1202_v5 = vpop.permute.xlu0 %1201  ;;  %v4081_v7 = vpop.permute.xlu2 %1588 }
 0x1d4   : > { %v2243_v8 = vadd.f32 %v2242_v48, %v2130_v3  ;;  %1025 = vst.msk [vmem:[#allocation3 + $0x180] sm:$0xff] %vm1008_vm4, %v4022_v36  ;;  %2152 = vmatmul.f32.gmra.mxu1 %v1792_v54 }
 0x1d5   : > { %1281 = vst.msk [vmem:[#allocation3 + $0x188] sm:$0xff] %vm622_vm2, %v1202_v5  ;;  %v4090_v14 = vld [vmem:[#allocation2 + $0x158] sm:$0xff] }
 0x1d6   : > { %v2324_v12 = vmax.f32 %v2243_v8, 0.0  ;;  %459 = vst.msk [vmem:[#allocation3 + $0x2b8] sm:$0xff] %vm245_vm0, %v4090_v14  ;;  %v4129_v36 = vld [vmem:[#allocation2 + $0x152] sm:$0xff]  ;;  %v4184_v1 = vld [vmem:[#allocation2 + $0x15a] sm:$0xff] }
 0x1d7   : > { %1738 = vst.msk [vmem:[#allocation3 + $0x250] sm:$0xff] %vm245_vm0, %v4129_v36 }
 0x1d8   : > { %1408 = vrot.lane.b32.xlu1 %v4085_v10, %s2990_s13  ;;  %2798 = vmatmul.msk.f32.gmra.mxu3 %vm2355_vm5, %v2324_v12  ;;  %1739 = vst.msk [vmem:[#allocation3 + $0x268] sm:$0xff] %vm245_vm0, %v4184_v1  ;;  %v331_v12 = vld [vmem:[%s3116_s25 + $0xf0] sm:$0xff] }
 0x1d9   : > { %1600 = vrot.lane.b32.xlu2 %v4071_v0, %s2991_s15  ;;  %v2019_v20 = vpop.f32.mrf.mxu0 }
 0x1da   : > { %574 = vrot.lane.b32.xlu0 %v3959_v61, %s2989_s29  ;;  %v1395_v15 = vpop.permute.xlu1 %1394  ;;  %v329_v61 = vld [vmem:[%s3116_s25 + $0xe0] sm:$0xff]  ;;  %v2020_v11 = vadd.f32 %v3822_v41, %v2019_v20 }
 0x1db   : > { %1474 = vst.msk [vmem:[#allocation3 + $0x188] sm:$0xff] %vm815_vm3, %v1395_v15  ;;  %v1794_v16 = vld [vmem:[#allocation3 + $0x180] sm:$0xff]  ;;  %v561_v58 = vpop.permute.xlu0 %560  ;;  %v4104_v6 = vpop.permute.xlu2 %948  ;;  %v361_v22 = vmax.f32 %v329_v61, 0.0  ;;  %v363_v15 = vmax.f32 %v331_v12, 0.0 }
 0x1dc   : > { %1666 = vst.msk [vmem:[#allocation3 + $0x188] sm:$0xff] %vm1008_vm4, %v1587_v51  ;;  %2042 = vmatmul.f32.gmra.mxu0 %v1794_v16  ;;  %v2251_v61 = vpop.f32.mrf.mxu2 }
 0x1dd   : > { %640 = vst.msk [vmem:[#allocation3 + $0x198] sm:$0xff] %vm622_vm2, %v561_v58  ;;  %v1808_v58 = vld [vmem:[#allocation3 + $0x1f0] sm:$0xff] }
 0x1de   : > { %394 = vst.msk [vmem:[#allocation2 + $0x169] sm:$0xff] %vm245_vm0, %v361_v22  ;;  %2779 = vmatmul.msk.f32.gmra.mxu2 %vm245_vm0, %v1808_v58 }
 0x1df   : > { %396 = vst.msk [vmem:[#allocation2 + $0x181] sm:$0xff] %vm245_vm0, %v363_v15 }
 0x1e0   : > { %767 = vrot.lane.b32.xlu1 %v3974_v9, %s2990_s13 }
 0x1e1   : > { %v2132_v2 = vpop.f32.mrf.mxu1  ;;  %960 = vrot.lane.b32.xlu2 %v4043_v53, %s2991_s15  ;;  %v4165_v53 = vld [vmem:[#allocation2 + $0x159] sm:$0xff] }
 0x1e2   : > { %1217 = vrot.lane.b32.xlu0 %v4046_v55, %s2989_s29  ;;  %v2133_v26 = vadd.f32 %v2132_v2, %v2020_v11  ;;  %v754_v28 = vpop.permute.xlu1 %753  ;;  %1100 = vst.msk [vmem:[#allocation3 + $0x290] sm:$0xff] %vm245_vm0, %v4165_v53 }
 0x1e3   : > { %833 = vst.msk [vmem:[#allocation3 + $0x198] sm:$0xff] %vm815_vm3, %v754_v28  ;;  %v1795_v9 = vld [vmem:[#allocation3 + $0x188] sm:$0xff]  ;;  %v1204_v30 = vpop.permute.xlu0 %1203  ;;  %v4124_v32 = vpop.permute.xlu2 %1590 }
 0x1e4   : > { %v2246_v33 = vadd.f32 %v2245_v24, %v2133_v26  ;;  %1026 = vst.msk [vmem:[#allocation3 + $0x198] sm:$0xff] %vm1008_vm4, %v4062_v35  ;;  %2155 = vmatmul.f32.gmra.mxu1 %v1795_v9  ;;  %v2254_v50 = vpop.f32.mrf.mxu2 }
 0x1e5   : > { %1282 = vst.msk [vmem:[#allocation3 + $0x1a0] sm:$0xff] %vm622_vm2, %v1204_v30  ;;  %v4131_v21 = vld [vmem:[#allocation2 + $0x168] sm:$0xff]  ;;  %v4189_v48 = vld [vmem:[#allocation2 + $0x170] sm:$0xff] }
 0x1e6   : > { %v2325_v34 = vmax.f32 %v2246_v33, 0.0  ;;  %460 = vst.msk [vmem:[#allocation3 + $0x2d0] sm:$0xff] %vm245_vm0, %v4131_v21  ;;  %v4226_v26 = vld [vmem:[#allocation2 + $0x169] sm:$0xff]  ;;  %2780 = vmatmul.msk.f32.gmra.mxu2 %vm245_vm0, %v1811_v40 }
 0x1e7   : > { %461 = vst.msk [vmem:[#allocation3 + $0x2e8] sm:$0xff] %vm245_vm0, %v4189_v48  ;;  %v4228_v28 = vld [vmem:[#allocation2 + $0x16a] sm:$0xff] }
 0x1e8   : > { %1410 = vrot.lane.b32.xlu1 %v4048_v56, %s2990_s13  ;;  %2799 = vmatmul.msk.f32.gmra.mxu3 %vm2355_vm5, %v2325_v34  ;;  %1101 = vst.msk [vmem:[#allocation3 + $0x2a8] sm:$0xff] %vm245_vm0, %v4226_v26 }
 0x1e9   : > { %1602 = vrot.lane.b32.xlu2 %v4118_v25, %s2991_s15  ;;  %v2022_v38 = vpop.f32.mrf.mxu0  ;;  %1740 = vst.msk [vmem:[#allocation3 + $0x280] sm:$0xff] %vm245_vm0, %v4228_v28 }
 0x1ea   : > { %576 = vrot.lane.b32.xlu0 %v3995_v19, %s2989_s29  ;;  %v1397_v37 = vpop.permute.xlu1 %1396  ;;  %v4154_v19 = vld [vmem:[%s4632_s4] ss:$0 sm:$0xff]  ;;  %v2023_v29 = vadd.f32 %v3822_v41, %v2022_v38 }
 0x1eb   : > { %1475 = vst.msk [vmem:[#allocation3 + $0x1a0] sm:$0xff] %vm815_vm3, %v1397_v37  ;;  %v1797_v17 = vld [vmem:[#allocation3 + $0x198] sm:$0xff]  ;;  %v4145_v44 = vpop.permute.xlu2 %950 }
 0x1ec   : > { %v563_v42 = vpop.permute.xlu0 %562  ;;  %1667 = vst.msk [vmem:[#allocation3 + $0x1a0] sm:$0xff] %vm1008_vm4, %v4081_v7  ;;  %2045 = vmatmul.f32.gmra.mxu0 %v1797_v17 }
 0x1ed   : > { %641 = vst.msk [vmem:[#allocation3 + $0x1b0] sm:$0xff] %vm622_vm2, %v563_v42  ;;  %v332_v42 = vld [vmem:[%s3116_s25 + $0xf8] sm:$0xff] }
 0x1ee   : > { %v364_v38 = vmax.f32 %v332_v42, 0.0 }
 0x1f0   : > { %769 = vrot.lane.b32.xlu1 %v4010_v31, %s2990_s13  ;;  %397 = vst.msk [vmem:[#allocation2 + $0x189] sm:$0xff] %vm245_vm0, %v364_v38 }
 0x1f1   : > { %v2135_v51 = vpop.f32.mrf.mxu1  ;;  %962 = vrot.lane.b32.xlu2 %v4085_v10, %s2991_s15 }
 0x1f2   : > { %1219 = vrot.lane.b32.xlu0 %v4088_v13, %s2989_s29  ;;  %v2136_v43 = vadd.f32 %v2135_v51, %v2023_v29  ;;  %v756_v31 = vpop.permute.xlu1 %755  ;;  %v2469_v46 = vpop.f32.mrf.mxu3 }
 0x1f3   : > { %834 = vst.msk [vmem:[#allocation3 + $0x1b0] sm:$0xff] %vm815_vm3, %v756_v31  ;;  %v2470_v57 = vadd.f32 %v4154_v19, %v2469_v46  ;;  %v1798_v35 = vld [vmem:[#allocation3 + $0x1a0] sm:$0xff]  ;;  %v4173_v60 = vpop.permute.xlu2 %1592 }
 0x1f4   : > { %v1206_v59 = vpop.permute.xlu0 %1205  ;;  %v2249_v39 = vadd.f32 %v2248_v52, %v2136_v43  ;;  %1027 = vst.msk [vmem:[#allocation3 + $0x1b0] sm:$0xff] %vm1008_vm4, %v4104_v6  ;;  %2158 = vmatmul.f32.gmra.mxu1 %v1798_v35 }
 0x1f5   : > { %v2597_v63 = vadd.f32 %v2565_v47, %v2470_v57  ;;  %1283 = vst.msk [vmem:[#allocation3 + $0x1b8] sm:$0xff] %vm622_vm2, %v1206_v59  ;;  %v4268_v57 = vld [vmem:[#allocation2 + $0x172] sm:$0xff] }
 0x1f6   : > { %v2326_v62 = vmax.f32 %v2249_v39, 0.0  ;;  %1741 = vst.msk [vmem:[#allocation3 + $0x298] sm:$0xff] %vm245_vm0, %v4268_v57 }
 0x1f7   : > { %2629 = vst.msk [vmem:[%s4180_s16] sm:$0xff] %vm245_vm0, %v2597_v63  ;;  %v4307_v18 = vld [vmem:[#allocation2 + $0x182] sm:$0xff] }
 0x1f8   : > { %1412 = vrot.lane.b32.xlu1 %v4090_v14, %s2990_s13  ;;  %2800 = vmatmul.msk.f32.gmra.mxu3 %vm2355_vm5, %v2326_v62  ;;  %1742 = vst.msk [vmem:[#allocation3 + $0x2b0] sm:$0xff] %vm245_vm0, %v4307_v18  ;;  %v4344_v40 = vld [vmem:[#allocation2 + $0x188] sm:$0xff] }
 0x1f9   : > { %1604 = vrot.lane.b32.xlu2 %v4165_v53, %s2991_s15  ;;  %v2025_v8 = vpop.f32.mrf.mxu0 }
 0x1fa   : > { %578 = vrot.lane.b32.xlu0 %v4031_v45, %s2989_s29  ;;  %v1399_v3 = vpop.permute.xlu1 %1398  ;;  %v2566_v45 = vld [vmem:[%s3116_s25 + $0x8] sm:$0xff]  ;;  %v2026_v6 = vadd.f32 %v3822_v41, %v2025_v8  ;;  %v2257_v8 = vpop.f32.mrf.mxu2 }
 0x1fb   : > { %1476 = vst.msk [vmem:[#allocation3 + $0x1b8] sm:$0xff] %vm815_vm3, %v1399_v3  ;;  %v1800_v4 = vld [vmem:[#allocation3 + $0x1b0] sm:$0xff]  ;;  %v4200_v5 = vpop.permute.xlu2 %952 }
 0x1fc   : > { %v565_v54 = vpop.permute.xlu0 %564  ;;  %1668 = vst.msk [vmem:[#allocation3 + $0x1b8] sm:$0xff] %vm1008_vm4, %v4124_v32  ;;  %2048 = vmatmul.f32.gmra.mxu0 %v1800_v4  ;;  %v2472_v7 = vpop.f32.mrf.mxu3  ;;  %v2567_v32 = vld [vmem:[%s3116_s25 + $0x10] sm:$0xff] }
 0x1fd   : > { %642 = vst.msk [vmem:[#allocation3 + $0x1c8] sm:$0xff] %vm622_vm2, %v565_v54  ;;  %v2473_v10 = vadd.f32 %v4154_v19, %v2472_v7  ;;  %v1814_v54 = vld [vmem:[#allocation3 + $0x220] sm:$0xff] }
 0x1fe   : > { %2781 = vmatmul.msk.f32.gmra.mxu2 %vm245_vm0, %v1814_v54  ;;  %v421_v7 = vld [vmem:[#allocation2 + $0x110] sm:$0xff] }
 0x1ff   : > { %v2598_v16 = vadd.f32 %v2566_v45, %v2473_v10  ;;  %v1518_v10 = vld [vmem:[#allocation2 + $0x181] sm:$0xff]  ;;  %453 = vst.msk [vmem:[#allocation3 + $0x228] sm:$0xff] %vm245_vm0, %v421_v7 }
 0x200   : > { %771 = vrot.lane.b32.xlu1 %v4046_v55, %s2990_s13  ;;  %1103 = vst.msk [vmem:[#allocation3 + $0x2d8] sm:$0xff] %vm245_vm0, %v1518_v10 }
 0x201   : > { %v2138_v20 = vpop.f32.mrf.mxu1  ;;  %2630 = vst.msk [vmem:[%s4180_s16 + $0x8] sm:$0xff] %vm245_vm0, %v2598_v16  ;;  %964 = vrot.lane.b32.xlu2 %v4048_v56, %s2991_s15 }
 0x202   : > { %1221 = vrot.lane.b32.xlu0 %v4129_v36, %s2989_s29  ;;  %v2139_v22 = vadd.f32 %v2138_v20, %v2026_v6  ;;  %v758_v11 = vpop.permute.xlu1 %757  ;;  %v4304_v6 = vld [vmem:[#allocation2 + $0x180] sm:$0xff] }
 0x203   : > { %835 = vst.msk [vmem:[#allocation3 + $0x1c8] sm:$0xff] %vm815_vm3, %v758_v11  ;;  %v1801_v55 = vld [vmem:[#allocation3 + $0x1b8] sm:$0xff]  ;;  %v4221_v2 = vpop.permute.xlu2 %1594 }
 0x204   : > { %v1208_v23 = vpop.permute.xlu0 %1207  ;;  %v2252_v24 = vadd.f32 %v2251_v61, %v2139_v22  ;;  %1028 = vst.msk [vmem:[#allocation3 + $0x1c8] sm:$0xff] %vm1008_vm4, %v4145_v44  ;;  %2161 = vmatmul.f32.gmra.mxu1 %v1801_v55  ;;  %v2569_v22 = vld [vmem:[%s3116_s25 + $0x20] sm:$0xff] }
 0x205   : > { %1284 = vst.msk [vmem:[#allocation3 + $0x1d0] sm:$0xff] %vm622_vm2, %v1208_v23 }
 0x206   : > { %v2327_v56 = vmax.f32 %v2252_v24, 0.0 }
 0x208   : > { %1414 = vrot.lane.b32.xlu1 %v4131_v21, %s2990_s13  ;;  %2801 = vmatmul.msk.f32.gmra.mxu3 %vm2355_vm5, %v2327_v56  ;;  %v1817_v56 = vld [vmem:[#allocation3 + $0x238] sm:$0xff] }
 0x209   : > { %1606 = vrot.lane.b32.xlu2 %v4226_v26, %s2991_s15  ;;  %2782 = vmatmul.msk.f32.gmra.mxu2 %vm245_vm0, %v1817_v56 }
 0x20a   : > { %580 = vrot.lane.b32.xlu0 %v4071_v0, %s2989_s29  ;;  %v1401_v9 = vpop.permute.xlu1 %1400  ;;  %v2028_v0 = vpop.f32.mrf.mxu0 }
 0x20b   : > { %1477 = vst.msk [vmem:[#allocation3 + $0x1d0] sm:$0xff] %vm815_vm3, %v1401_v9  ;;  %v2475_v30 = vpop.f32.mrf.mxu3  ;;  %v1803_v33 = vld [vmem:[#allocation3 + $0x1c8] sm:$0xff]  ;;  %v4246_v17 = vpop.permute.xlu2 %954  ;;  %v2029_v27 = vadd.f32 %v3822_v41, %v2028_v0  ;;  %v4327_v9 = vld [vmem:[%s4630_s2] ss:$0 sm:$0xff] }
 0x20c   : > { %v567_v34 = vpop.permute.xlu0 %566  ;;  %1669 = vst.msk [vmem:[#allocation3 + $0x1d0] sm:$0xff] %vm1008_vm4, %v4173_v60  ;;  %v2476_v37 = vadd.f32 %v4154_v19, %v2475_v30  ;;  %2051 = vmatmul.f32.gmra.mxu0 %v1803_v33  ;;  %v2568_v60 = vld [vmem:[%s3116_s25 + $0x18] sm:$0xff] }
 0x20d   : > { %643 = vst.msk [vmem:[#allocation3 + $0x1e0] sm:$0xff] %vm622_vm2, %v567_v34  ;;  %v2260_v34 = vpop.f32.mrf.mxu2 }
 0x20e   : > { %v2599_v44 = vadd.f32 %v2567_v32, %v2476_v37  ;;  %v422_v32 = vld [vmem:[#allocation2 + $0x120] sm:$0xff]  ;;  %v1519_v37 = vld [vmem:[#allocation2 + $0x189] sm:$0xff] }
 0x20f   : > { %454 = vst.msk [vmem:[#allocation3 + $0x240] sm:$0xff] %vm245_vm0, %v422_v32 }
 0x210   : > { %2631 = vst.msk [vmem:[%s4180_s16 + $0x10] sm:$0xff] %vm245_vm0, %v2599_v44  ;;  %773 = vrot.lane.b32.xlu1 %v4088_v13, %s2990_s13 }
 0x211   : > { %v2141_v29 = vpop.f32.mrf.mxu1  ;;  %966 = vrot.lane.b32.xlu2 %v4090_v14, %s2991_s15  ;;  %v4266_v14 = vld [vmem:[#allocation2 + $0x171] sm:$0xff]  ;;  %1104 = vst.msk [vmem:[#allocation3 + $0x2f0] sm:$0xff] %vm245_vm0, %v1519_v37 }
 0x212   : > { %1223 = vrot.lane.b32.xlu0 %v4184_v1, %s2989_s29  ;;  %v2142_v51 = vadd.f32 %v2141_v29, %v2029_v27  ;;  %v760_v52 = vpop.permute.xlu1 %759  ;;  %1102 = vst.msk [vmem:[#allocation3 + $0x2c0] sm:$0xff] %vm245_vm0, %v4266_v14  ;;  %v4347_v27 = vld [vmem:[#allocation2 + $0x18a] sm:$0xff] }
 0x213   : > { %836 = vst.msk [vmem:[#allocation3 + $0x1e0] sm:$0xff] %vm815_vm3, %v760_v52  ;;  %v1804_v13 = vld [vmem:[#allocation3 + $0x1d0] sm:$0xff]  ;;  %v1597_v46 = vpop.permute.xlu2 %1596 }
 0x214   : > { %v1210_v43 = vpop.permute.xlu0 %1209  ;;  %v2255_v31 = vadd.f32 %v2254_v50, %v2142_v51  ;;  %1029 = vst.msk [vmem:[#allocation3 + $0x1e0] sm:$0xff] %vm1008_vm4, %v4200_v5  ;;  %2164 = vmatmul.f32.gmra.mxu1 %v1804_v13  ;;  %v2570_v50 = vld [vmem:[%s3116_s25 + $0x28] sm:$0xff] }
 0x215   : > { %1285 = vst.msk [vmem:[#allocation3 + $0x1e8] sm:$0xff] %vm622_vm2, %v1210_v43 }
 0x216   : > { %v2328_v47 = vmax.f32 %v2255_v31, 0.0  ;;  %1743 = vst.msk [vmem:[#allocation3 + $0x2c8] sm:$0xff] %vm245_vm0, %v4347_v27 }
 0x218   : > { %1416 = vrot.lane.b32.xlu1 %v4189_v48, %s2990_s13  ;;  %2802 = vmatmul.msk.f32.gmra.mxu3 %vm2355_vm5, %v2328_v47 }
 0x219   : > { %1608 = vrot.lane.b32.xlu2 %v4266_v14, %s2991_s15 }
 0x21a   : > { %582 = vrot.lane.b32.xlu0 %v4118_v25, %s2989_s29  ;;  %v1403_v35 = vpop.permute.xlu1 %1402  ;;  %v2031_v25 = vpop.f32.mrf.mxu0 }
 0x21b   : > { %1478 = vst.msk [vmem:[#allocation3 + $0x1e8] sm:$0xff] %vm815_vm3, %v1403_v35  ;;  %v2478_v59 = vpop.f32.mrf.mxu3  ;;  %v1806_v39 = vld [vmem:[#allocation3 + $0x1e0] sm:$0xff]  ;;  %v4286_v3 = vpop.permute.xlu2 %956  ;;  %v2032_v5 = vadd.f32 %v3822_v41, %v2031_v25  ;;  %v423_v35 = vld [vmem:[#allocation2 + $0x128] sm:$0xff] }
 0x21c   : > { %v569_v63 = vpop.permute.xlu0 %568  ;;  %1670 = vst.msk [vmem:[#allocation3 + $0x1e8] sm:$0xff] %vm1008_vm4, %v4221_v2  ;;  %v2479_v62 = vadd.f32 %v4154_v19, %v2478_v59  ;;  %2054 = vmatmul.f32.gmra.mxu0 %v1806_v39 }
 0x21d   : > { %644 = vst.msk [vmem:[#allocation3 + $0x1f8] sm:$0xff] %vm622_vm2, %v569_v63 }
 0x21e   : > { %v2600_v4 = vadd.f32 %v2568_v60, %v2479_v62  ;;  %v2263_v60 = vpop.f32.mrf.mxu2  ;;  %455 = vst.msk [vmem:[#allocation3 + $0x258] sm:$0xff] %vm245_vm0, %v423_v35 }
 0x220   : > { %2632 = vst.msk [vmem:[%s4180_s16 + $0x18] sm:$0xff] %vm245_vm0, %v2600_v4  ;;  %775 = vrot.lane.b32.xlu1 %v4129_v36, %s2990_s13  ;;  %v1328_v4 = vld [vmem:[#allocation2 + $0x198] sm:$0xff] }
 0x221   : > { %v2144_v45 = vpop.f32.mrf.mxu1  ;;  %968 = vrot.lane.b32.xlu2 %v4131_v21, %s2991_s15 }
 0x222   : > { %1225 = vrot.lane.b32.xlu0 %v4228_v28, %s2989_s29  ;;  %v2145_v41 = vadd.f32 %v2144_v45, %v2032_v5  ;;  %v762_v12 = vpop.permute.xlu1 %761  ;;  %v1520_v5 = vld [vmem:[#allocation2 + $0x199] sm:$0xff] }
 0x223   : > { %837 = vst.msk [vmem:[#allocation3 + $0x1f8] sm:$0xff] %vm815_vm3, %v762_v12  ;;  %v1807_v36 = vld [vmem:[#allocation3 + $0x1e8] sm:$0xff]  ;;  %v1599_v58 = vpop.permute.xlu2 %1598 }
 0x224   : > { %v1212_v15 = vpop.permute.xlu0 %1211  ;;  %v2258_v16 = vadd.f32 %v2257_v8, %v2145_v41  ;;  %1030 = vst.msk [vmem:[#allocation3 + $0x1f8] sm:$0xff] %vm1008_vm4, %v4246_v17  ;;  %2167 = vmatmul.f32.gmra.mxu1 %v1807_v36  ;;  %v2571_v8 = vld [vmem:[%s3116_s25 + $0x30] sm:$0xff] }
 0x225   : > { %1286 = vst.msk [vmem:[#allocation3 + $0x200] sm:$0xff] %vm622_vm2, %v1212_v15 }
 0x226   : > { %v2329_v21 = vmax.f32 %v2258_v16, 0.0  ;;  %v1823_v16 = vld [vmem:[#allocation3 + $0x268] sm:$0xff] }
 0x228   : > { %1418 = vrot.lane.b32.xlu1 %v4304_v6, %s2990_s13  ;;  %2803 = vmatmul.msk.f32.gmra.mxu3 %vm2355_vm5, %v2329_v21 }
 0x229   : > { %1610 = vrot.lane.b32.xlu2 %v1518_v10, %s2991_s15  ;;  %v2034_v24 = vpop.f32.mrf.mxu0 }
 0x22a   : > { %584 = vrot.lane.b32.xlu0 %v4165_v53, %s2989_s29  ;;  %v1405_v20 = vpop.permute.xlu1 %1404  ;;  %v2035_v30 = vadd.f32 %v4327_v9, %v2034_v24  ;;  %v1521_v24 = vld [vmem:[#allocation2 + $0x1a1] sm:$0xff] }
 0x22b   : > { %1479 = vst.msk [vmem:[#allocation3 + $0x200] sm:$0xff] %vm815_vm3, %v1405_v20  ;;  %v2481_v61 = vpop.f32.mrf.mxu3  ;;  %v1809_v11 = vld [vmem:[#allocation3 + $0x1f8] sm:$0xff]  ;;  %v4321_v2 = vpop.permute.xlu2 %958 }
 0x22c   : > { %v571_v55 = vpop.permute.xlu0 %570  ;;  %1671 = vst.msk [vmem:[#allocation3 + $0x200] sm:$0xff] %vm1008_vm4, %v1597_v46  ;;  %v2482_v23 = vadd.f32 %v4154_v19, %v2481_v61  ;;  %2057 = vmatmul.f32.gmra.mxu0 %v1809_v11  ;;  %v1820_v46 = vld [vmem:[#allocation3 + $0x250] sm:$0xff] }
 0x22d   : > { %645 = vst.msk [vmem:[#allocation3 + $0x210] sm:$0xff] %vm622_vm2, %v571_v55  ;;  %2783 = vmatmul.msk.f32.gmra.mxu2 %vm245_vm0, %v1820_v46 }
 0x22e   : > { %v2601_v53 = vadd.f32 %v2569_v22, %v2482_v23  ;;  %v1329_v23 = vld [vmem:[#allocation2 + $0x1a0] sm:$0xff] }
 0x230   : > { %2633 = vst.msk [vmem:[%s4180_s16 + $0x20] sm:$0xff] %vm245_vm0, %v2601_v53  ;;  %777 = vrot.lane.b32.xlu1 %v4184_v1, %s2990_s13 }
 0x231   : > { %v2147_v33 = vpop.f32.mrf.mxu1  ;;  %970 = vrot.lane.b32.xlu2 %v4189_v48, %s2991_s15 }
 0x232   : > { %1227 = vrot.lane.b32.xlu0 %v4268_v57, %s2989_s29  ;;  %v2148_v17 = vadd.f32 %v2147_v33, %v2035_v30  ;;  %v764_v0 = vpop.permute.xlu1 %763  ;;  %v2572_v30 = vld [vmem:[%s3116_s25 + $0x38] sm:$0xff] }
 0x233   : > { %838 = vst.msk [vmem:[#allocation3 + $0x210] sm:$0xff] %vm815_vm3, %v764_v0  ;;  %v1810_v1 = vld [vmem:[#allocation3 + $0x200] sm:$0xff]  ;;  %v1601_v38 = vpop.permute.xlu2 %1600 }
 0x234   : > { %v1214_v42 = vpop.permute.xlu0 %1213  ;;  %v2261_v44 = vadd.f32 %v2260_v34, %v2148_v17  ;;  %1031 = vst.msk [vmem:[#allocation3 + $0x210] sm:$0xff] %vm1008_vm4, %v4286_v3  ;;  %2170 = vmatmul.f32.gmra.mxu1 %v1810_v1  ;;  %v1826_v1 = vld [vmem:[#allocation3 + $0x280] sm:$0xff] }
 0x235   : > { %1287 = vst.msk [vmem:[#allocation3 + $0x218] sm:$0xff] %vm622_vm2, %v1214_v42  ;;  %2784 = vmatmul.msk.f32.gmra.mxu2 %vm245_vm0, %v1823_v16 }
 0x236   : > { %v2330_v48 = vmax.f32 %v2261_v44, 0.0  ;;  %v425_v44 = vld [vmem:[#allocation2 + $0x140] sm:$0xff] }
 0x237   : > { %457 = vst.msk [vmem:[#allocation3 + $0x288] sm:$0xff] %vm245_vm0, %v425_v44 }
 0x238   : > { %1420 = vrot.lane.b32.xlu1 %v4344_v40, %s2990_s13  ;;  %2804 = vmatmul.msk.f32.gmra.mxu3 %vm2355_vm5, %v2330_v48 }
 0x239   : > { %1612 = vrot.lane.b32.xlu2 %v1519_v37, %s2991_s15  ;;  %v2037_v31 = vpop.f32.mrf.mxu0 }
 0x23a   : > { %586 = vrot.lane.b32.xlu0 %v4226_v26, %s2989_s29  ;;  %v1407_v49 = vpop.permute.xlu1 %1406  ;;  %v2038_v47 = vadd.f32 %v4327_v9, %v2037_v31  ;;  %v2573_v31 = vld [vmem:[%s3116_s25 + $0x40] sm:$0xff] }
 0x23b   : > { %1480 = vst.msk [vmem:[#allocation3 + $0x218] sm:$0xff] %vm815_vm3, %v1407_v49  ;;  %v2484_v29 = vpop.f32.mrf.mxu3  ;;  %v1812_v51 = vld [vmem:[#allocation3 + $0x210] sm:$0xff]  ;;  %v961_v43 = vpop.permute.xlu2 %960 }
 0x23c   : > { %v573_v52 = vpop.permute.xlu0 %572  ;;  %1672 = vst.msk [vmem:[#allocation3 + $0x218] sm:$0xff] %vm1008_vm4, %v1599_v58  ;;  %v2485_v13 = vadd.f32 %v4154_v19, %v2484_v29  ;;  %2060 = vmatmul.f32.gmra.mxu0 %v1812_v51 }
 0x23d   : > { %646 = vst.msk [vmem:[#allocation3 + $0x228] sm:$0xff] %vm622_vm2, %v573_v52  ;;  %2785 = vmatmul.msk.f32.gmra.mxu2 %vm245_vm0, %v1826_v1 }
 0x23e   : > { %v2602_v26 = vadd.f32 %v2570_v50, %v2485_v13 }
 0x240   : > { %2634 = vst.msk [vmem:[%s4180_s16 + $0x28] sm:$0xff] %vm245_vm0, %v2602_v26  ;;  %779 = vrot.lane.b32.xlu1 %v4228_v28, %s2990_s13 }
 0x241   : > { %v2150_v59 = vpop.f32.mrf.mxu1  ;;  %972 = vrot.lane.b32.xlu2 %v4304_v6, %s2991_s15  ;;  %v424_v6 = vld [vmem:[#allocation2 + $0x138] sm:$0xff] }
 0x242   : > { %1229 = vrot.lane.b32.xlu0 %v4307_v18, %s2989_s29  ;;  %v2151_v39 = vadd.f32 %v2150_v59, %v2038_v47  ;;  %v766_v63 = vpop.permute.xlu1 %765  ;;  %v2266_v18 = vpop.f32.mrf.mxu2  ;;  %456 = vst.msk [vmem:[#allocation3 + $0x270] sm:$0xff] %vm245_vm0, %v424_v6 }
 0x243   : > { %839 = vst.msk [vmem:[#allocation3 + $0x228] sm:$0xff] %vm815_vm3, %v766_v63  ;;  %v1813_v62 = vld [vmem:[#allocation3 + $0x218] sm:$0xff]  ;;  %v1603_v25 = vpop.permute.xlu2 %1602 }
 0x244   : > { %v1216_v3 = vpop.permute.xlu0 %1215  ;;  %v2264_v28 = vadd.f32 %v2263_v60, %v2151_v39  ;;  %1032 = vst.msk [vmem:[#allocation3 + $0x228] sm:$0xff] %vm1008_vm4, %v4321_v2  ;;  %2173 = vmatmul.f32.gmra.mxu1 %v1813_v62  ;;  %v1829_v39 = vld [vmem:[#allocation3 + $0x298] sm:$0xff] }
 0x245   : > { %1288 = vst.msk [vmem:[#allocation3 + $0x230] sm:$0xff] %vm622_vm2, %v1216_v3  ;;  %2786 = vmatmul.msk.f32.gmra.mxu2 %vm245_vm0, %v1829_v39 }
 0x246   : > { %v2331_v54 = vmax.f32 %v2264_v28, 0.0 }
 0x248   : > { %1422 = vrot.lane.b32.xlu1 %v1328_v4, %s2990_s13  ;;  %2805 = vmatmul.msk.f32.gmra.mxu3 %vm2355_vm5, %v2331_v54 }
 0x249   : > { %1614 = vrot.lane.b32.xlu2 %v1520_v5, %s2991_s15  ;;  %v2040_v15 = vpop.f32.mrf.mxu0 }
 0x24a   : > { %588 = vrot.lane.b32.xlu0 %v4266_v14, %s2989_s29  ;;  %v1409_v7 = vpop.permute.xlu1 %1408  ;;  %v2041_v58 = vadd.f32 %v4327_v9, %v2040_v15 }
 0x24b   : > { %1481 = vst.msk [vmem:[#allocation3 + $0x230] sm:$0xff] %vm815_vm3, %v1409_v7  ;;  %v2487_v45 = vpop.f32.mrf.mxu3  ;;  %v1815_v10 = vld [vmem:[#allocation3 + $0x228] sm:$0xff]  ;;  %v963_v36 = vpop.permute.xlu2 %962 }
 0x24c   : > { %v575_v41 = vpop.permute.xlu0 %574  ;;  %1673 = vst.msk [vmem:[#allocation3 + $0x230] sm:$0xff] %vm1008_vm4, %v1601_v38  ;;  %v2488_v12 = vadd.f32 %v4154_v19, %v2487_v45  ;;  %2063 = vmatmul.f32.gmra.mxu0 %v1815_v10 }
 0x24d   : > { %647 = vst.msk [vmem:[#allocation3 + $0x240] sm:$0xff] %vm622_vm2, %v575_v41  ;;  %v2574_v41 = vld [vmem:[%s3116_s25 + $0x48] sm:$0xff] }
 0x24e   : > { %v2603_v14 = vadd.f32 %v2571_v8, %v2488_v12 }
 0x250   : > { %2635 = vst.msk [vmem:[%s4180_s16 + $0x30] sm:$0xff] %vm245_vm0, %v2603_v14  ;;  %781 = vrot.lane.b32.xlu1 %v4268_v57, %s2990_s13 }
 0x251   : > { %v2153_v21 = vpop.f32.mrf.mxu1  ;;  %974 = vrot.lane.b32.xlu2 %v4344_v40, %s2991_s15  ;;  %v2269_v40 = vpop.f32.mrf.mxu2 }
 0x252   : > { %1231 = vrot.lane.b32.xlu0 %v4347_v27, %s2989_s29  ;;  %v2154_v20 = vadd.f32 %v2153_v21, %v2041_v58  ;;  %v768_v61 = vpop.permute.xlu1 %767  ;;  %v1832_v58 = vld [vmem:[#allocation3 + $0x2b0] sm:$0xff] }
 0x253   : > { %840 = vst.msk [vmem:[#allocation3 + $0x240] sm:$0xff] %vm815_vm3, %v768_v61  ;;  %v1816_v22 = vld [vmem:[#allocation3 + $0x230] sm:$0xff]  ;;  %v1605_v55 = vpop.permute.xlu2 %1604  ;;  %2787 = vmatmul.msk.f32.gmra.mxu2 %vm245_vm0, %v1832_v58 }
 0x254   : > { %v1218_v57 = vpop.permute.xlu0 %1217  ;;  %v2267_v11 = vadd.f32 %v2266_v18, %v2154_v20  ;;  %1033 = vst.msk [vmem:[#allocation3 + $0x240] sm:$0xff] %vm1008_vm4, %v961_v43  ;;  %2176 = vmatmul.f32.gmra.mxu1 %v1816_v22 }
 0x255   : > { %1289 = vst.msk [vmem:[#allocation3 + $0x248] sm:$0xff] %vm622_vm2, %v1218_v57 }
 0x256   : > { %v2332_v2 = vmax.f32 %v2267_v11, 0.0 }
 0x258   : > { %1424 = vrot.lane.b32.xlu1 %v1329_v23, %s2990_s13  ;;  %2806 = vmatmul.msk.f32.gmra.mxu3 %vm2355_vm5, %v2332_v2 }
 0x259   : > { %1616 = vrot.lane.b32.xlu2 %v1521_v24, %s2991_s15  ;;  %v2043_v17 = vpop.f32.mrf.mxu0  ;;  %v2272_v3 = vpop.f32.mrf.mxu2  ;;  %s2829_s15 = sshll.u32 %s3045_s22, 8 }
 0x25a   : > { %v1411_v53 = vpop.permute.xlu1 %1410  ;;  %v2044_v42 = vadd.f32 %v4327_v9, %v2043_v17  ;;  %v1835_v17 = vld [vmem:[#allocation3 + $0x2c8] sm:$0xff]  ;;  %s2673_s28 = scalar_lea.hbm %s4633_s5, %s2829_s15 }
 0x25b   : > { %1482 = vst.msk [vmem:[#allocation3 + $0x248] sm:$0xff] %vm815_vm3, %v1411_v53  ;;  %v2490_v56 = vpop.f32.mrf.mxu3  ;;  %v1818_v32 = vld [vmem:[#allocation3 + $0x240] sm:$0xff]  ;;  %v965_v37 = vpop.permute.xlu2 %964  ;;  %v2575_v53 = vld [vmem:[%s3116_s25 + $0x50] sm:$0xff]  ;;  %2788 = vmatmul.msk.f32.gmra.mxu2 %vm245_vm0, %v1835_v17  ;;  %s2676_s10 = sshll.u32 %s2673_s28, 4  ;;  %s2677_s10 = int_to_ptr.hbm [resolvable:$true] %s2676_s10 }
 0x25c   : > { %v577_v33 = vpop.permute.xlu0 %576  ;;  %1674 = vst.msk [vmem:[#allocation3 + $0x248] sm:$0xff] %vm1008_vm4, %v1603_v25  ;;  %v2491_v34 = vadd.f32 %v4154_v19, %v2490_v56  ;;  %2066 = vmatmul.f32.gmra.mxu0 %v1818_v32  ;;  %s2932_s11 = sshra.s32 %s2677_s10, 4  ;;  %s2933_s11 = int_to_ptr.hbm [resolvable:$true] %s2932_s11 }
 0x25d   : > { %648 = vst.msk [vmem:[#allocation3 + $0x258] sm:$0xff] %vm622_vm2, %v577_v33  ;;  %s2934_s22 = scalar_lea.hbm %s2933_s11, 256  ;;  %p2939_p0 = scmp.lt.s32.totalorder %s2933_s11, %s4633_s5 }
 0x25e   : > { %v2604_v0 = vadd.f32 %v2572_v30, %v2491_v34  ;;  %p2935_p6 = scmp.ne.s32.totalorder %s2933_s11, %s2934_s22  ;;  %p2940_p1 = scmp.lt.s32.totalorder %s2938_s17, %s2934_s22 }
 0x260   : > { %2636 = vst.msk [vmem:[%s4180_s16 + $0x38] sm:$0xff] %vm245_vm0, %v2604_v0  ;;  %p2936_p9 = pnand %p2935_p6, %p3074_p11  ;;  %p2941_p3 = por %p2940_p1, %p2939_p0 }
 0x261   : > { %v2156_v38 = vpop.f32.mrf.mxu1  ;;  %v2275_v18 = vpop.f32.mrf.mxu2 }
 0x262   : > { %v2157_v48 = vadd.f32 %v2156_v38, %v2044_v42  ;;  %v770_v27 = vpop.permute.xlu1 %769  ;;  %p2937_p13 = pneg %p2936_p9 }
 0x263   : > { %841 = vst.msk [vmem:[#allocation3 + $0x258] sm:$0xff] %vm815_vm3, %v770_v27  ;;  %v1819_v49 = vld [vmem:[#allocation3 + $0x248] sm:$0xff]  ;;  %v1607_v51 = vpop.permute.xlu2 %1606 }
 0x264   : > { %v1220_v29 = vpop.permute.xlu0 %1219  ;;  %v2270_v50 = vadd.f32 %v2269_v40, %v2157_v48  ;;  %1034 = vst.msk [vmem:[#allocation3 + $0x258] sm:$0xff] %vm1008_vm4, %v963_v36  ;;  %2179 = vmatmul.f32.gmra.mxu1 %v1819_v49  ;;  %p2942_p4 = pnand %p2941_p3, %p2937_p13 }
 0x265   : > { %1290 = vst.msk [vmem:[#allocation3 + $0x260] sm:$0xff] %vm622_vm2, %v1220_v29 }
 0x266   : > { %v2333_v52 = vmax.f32 %v2270_v50, 0.0  ;;  %v1712_v50 = vld [vmem:[#allocation2 + $0x19a] sm:$0xff] }
 0x267   : > { %1744 = vst.msk [vmem:[#allocation3 + $0x2e0] sm:$0xff] %vm245_vm0, %v1712_v50 }
 0x268   : > { %2807 = vmatmul.msk.f32.gmra.mxu3 %vm2355_vm5, %v2333_v52 }
 0x269   : > { %v2046_v35 = vpop.f32.mrf.mxu0  ;;  %v2278_v42 = vpop.f32.mrf.mxu2 }
 0x26a   : > { %v1413_v13 = vpop.permute.xlu1 %1412  ;;  %v2047_v63 = vadd.f32 %v4327_v9, %v2046_v35 }
 0x26b   : > { %1483 = vst.msk [vmem:[#allocation3 + $0x260] sm:$0xff] %vm815_vm3, %v1413_v13  ;;  %v2493_v43 = vpop.f32.mrf.mxu3  ;;  %v1821_v26 = vld [vmem:[#allocation3 + $0x258] sm:$0xff]  ;;  %v967_v60 = vpop.permute.xlu2 %966 }
 0x26c   : > { %v579_v46 = vpop.permute.xlu0 %578  ;;  %1675 = vst.msk [vmem:[#allocation3 + $0x260] sm:$0xff] %vm1008_vm4, %v1605_v55  ;;  %v2494_v47 = vadd.f32 %v4154_v19, %v2493_v43  ;;  %2069 = vmatmul.f32.gmra.mxu0 %v1821_v26  ;;  %v2576_v13 = vld [vmem:[%s3116_s25 + $0x58] sm:$0xff] }
 0x26d   : > { %649 = vst.msk [vmem:[#allocation3 + $0x270] sm:$0xff] %vm622_vm2, %v579_v46 }
 0x26e   : > { %v2605_v59 = vadd.f32 %v2573_v31, %v2494_v47  ;;  %v1838_v35 = vld [vmem:[#allocation3 + $0x2e0] sm:$0xff] }
 0x26f   : > { %2789 = vmatmul.msk.f32.gmra.mxu2 %vm245_vm0, %v1838_v35 }
 0x270   : > { %2637 = vst.msk [vmem:[%s4180_s16 + $0x40] sm:$0xff] %vm245_vm0, %v2605_v59 }
 0x271   : > { %v2159_v62 = vpop.f32.mrf.mxu1 }
 0x272   : > { %v2160_v28 = vadd.f32 %v2159_v62, %v2047_v63  ;;  %v772_v25 = vpop.permute.xlu1 %771  ;;  %v2281_v63 = vpop.f32.mrf.mxu2 }
 0x273   : > { %842 = vst.msk [vmem:[#allocation3 + $0x270] sm:$0xff] %vm815_vm3, %v772_v25  ;;  %v1822_v4 = vld [vmem:[#allocation3 + $0x260] sm:$0xff]  ;;  %v1609_v45 = vpop.permute.xlu2 %1608 }
 0x274   : > { %v1222_v54 = vpop.permute.xlu0 %1221  ;;  %v2273_v5 = vadd.f32 %v2272_v3, %v2160_v28  ;;  %1035 = vst.msk [vmem:[#allocation3 + $0x270] sm:$0xff] %vm1008_vm4, %v965_v37  ;;  %2182 = vmatmul.f32.gmra.mxu1 %v1822_v4 }
 0x275   : > { %1291 = vst.msk [vmem:[#allocation3 + $0x278] sm:$0xff] %vm622_vm2, %v1222_v54 }
 0x276   : > { %v2334_v7 = vmax.f32 %v2273_v5, 0.0  ;;  %v1713_v5 = vld [vmem:[#allocation2 + $0x1a2] sm:$0xff] }
 0x277   : > { %1745 = vst.msk [vmem:[#allocation3 + $0x2f8] sm:$0xff] %vm245_vm0, %v1713_v5 }
 0x278   : > { %2808 = vmatmul.msk.f32.gmra.mxu3 %vm2355_vm5, %v2334_v7 }
 0x279   : > { %v2049_v14 = vpop.f32.mrf.mxu0 }
 0x27a   : > { %v1415_v8 = vpop.permute.xlu1 %1414  ;;  %v2050_v6 = vadd.f32 %v4327_v9, %v2049_v14 }
 0x27b   : > { %1484 = vst.msk [vmem:[#allocation3 + $0x278] sm:$0xff] %vm815_vm3, %v1415_v8  ;;  %v2496_v10 = vpop.f32.mrf.mxu3  ;;  %v1824_v12 = vld [vmem:[#allocation3 + $0x270] sm:$0xff]  ;;  %v969_v22 = vpop.permute.xlu2 %968 }
 0x27c   : > { %v581_v36 = vpop.permute.xlu0 %580  ;;  %1676 = vst.msk [vmem:[#allocation3 + $0x278] sm:$0xff] %vm1008_vm4, %v1607_v51  ;;  %v2497_v15 = vadd.f32 %v4154_v19, %v2496_v10  ;;  %2072 = vmatmul.f32.gmra.mxu0 %v1824_v12  ;;  %v2577_v10 = vld [vmem:[%s3116_s25 + $0x60] sm:$0xff] }
 0x27d   : > { %650 = vst.msk [vmem:[#allocation3 + $0x288] sm:$0xff] %vm622_vm2, %v581_v36 }
 0x27e   : > { %v2606_v16 = vadd.f32 %v2574_v41, %v2497_v15 }
 0x280   : > { %2638 = vst.msk [vmem:[%s4180_s16 + $0x48] sm:$0xff] %vm245_vm0, %v2606_v16  ;;  %v1841_v16 = vld [vmem:[#allocation3 + $0x2f8] sm:$0xff] }
 0x281   : > { %v2162_v21 = vpop.f32.mrf.mxu1  ;;  %2790 = vmatmul.msk.f32.gmra.mxu2 %vm245_vm0, %v1841_v16 }
 0x282   : > { %v2163_v20 = vadd.f32 %v2162_v21, %v2050_v6  ;;  %v774_v61 = vpop.permute.xlu1 %773  ;;  %v2284_v21 = vpop.f32.mrf.mxu2 }
 0x283   : > { %843 = vst.msk [vmem:[#allocation3 + $0x288] sm:$0xff] %vm815_vm3, %v774_v61  ;;  %v1825_v57 = vld [vmem:[#allocation3 + $0x278] sm:$0xff]  ;;  %v1611_v33 = vpop.permute.xlu2 %1610 }
 0x284   : > { %v1224_v11 = vpop.permute.xlu0 %1223  ;;  %v2276_v55 = vadd.f32 %v2275_v18, %v2163_v20  ;;  %1036 = vst.msk [vmem:[#allocation3 + $0x288] sm:$0xff] %vm1008_vm4, %v967_v60  ;;  %2185 = vmatmul.f32.gmra.mxu1 %v1825_v57 }
 0x285   : > { %1292 = vst.msk [vmem:[#allocation3 + $0x290] sm:$0xff] %vm622_vm2, %v1224_v11 }
 0x286   : > { %v2335_v23 = vmax.f32 %v2276_v55, 0.0 }
 0x288   : > { %2809 = vmatmul.msk.f32.gmra.mxu3 %vm2355_vm5, %v2335_v23 }
 0x289   : > { %v2052_v34 = vpop.f32.mrf.mxu0 }
 0x28a   : > { %v1417_v2 = vpop.permute.xlu1 %1416  ;;  %v2053_v0 = vadd.f32 %v4327_v9, %v2052_v34 }
 0x28b   : > { %1485 = vst.msk [vmem:[#allocation3 + $0x290] sm:$0xff] %vm815_vm3, %v1417_v2  ;;  %v2499_v24 = vpop.f32.mrf.mxu3  ;;  %v1827_v56 = vld [vmem:[#allocation3 + $0x288] sm:$0xff]  ;;  %v971_v29 = vpop.permute.xlu2 %970 }
 0x28c   : > { %v583_v30 = vpop.permute.xlu0 %582  ;;  %1677 = vst.msk [vmem:[#allocation3 + $0x290] sm:$0xff] %vm1008_vm4, %v1609_v45  ;;  %v2500_v32 = vadd.f32 %v4154_v19, %v2499_v24  ;;  %2075 = vmatmul.f32.gmra.mxu0 %v1827_v56  ;;  %v2578_v24 = vld [vmem:[%s3116_s25 + $0x68] sm:$0xff] }
 0x28d   : > { %651 = vst.msk [vmem:[#allocation3 + $0x2a0] sm:$0xff] %vm622_vm2, %v583_v30 }
 0x28e   : > { %v2607_v37 = vadd.f32 %v2575_v53, %v2500_v32 }
 0x290   : > { %2639 = vst.msk [vmem:[%s4180_s16 + $0x50] sm:$0xff] %vm245_vm0, %v2607_v37 }
 0x291   : > { %v2165_v1 = vpop.f32.mrf.mxu1 }
 0x292   : > { %v2166_v44 = vadd.f32 %v2165_v1, %v2053_v0  ;;  %v776_v38 = vpop.permute.xlu1 %775  ;;  %v2287_v0 = vpop.f32.mrf.mxu2 }
 0x293   : > { %844 = vst.msk [vmem:[#allocation3 + $0x2a0] sm:$0xff] %vm815_vm3, %v776_v38  ;;  %v1828_v40 = vld [vmem:[#allocation3 + $0x290] sm:$0xff]  ;;  %v1613_v60 = vpop.permute.xlu2 %1612 }
 0x294   : > { %v1226_v48 = vpop.permute.xlu0 %1225  ;;  %v2279_v27 = vadd.f32 %v2278_v42, %v2166_v44  ;;  %1037 = vst.msk [vmem:[#allocation3 + $0x2a0] sm:$0xff] %vm1008_vm4, %v969_v22  ;;  %2188 = vmatmul.f32.gmra.mxu1 %v1828_v40 }
 0x295   : > { %1293 = vst.msk [vmem:[#allocation3 + $0x2a8] sm:$0xff] %vm622_vm2, %v1226_v48 }
 0x296   : > { %v2336_v49 = vmax.f32 %v2279_v27, 0.0 }
 0x298   : > { %2810 = vmatmul.msk.f32.gmra.mxu3 %vm2355_vm5, %v2336_v49 }
 0x299   : > { %v2055_v46 = vpop.f32.mrf.mxu0 }
 0x29a   : > { %v1419_v51 = vpop.permute.xlu1 %1418  ;;  %v2056_v59 = vadd.f32 %v4327_v9, %v2055_v46  ;;  %v2290_v46 = vpop.f32.mrf.mxu2 }
 0x29b   : > { %1486 = vst.msk [vmem:[#allocation3 + $0x2a8] sm:$0xff] %vm815_vm3, %v1419_v51  ;;  %v2502_v52 = vpop.f32.mrf.mxu3  ;;  %v1830_v43 = vld [vmem:[#allocation3 + $0x2a0] sm:$0xff]  ;;  %v973_v45 = vpop.permute.xlu2 %972  ;;  %v4503_v51 = vld [vmem:[%s4632_s4] ss:$0 sm:$0xff] }
 0x29c   : > { %v585_v31 = vpop.permute.xlu0 %584  ;;  %1678 = vst.msk [vmem:[#allocation3 + $0x2a8] sm:$0xff] %vm1008_vm4, %v1611_v33  ;;  %v2503_v26 = vadd.f32 %v4154_v19, %v2502_v52  ;;  %2078 = vmatmul.f32.gmra.mxu0 %v1830_v43 }
 0x29d   : > { %652 = vst.msk [vmem:[#allocation3 + $0x2b8] sm:$0xff] %vm622_vm2, %v585_v31 }
 0x29e   : > { %v2608_v47 = vadd.f32 %v2576_v13, %v2503_v26 }
 0x2a0   : > { %2640 = vst.msk [vmem:[%s4180_s16 + $0x58] sm:$0xff] %vm245_vm0, %v2608_v47 }
 0x2a1   : > { %v2168_v39 = vpop.f32.mrf.mxu1 }
 0x2a2   : > { %v2169_v62 = vadd.f32 %v2168_v39, %v2056_v59  ;;  %v778_v3 = vpop.permute.xlu1 %777 }
 0x2a3   : > { %845 = vst.msk [vmem:[#allocation3 + $0x2b8] sm:$0xff] %vm815_vm3, %v778_v3  ;;  %v1831_v28 = vld [vmem:[#allocation3 + $0x2a8] sm:$0xff]  ;;  %v1615_v11 = vpop.permute.xlu2 %1614 }
 0x2a4   : > { %v1228_v25 = vpop.permute.xlu0 %1227  ;;  %v2282_v4 = vadd.f32 %v2281_v63, %v2169_v62  ;;  %1038 = vst.msk [vmem:[#allocation3 + $0x2b8] sm:$0xff] %vm1008_vm4, %v971_v29  ;;  %2191 = vmatmul.f32.gmra.mxu1 %v1831_v28  ;;  %v2579_v29 = vld [vmem:[%s3116_s25 + $0x70] sm:$0xff]  ;;  %v2580_v63 = vld [vmem:[%s3116_s25 + $0x78] sm:$0xff] }
 0x2a5   : > { %1294 = vst.msk [vmem:[#allocation3 + $0x2c0] sm:$0xff] %vm622_vm2, %v1228_v25 }
 0x2a6   : > { %v2337_v54 = vmax.f32 %v2282_v4, 0.0 }
 0x2a8   : > { %2811 = vmatmul.msk.f32.gmra.mxu3 %vm2355_vm5, %v2337_v54 }
 0x2a9   : > { %v2058_v15 = vpop.f32.mrf.mxu0 }
 0x2aa   : > { %v1421_v7 = vpop.permute.xlu1 %1420  ;;  %v2059_v58 = vadd.f32 %v4327_v9, %v2058_v15 }
 0x2ab   : > { %1487 = vst.msk [vmem:[#allocation3 + $0x2c0] sm:$0xff] %vm815_vm3, %v1421_v7  ;;  %v2505_v8 = vpop.f32.mrf.mxu3  ;;  %v1833_v41 = vld [vmem:[#allocation3 + $0x2b8] sm:$0xff]  ;;  %v975_v34 = vpop.permute.xlu2 %974 }
 0x2ac   : > { %v587_v12 = vpop.permute.xlu0 %586  ;;  %1679 = vst.msk [vmem:[#allocation3 + $0x2c0] sm:$0xff] %vm1008_vm4, %v1613_v60  ;;  %v2506_v36 = vadd.f32 %v4154_v19, %v2505_v8  ;;  %2081 = vmatmul.f32.gmra.mxu0 %v1833_v41 }
 0x2ad   : > { %653 = vst.msk [vmem:[#allocation3 + $0x2d0] sm:$0xff] %vm622_vm2, %v587_v12 }
 0x2ae   : > { %v2609_v14 = vadd.f32 %v2577_v10, %v2506_v36  ;;  %v2581_v10 = vld [vmem:[%s3116_s25 + $0x80] sm:$0xff] }
 0x2b0   : > { %2641 = vst.msk [vmem:[%s4180_s16 + $0x60] sm:$0xff] %vm245_vm0, %v2609_v14  ;;  %v2293_v54 = vpop.f32.mrf.mxu2 }
 0x2b1   : > { %v2171_v6 = vpop.f32.mrf.mxu1 }
 0x2b2   : > { %v2172_v18 = vadd.f32 %v2171_v6, %v2059_v58  ;;  %v780_v20 = vpop.permute.xlu1 %779 }
 0x2b3   : > { %846 = vst.msk [vmem:[#allocation3 + $0x2d0] sm:$0xff] %vm815_vm3, %v780_v20  ;;  %v1834_v61 = vld [vmem:[#allocation3 + $0x2c0] sm:$0xff]  ;;  %v1617_v48 = vpop.permute.xlu2 %1616  ;;  %v2582_v20 = vld [vmem:[%s3116_s25 + $0x88] sm:$0xff] }
 0x2b4   : > { %v1230_v22 = vpop.permute.xlu0 %1229  ;;  %v2285_v57 = vadd.f32 %v2284_v21, %v2172_v18  ;;  %1039 = vst.msk [vmem:[#allocation3 + $0x2d0] sm:$0xff] %vm1008_vm4, %v973_v45  ;;  %2194 = vmatmul.f32.gmra.mxu1 %v1834_v61 }
 0x2b5   : > { %1295 = vst.msk [vmem:[#allocation3 + $0x2d8] sm:$0xff] %vm622_vm2, %v1230_v22 }
 0x2b6   : > { %v2338_v55 = vmax.f32 %v2285_v57, 0.0 }
 0x2b8   : > { %2812 = vmatmul.msk.f32.gmra.mxu3 %vm2355_vm5, %v2338_v55  ;;  %v2296_v16 = vpop.f32.mrf.mxu2 }
 0x2b9   : > { %v2061_v32 = vpop.f32.mrf.mxu0 }
 0x2ba   : > { %v1423_v23 = vpop.permute.xlu1 %1422  ;;  %v2062_v37 = vadd.f32 %v4327_v9, %v2061_v32 }
 0x2bb   : > { %1488 = vst.msk [vmem:[#allocation3 + $0x2d8] sm:$0xff] %vm815_vm3, %v1423_v23  ;;  %v2508_v2 = vpop.f32.mrf.mxu3  ;;  %v1836_v53 = vld [vmem:[#allocation3 + $0x2d0] sm:$0xff] }
 0x2bc   : > { %v589_v56 = vpop.permute.xlu0 %588  ;;  %1680 = vst.msk [vmem:[#allocation3 + $0x2d8] sm:$0xff] %vm1008_vm4, %v1615_v11  ;;  %v2509_v30 = vadd.f32 %v4154_v19, %v2508_v2  ;;  %2084 = vmatmul.f32.gmra.mxu0 %v1836_v53 }
 0x2bd   : > { %654 = vst.msk [vmem:[#allocation3 + $0x2e8] sm:$0xff] %vm622_vm2, %v589_v56 }
 0x2be   : > { %v2610_v33 = vadd.f32 %v2578_v24, %v2509_v30  ;;  %v2583_v30 = vld [vmem:[%s3116_s25 + $0x90] sm:$0xff] }
 0x2c0   : > { %2642 = vst.msk [vmem:[%s4180_s16 + $0x68] sm:$0xff] %vm245_vm0, %v2610_v33  ;;  %v2299_v23 = vpop.f32.mrf.mxu2 }
 0x2c1   : > { %v2174_v17 = vpop.f32.mrf.mxu1 }
 0x2c2   : > { %v2175_v1 = vadd.f32 %v2174_v17, %v2062_v37  ;;  %v782_v42 = vpop.permute.xlu1 %781 }
 0x2c3   : > { %847 = vst.msk [vmem:[#allocation3 + $0x2e8] sm:$0xff] %vm815_vm3, %v782_v42  ;;  %v1837_v44 = vld [vmem:[#allocation3 + $0x2d8] sm:$0xff] }
 0x2c4   : > { %v1232_v38 = vpop.permute.xlu0 %1231  ;;  %v2288_v19 = vadd.f32 %v2287_v0, %v2175_v1  ;;  %1040 = vst.msk [vmem:[#allocation3 + $0x2e8] sm:$0xff] %vm1008_vm4, %v975_v34  ;;  %2197 = vmatmul.f32.gmra.mxu1 %v1837_v44 }
 0x2c5   : > { %1296 = vst.msk [vmem:[#allocation3 + $0x2f0] sm:$0xff] %vm622_vm2, %v1232_v38 }
 0x2c6   : > { %v2339_v40 = vmax.f32 %v2288_v19, 0.0  ;;  %v2584_v19 = vld [vmem:[%s3116_s25 + $0x98] sm:$0xff] }
 0x2c8   : > { %2813 = vmatmul.msk.f32.gmra.mxu3 %vm2355_vm5, %v2339_v40  ;;  %v2302_v0 = vpop.f32.mrf.mxu2 }
 0x2c9   : > { %v2064_v13 = vpop.f32.mrf.mxu0 }
 0x2ca   : > { %v1425_v27 = vpop.permute.xlu1 %1424  ;;  %v2065_v31 = vadd.f32 %v4327_v9, %v2064_v13 }
 0x2cb   : > { %1489 = vst.msk [vmem:[#allocation3 + $0x2f0] sm:$0xff] %vm815_vm3, %v1425_v27  ;;  %v2511_v49 = vpop.f32.mrf.mxu3  ;;  %v1839_v50 = vld [vmem:[#allocation3 + $0x2e8] sm:$0xff] }
 0x2cc   : > { %1681 = vst.msk [vmem:[#allocation3 + $0x2f0] sm:$0xff] %vm1008_vm4, %v1617_v48  ;;  %v2512_v52 = vadd.f32 %v4503_v51, %v2511_v49  ;;  %2087 = vmatmul.f32.gmra.mxu0 %v1839_v50 }
 0x2ce   : > { %v2611_v43 = vadd.f32 %v2579_v29, %v2512_v52 }
 0x2d0   : > { %2643 = vst.msk [vmem:[%s4180_s16 + $0x70] sm:$0xff] %vm245_vm0, %v2611_v43 }
 0x2d1   : > { %v2177_v26 = vpop.f32.mrf.mxu1 }
 0x2d2   : > { %v2178_v47 = vadd.f32 %v2177_v26, %v2065_v31  ;;  %v2585_v26 = vld [vmem:[%s3116_s25 + $0xa0] sm:$0xff] }
 0x2d3   : > { %v1840_v35 = vld [vmem:[#allocation3 + $0x2f0] sm:$0xff] }
 0x2d4   : > { %v2291_v59 = vadd.f32 %v2290_v46, %v2178_v47  ;;  %2200 = vmatmul.f32.gmra.mxu1 %v1840_v35 }
 0x2d6   : > { %v2340_v60 = vmax.f32 %v2291_v59, 0.0  ;;  %v2305_v50 = vpop.f32.mrf.mxu2 }
 0x2d8   : > { %2814 = vmatmul.msk.f32.gmra.mxu3 %vm2355_vm5, %v2340_v60 }
 0x2d9   : > { %v2067_v3 = vpop.f32.mrf.mxu0 }
 0x2da   : > { %v2068_v25 = vadd.f32 %v4327_v9, %v2067_v3 }
 0x2db   : > { %v2514_v39 = vpop.f32.mrf.mxu3 }
 0x2dc   : > { %v2515_v62 = vadd.f32 %v4503_v51, %v2514_v39 }
 0x2de   : > { %v2612_v28 = vadd.f32 %v2580_v63, %v2515_v62  ;;  %v2308_v39 = vpop.f32.mrf.mxu2 }
 0x2e0   : > { %2644 = vst.msk [vmem:[%s4180_s16 + $0x78] sm:$0xff] %vm245_vm0, %v2612_v28 }
 0x2e1   : > { %v2180_v4 = vpop.f32.mrf.mxu1 }
 0x2e2   : > { %v2181_v5 = vadd.f32 %v2180_v4, %v2068_v25  ;;  %v2586_v25 = vld [vmem:[%s3116_s25 + $0xa8] sm:$0xff] }
 0x2e4   : > { %v2294_v7 = vadd.f32 %v2293_v54, %v2181_v5 }
 0x2e6   : > { %v2341_v45 = vmax.f32 %v2294_v7, 0.0 }
 0x2e8   : > { %2815 = vmatmul.msk.f32.gmra.mxu3 %vm2355_vm5, %v2341_v45 }
 0x2e9   : > { %v2070_v12 = vpop.f32.mrf.mxu0 }
 0x2ea   : > { %v2071_v15 = vadd.f32 %v4327_v9, %v2070_v12 }
 0x2eb   : > { %v2517_v8 = vpop.f32.mrf.mxu3 }
 0x2ec   : > { %v2518_v41 = vadd.f32 %v4503_v51, %v2517_v8 }
 0x2ee   : > { %v2613_v36 = vadd.f32 %v2581_v10, %v2518_v41 }
 0x2f0   : > { %2645 = vst.msk [vmem:[%s4180_s16 + $0x80] sm:$0xff] %vm245_vm0, %v2613_v36 }
 0x2f1   : > { %v2183_v14 = vpop.f32.mrf.mxu1 }
 0x2f2   : > { %v2184_v58 = vadd.f32 %v2183_v14, %v2071_v15  ;;  %v2311_v8 = vpop.f32.mrf.mxu2  ;;  %v2587_v15 = vld [vmem:[%s3116_s25 + $0xb0] sm:$0xff] }
 0x2f4   : > { %v2297_v6 = vadd.f32 %v2296_v16, %v2184_v58 }
 0x2f6   : > { %v2342_v21 = vmax.f32 %v2297_v6, 0.0 }
 0x2f8   : > { %2816 = vmatmul.msk.f32.gmra.mxu3 %vm2355_vm5, %v2342_v21 }
 0x2f9   : > { %v2073_v22 = vpop.f32.mrf.mxu0 }
 0x2fa   : > { %v2074_v11 = vadd.f32 %v4327_v9, %v2073_v22 }
 0x2fb   : > { %v2520_v18 = vpop.f32.mrf.mxu3 }
 0x2fc   : > { %v2521_v61 = vadd.f32 %v4503_v51, %v2520_v18 }
 0x2fe   : > { %v2614_v57 = vadd.f32 %v2582_v20, %v2521_v61 }
 0x300   : > { %2646 = vst.msk [vmem:[%s4180_s16 + $0x88] sm:$0xff] %vm245_vm0, %v2614_v57 }
 0x301   : > { %v2186_v55 = vpop.f32.mrf.mxu1 }
 0x302   : > { %v2187_v2 = vadd.f32 %v2186_v55, %v2074_v11  ;;  %v2588_v11 = vld [vmem:[%s3116_s25 + $0xb8] sm:$0xff] }
 0x304   : > { %v2300_v24 = vadd.f32 %v2299_v23, %v2187_v2  ;;  %v2314_v18 = vpop.f32.mrf.mxu2  ;;  %v2589_v2 = vld [vmem:[%s3116_s25 + $0xc0] sm:$0xff] }
 0x306   : > { %v2343_v53 = vmax.f32 %v2300_v24, 0.0 }
 0x308   : > { %2817 = vmatmul.msk.f32.gmra.mxu3 %vm2355_vm5, %v2343_v53 }
 0x309   : > { %v2076_v33 = vpop.f32.mrf.mxu0 }
 0x30a   : > { %v2077_v37 = vadd.f32 %v4327_v9, %v2076_v33 }
 0x30b   : > { %v2523_v56 = vpop.f32.mrf.mxu3 }
 0x30c   : > { %v2524_v32 = vadd.f32 %v4503_v51, %v2523_v56 }
 0x30e   : > { %v2615_v34 = vadd.f32 %v2583_v30, %v2524_v32  ;;  %v2590_v30 = vld [vmem:[%s3116_s25 + $0xc8] sm:$0xff] }
 0x310   : > { %2647 = vst.msk [vmem:[%s4180_s16 + $0x90] sm:$0xff] %vm245_vm0, %v2615_v34 }
 0x311   : > { %v2189_v17 = vpop.f32.mrf.mxu1 }
 0x312   : > { %v2190_v1 = vadd.f32 %v2189_v17, %v2077_v37  ;;  %v2591_v37 = vld [vmem:[%s3116_s25 + $0xd0] sm:$0xff] }
 0x314   : > { %v2303_v42 = vadd.f32 %v2302_v0, %v2190_v1 }
 0x316   : > { %v2344_v44 = vmax.f32 %v2303_v42, 0.0  ;;  %v2592_v42 = vld [vmem:[%s3116_s25 + $0xd8] sm:$0xff] }
 0x318   : > { %2818 = vmatmul.msk.f32.gmra.mxu3 %vm2355_vm5, %v2344_v44 }
 0x319   : > { %v2079_v48 = vpop.f32.mrf.mxu0 }
 0x31a   : > { %v2080_v49 = vadd.f32 %v4327_v9, %v2079_v48 }
 0x31b   : > { %v2526_v38 = vpop.f32.mrf.mxu3 }
 0x31c   : > { %v2527_v40 = vadd.f32 %v4503_v51, %v2526_v38 }
 0x31e   : > { %v2616_v27 = vadd.f32 %v2584_v19, %v2527_v40  ;;  %v2593_v40 = vld [vmem:[%s3116_s25 + $0xe0] sm:$0xff] }
 0x320   : > { %2648 = vst.msk [vmem:[%s4180_s16 + $0x98] sm:$0xff] %vm245_vm0, %v2616_v27 }
 0x321   : > { %v2192_v29 = vpop.f32.mrf.mxu1 }
 0x322   : > { %v2193_v52 = vadd.f32 %v2192_v29, %v2080_v49  ;;  %v2594_v29 = vld [vmem:[%s3116_s25 + $0xe8] sm:$0xff] }
 0x324   : > { %v2306_v13 = vadd.f32 %v2305_v50, %v2193_v52 }
 0x326   : > { %v2345_v43 = vmax.f32 %v2306_v13, 0.0 }
 0x328   : > { %2819 = vmatmul.msk.f32.gmra.mxu3 %vm2355_vm5, %v2345_v43  ;;  %v2595_v43 = vld [vmem:[%s3116_s25 + $0xf0] sm:$0xff] }
 0x329   : > { %v2082_v47 = vpop.f32.mrf.mxu0 }
 0x32a   : > { %v2083_v59 = vadd.f32 %v4327_v9, %v2082_v47  ;;  %v2596_v47 = vld [vmem:[%s3116_s25 + $0xf8] sm:$0xff] }
 0x32b   : > { %v2529_v31 = vpop.f32.mrf.mxu3 }
 0x32c   : > { %v2530_v46 = vadd.f32 %v4503_v51, %v2529_v31 }
 0x32e   : > { %v2617_v35 = vadd.f32 %v2585_v26, %v2530_v46 }
 0x330   : > { %2649 = vst.msk [vmem:[%s4180_s16 + $0xa0] sm:$0xff] %vm245_vm0, %v2617_v35 }
 0x331   : > { %v2195_v60 = vpop.f32.mrf.mxu1 }
 0x332   : > { %v2196_v63 = vadd.f32 %v2195_v60, %v2083_v59 }
 0x334   : > { %v2309_v62 = vadd.f32 %v2308_v39, %v2196_v63 }
 0x336   : > { %v2346_v3 = vmax.f32 %v2309_v62, 0.0 }
 0x338   : > { %2820 = vmatmul.msk.f32.gmra.mxu3 %vm2355_vm5, %v2346_v3 }
 0x339   : > { %v2085_v54 = vpop.f32.mrf.mxu0 }
 0x33a   : > { %v2086_v7 = vadd.f32 %v4327_v9, %v2085_v54 }
 0x33b   : > { %v2532_v28 = vpop.f32.mrf.mxu3 }
 0x33c   : > { %v2533_v4 = vadd.f32 %v4503_v51, %v2532_v28 }
 0x33e   : > { %v2618_v5 = vadd.f32 %v2586_v25, %v2533_v4 }
 0x340   : > { %2650 = vst.msk [vmem:[%s4180_s16 + $0xa8] sm:$0xff] %vm245_vm0, %v2618_v5 }
 0x341   : > { %v2198_v45 = vpop.f32.mrf.mxu1 }
 0x342   : > { %v2199_v10 = vadd.f32 %v2198_v45, %v2086_v7 }
 0x344   : > { %v2312_v41 = vadd.f32 %v2311_v8, %v2199_v10 }
 0x346   : > { %v2347_v12 = vmax.f32 %v2312_v41, 0.0 }
 0x348   : > { %2821 = vmatmul.msk.f32.gmra.mxu3 %vm2355_vm5, %v2347_v12 }
 0x349   : > { %v2088_v16 = vpop.f32.mrf.mxu0 }
 0x34a   : > { %v2089_v6 = vadd.f32 %v4327_v9, %v2088_v16 }
 0x34b   : > { %v2535_v36 = vpop.f32.mrf.mxu3 }
 0x34c   : > { %v2536_v14 = vadd.f32 %v4503_v51, %v2535_v36 }
 0x34e   : > { %v2619_v58 = vadd.f32 %v2587_v15, %v2536_v14 }
 0x350   : > { %2651 = vst.msk [vmem:[%s4180_s16 + $0xb0] sm:$0xff] %vm245_vm0, %v2619_v58 }
 0x351   : > { %v2201_v21 = vpop.f32.mrf.mxu1 }
 0x352   : > { %v2202_v20 = vadd.f32 %v2201_v21, %v2089_v6 }
 0x354   : > { %v2315_v61 = vadd.f32 %v2314_v18, %v2202_v20 }
 0x356   : > { %v2348_v22 = vmax.f32 %v2315_v61, 0.0 }
 0x358   : > { %2822 = vmatmul.msk.f32.gmra.mxu3 %vm2355_vm5, %v2348_v22 }
 0x35b   : > { %v2538_v57 = vpop.f32.mrf.mxu3 }
 0x35c   : > { %v2539_v55 = vadd.f32 %v4503_v51, %v2538_v57 }
 0x35e   : > { %v2620_v23 = vadd.f32 %v2588_v11, %v2539_v55 }
 0x360   : > { %2652 = vst.msk [vmem:[%s4180_s16 + $0xb8] sm:$0xff] %vm245_vm0, %v2620_v23 }
 0x36b   : > { %v2541_v9 = vpop.f32.mrf.mxu3 }
 0x36c   : > { %v2542_v24 = vadd.f32 %v4503_v51, %v2541_v9 }
 0x36e   : > { %v2621_v53 = vadd.f32 %v2589_v2, %v2542_v24 }
 0x370   : > { %2653 = vst.msk [vmem:[%s4180_s16 + $0xc0] sm:$0xff] %vm245_vm0, %v2621_v53 }
 0x37b   : > { %v2544_v56 = vpop.f32.mrf.mxu3 }
 0x37c   : > { %v2545_v32 = vadd.f32 %v4503_v51, %v2544_v56 }
 0x37e   : > { %v2622_v33 = vadd.f32 %v2590_v30, %v2545_v32 }
 0x380   : > { %2654 = vst.msk [vmem:[%s4180_s16 + $0xc8] sm:$0xff] %vm245_vm0, %v2622_v33 }
 0x38b   : > { %v2547_v34 = vpop.f32.mrf.mxu3 }
 0x38c   : > { %v2548_v17 = vadd.f32 %v4503_v51, %v2547_v34 }
 0x38e   : > { %v2623_v0 = vadd.f32 %v2591_v37, %v2548_v17 }
 0x390   : > { %2655 = vst.msk [vmem:[%s4180_s16 + $0xd0] sm:$0xff] %vm245_vm0, %v2623_v0 }
 0x39b   : > { %v2550_v1 = vpop.f32.mrf.mxu3 }
 0x39c   : > { %v2551_v44 = vadd.f32 %v4503_v51, %v2550_v1 }
 0x39e   : > { %v2624_v38 = vadd.f32 %v2592_v42, %v2551_v44 }
 0x3a0   : > { %2656 = vst.msk [vmem:[%s4180_s16 + $0xd8] sm:$0xff] %vm245_vm0, %v2624_v38 }
 0x3ab   : > { %v2553_v19 = vpop.f32.mrf.mxu3 }
 0x3ac   : > { %v2554_v48 = vadd.f32 %v4503_v51, %v2553_v19 }
 0x3ae   : > { %v2625_v27 = vadd.f32 %v2593_v40, %v2554_v48 }
 0x3b0   : > { %2657 = vst.msk [vmem:[%s4180_s16 + $0xe0] sm:$0xff] %vm245_vm0, %v2625_v27 }
 0x3bb   : > { %v2556_v49 = vpop.f32.mrf.mxu3 }
 0x3bc   : > { %v2557_v50 = vadd.f32 %v4503_v51, %v2556_v49 }
 0x3be   : > { %v2626_v52 = vadd.f32 %v2594_v29, %v2557_v50 }
 0x3c0   : > { %2658 = vst.msk [vmem:[%s4180_s16 + $0xe8] sm:$0xff] %vm245_vm0, %v2626_v52 }
 0x3cb   : > { %v2559_v13 = vpop.f32.mrf.mxu3 }
 0x3cc   : > { %v2560_v31 = vadd.f32 %v4503_v51, %v2559_v13 }
 0x3ce   : > { %v2627_v26 = vadd.f32 %v2595_v43, %v2560_v31 }
 0x3d0   : > { %2659 = vst.msk [vmem:[%s4180_s16 + $0xf0] sm:$0xff] %vm245_vm0, %v2627_v26 }
 0x3db   : > { %v2562_v46 = vpop.f32.mrf.mxu3 }
 0x3dc   : > { %v2563_v35 = vadd.f32 %v4503_v51, %v2562_v46 }
 0x3de   : > { %v2628_v59 = vadd.f32 %v2596_v47, %v2563_v35 }
 0x3e0   : > { %2660 = vst.msk [vmem:[%s4180_s16 + $0xf8] sm:$0xff] %vm245_vm0, %v2628_v59 }
 0x3e1   : > { %2945 = shalt.err (!%p2942_p4)
}
 0x3e2   : > { %s2992_s12 = smov 128   ;;  %s2993_s16 = smov 8  }
 0x3e3   : > { %2832 = dma.vmem_to_hbm [thread:$0]  (%p3074_p11), %s2675_s9, 4096, %s2677_s10, %s2662_s7, %s2992_s12, %s2992_s12, %s2993_s16  }
 0x3e4 PF: > { %s2691_s13 = sand.u32 1, %s2972_s18   ;;  %p4639_p7 = scmp.ge.s32.totalorder %s2984_s21, 2 }
 0x3e5   : > { %s2692_s15 = scalar_lea.sflag [#allocation6], %s2691_s13 }
 0x3e6   : > { %p2839_p5 = pnand %p4639_p7, %p3078_p12 }
 0x3e8   : > { %p2840_p8 = pneg %p2839_p5 }
 0x3ea   : > { %2967 = dma.done.wait (%p2840_p8), %s2692_s15, 4096  }
 0x3eb   : > { %2969 = vsyncadd (%p2840_p8), %s2692_s15, 4294963200  ;;  %p18_p10 = scmp.ge.s32.totalorder %s3049_s24, 4   ;;  %s4640_s18 = smov %s2976_s19 }
 0x3ec   : > { %s4641_s19 = smov %s2980_s20  ;;  %s4642_s20 = smov %s3061_s27 }
 0x3ed   : > { %s4643_s21 = smov %s3049_s24  ;;  %20 = sbr.rel (!%p18_p10) target bundleno = 5 (0x5), region = 87 }
 0x3f2   :  { %2698 = vsyncpa [#allocation5], 1 }
 0x3f3   :  { %2700 = vsyncpa [#allocation5 + $0x1], 1 }
 0x3f4   :  { %2701 = vsyncpa [#allocation6], 1 }
 0x3f5   :  { %2703 = vsyncpa [#allocation6 + $0x1], 1 }

</bundles_post_ra>
